<compile_context>
chip_gen: v7x
topology: tpu7x:2x2x1
jax: 0.10.0
libtpu: 0.0.40
codegen_flags: <defaults>
</compile_context>

<pallas_src>
import functools

import jax
import jax.numpy as jnp
from jax.experimental import pallas as pl
from jax.experimental.pallas import tpu as pltpu


def _sepconv_kernel(x_ref, dw_ref, dwb_ref, g_ref, beta_ref,
                    w1_ref, b1_ref, w2_ref, b2_ref,
                    o_ref, xpad_ref, *, th, W, C, eps):
    """Fused SepConv forward for one (batch, row-tile) grid step.

    x_ref    : (H, W, C)      full NHWC image of this batch element (batch dim squeezed)
    dw_ref   : (9, C)         depthwise 3x3 taps, tap k = 3*dy + dx
    dwb_ref  : (1, C)         depthwise conv bias
    g_ref    : (1, C)         LayerNorm weight  (shared, used twice)
    beta_ref : (1, C)         LayerNorm bias    (shared, used twice)
    w1_ref   : (C, 4C)        pwconv1 weight (transposed), bf16 for the MXU
    b1_ref   : (1, 4C)        pwconv1 bias (f32)
    w2_ref   : (4C, C)        pwconv2 weight (transposed), bf16 for the MXU
    b2_ref   : (1, C)         pwconv2 bias (f32)
    o_ref    : (th, W, C)     output row tile
    xpad_ref : (th+2, W+2, C) f32 scratch: zero-padded window for the 3x3 depthwise conv
    """
    t = pl.program_id(1)
    row0 = pl.multiple_of(t * th, th)

    # ---- build the zero-padded (th+2, W+2, C) window in VMEM (no host-side pad) ------
    xpad_ref[...] = jnp.zeros_like(xpad_ref)
    xpad_ref[1:th + 1, 1:W + 1, :] = x_ref[pl.ds(row0, th), :, :].astype(jnp.float32)

    @pl.when(t > 0)
    def _top_halo():
        xpad_ref[0:1, 1:W + 1, :] = x_ref[pl.ds(row0 - 1, 1), :, :].astype(jnp.float32)

    @pl.when(t < pl.num_programs(1) - 1)
    def _bottom_halo():
        xpad_ref[th + 1:th + 2, 1:W + 1, :] = (
            x_ref[pl.ds(row0 + th, 1), :, :].astype(jnp.float32))

    # ---- depthwise 3x3 conv: groups == C  ->  9 shifted per-channel FMAs on the VPU ---
    acc = jnp.zeros((th, W, C), jnp.float32)
    for dy in range(3):
        for dx in range(3):
            k = dy * 3 + dx
            tap = dw_ref[k:k + 1, :].reshape(1, 1, C)          # loaded once per tap
            acc = acc + xpad_ref[dy:dy + th, dx:dx + W, :] * tap
    h = acc.reshape(th * W, C) + dwb_ref[...]                  # (rows, C)

    # shared LayerNorm affine params: loaded / broadcast exactly once, used twice
    gamma = g_ref[...]
    beta = beta_ref[...]
    inv_c = 1.0 / C

    def layernorm(v):                                          # one-pass stats over lanes
        s1 = jnp.sum(v, axis=-1, keepdims=True)
        s2 = jnp.sum(v * v, axis=-1, keepdims=True)
        mean = s1 * inv_c
        var = s2 * inv_c - mean * mean
        return (v - mean) * jax.lax.rsqrt(var + eps) * gamma + beta

    def gelu(v):                                               # exact GELU (matches nn.GELU())
        return 0.5 * v * (1.0 + jax.lax.erf(v * 0.7071067811865476))

    y = gelu(layernorm(h))

    # pointwise convs == dense layers over channels -> MXU matmuls, bf16 in / f32 accumulate
    y = jnp.dot(y.astype(w1_ref.dtype), w1_ref[...],
                preferred_element_type=jnp.float32) + b1_ref[...]
    y = gelu(y)
    y = jnp.dot(y.astype(w2_ref.dtype), w2_ref[...],
                preferred_element_type=jnp.float32) + b2_ref[...]

    y = gelu(layernorm(y))                                     # same norm module again
    o_ref[...] = y.reshape(th, W, C).astype(o_ref.dtype)       # lane-dense (C last) store


def _pick_row_tile(H):
    # prefer a multiple of the 8-row sublane tile that still yields >= 2 row tiles
    for th in (64, 32, 16, 8):
        if H % th == 0 and H // th >= 2:
            return th
    return H


def sepconv_forward(params, x_nchw, *, row_tile=None, mxu_dtype=jnp.bfloat16, eps=1e-6):
    """SepConv.forward.  NCHW in / NCHW out, matching the PyTorch module interface."""
    N, C, H, W = x_nchw.shape
    th = row_tile if row_tile is not None else _pick_row_tile(H)
    assert H % th == 0, (H, th)
    nt = H // th

    x = jnp.transpose(x_nchw, (0, 2, 3, 1))                    # NCHW -> NHWC (C on lanes)

    dw = params["dw"].reshape(9, C).astype(jnp.float32)        # (3,3,C) -> (9,C)
    dwb = params["dwb"].reshape(1, C).astype(jnp.float32)
    gamma = params["gamma"].reshape(1, C).astype(jnp.float32)
    beta = params["beta"].reshape(1, C).astype(jnp.float32)
    w1 = params["w1"].astype(mxu_dtype)                        # (C, 4C)  == pwconv1.weight.T
    b1 = params["b1"].reshape(1, 4 * C).astype(jnp.float32)
    w2 = params["w2"].astype(mxu_dtype)                        # (4C, C)  == pwconv2.weight.T
    b2 = params["b2"].reshape(1, C).astype(jnp.float32)

    # Explicit VMEM budget (double-buffered input image + output row tile + bf16 weights
    # + padded dwconv window + headroom for the f32 (rows, 4C) hidden values).  Stays far
    # under v7x's 64 MiB physical VMEM at these block sizes.
    itm = jnp.dtype(mxu_dtype).itemsize
    est = (2 * H * W * C * 4
           + 2 * th * W * C * 4
           + 2 * (C * 4 * C + 4 * C * C) * itm
           + (th + 2) * (W + 2) * C * 4
           + 4 * th * W * 4 * C * 4)
    vmem_limit = int(min(max(2 * est, 8 << 20), 48 << 20))

    kern = functools.partial(_sepconv_kernel, th=th, W=W, C=C, eps=eps)
    y = pl.pallas_call(
        kern,
        out_shape=jax.ShapeDtypeStruct((N, H, W, C), x_nchw.dtype),
        grid=(N, nt),
        in_specs=[
            # Whole image per batch element; the block index ignores the row-tile axis,
            # so Pallas fetches it once per batch element and reuses the buffer across t.
            # TODO(synk): for very large H*W*C, switch to halo-row manual DMA so the
            # per-step input VMEM stays bounded by the row tile.
            pl.BlockSpec((None, H, W, C), lambda n, t: (n, 0, 0, 0)),
            pl.BlockSpec((9, C), lambda n, t: (0, 0)),
            pl.BlockSpec((1, C), lambda n, t: (0, 0)),
            pl.BlockSpec((1, C), lambda n, t: (0, 0)),
            pl.BlockSpec((1, C), lambda n, t: (0, 0)),
            pl.BlockSpec((C, 4 * C), lambda n, t: (0, 0)),
            pl.BlockSpec((1, 4 * C), lambda n, t: (0, 0)),
            pl.BlockSpec((4 * C, C), lambda n, t: (0, 0)),
            pl.BlockSpec((1, C), lambda n, t: (0, 0)),
        ],
        out_specs=pl.BlockSpec((None, th, W, C), lambda n, t: (n, t, 0, 0)),
        scratch_shapes=[pltpu.VMEM((th + 2, W + 2, C), jnp.float32)],
        compiler_params=pltpu.CompilerParams(
            dimension_semantics=("parallel", "parallel"),
            vmem_limit_bytes=vmem_limit),
    )(x, dw, dwb, gamma, beta, w1, b1, w2, b2)

    return jnp.transpose(y, (0, 3, 1, 2))                      # NHWC -> NCHW


# ----------------------------- pure-JAX f32 reference ---------------------------------

def _gelu(v):
    return 0.5 * v * (1.0 + jax.lax.erf(v * 0.7071067811865476))


def sepconv_ref(params, x_nchw, eps=1e-6):
    x = jnp.transpose(x_nchw, (0, 2, 3, 1)).astype(jnp.float32)
    N, H, W, C = x.shape
    xp = jnp.pad(x, ((0, 0), (1, 1), (1, 1), (0, 0)))
    dw = params["dw"]                                          # (3, 3, C)
    y = jnp.zeros_like(x)
    for dy in range(3):
        for dx in range(3):
            y = y + xp[:, dy:dy + H, dx:dx + W, :] * dw[dy, dx]
    y = y + params["dwb"]

    def ln(v):
        m = jnp.mean(v, axis=-1, keepdims=True)
        c = v - m
        var = jnp.mean(c * c, axis=-1, keepdims=True)
        return c * jax.lax.rsqrt(var + eps) * params["gamma"] + params["beta"]

    y = _gelu(ln(y))
    y = _gelu(y @ params["w1"] + params["b1"])
    y = y @ params["w2"] + params["b2"]
    y = _gelu(ln(y))
    return jnp.transpose(y, (0, 3, 1, 2))


def init_params(key, dim):
    ks = jax.random.split(key, 6)
    tn = lambda k, shape, std: std * jax.random.truncated_normal(
        k, -2.0, 2.0, shape, jnp.float32)
    return dict(
        dw=tn(ks[0], (3, 3, dim), 0.1),        # PyTorch dwconv.weight (dim,1,3,3) -> (3,3,dim)
        dwb=tn(ks[1], (dim,), 0.02),
        gamma=jnp.ones((dim,), jnp.float32),   # nn.LayerNorm defaults
        beta=jnp.zeros((dim,), jnp.float32),
        w1=tn(ks[2], (dim, 4 * dim), 0.02),    # pwconv1.weight.T
        b1=tn(ks[3], (4 * dim,), 0.02),
        w2=tn(ks[4], (4 * dim, dim), 0.02),    # pwconv2.weight.T
        b2=tn(ks[5], (dim,), 0.02),
    )


if __name__ == "__main__":
    key = jax.random.PRNGKey(0)
    # dim = 128 keeps the channel axis exactly one 128-lane vreg wide (lane-dense stores
    # and LayerNorm reductions); batch 2, 16x16 spatial, row tile 8 -> grid (2, 2).
    N, C, H, W = 2, 128, 16, 16

    key, kp, kx = jax.random.split(key, 3)
    params = init_params(kp, C)
    x = jax.random.normal(kx, (N, C, H, W), jnp.float32)

    out = jax.jit(sepconv_forward)(params, x)
    out = jax.block_until_ready(out)
    assert out.shape == (N, C, H, W), out.shape
    assert bool(jnp.all(jnp.isfinite(out)))

    # bf16 MXU operands (f32 accumulation) vs the f32 reference -> ~1e-2-level error.
    ref = sepconv_ref(params, x)
    tol = 5e-2 + 5e-2 * jnp.abs(ref)
    assert bool(jnp.all(jnp.abs(out - ref) <= tol)), float(jnp.max(jnp.abs(out - ref)))

    print("KERNEL_OK")
</pallas_src>

<mosaic_0001>
module attributes {stable_mosaic.version = 11 : i64} {
  func.func @_sepconv_kernel(%arg0: i32, %arg1: i32, %arg2: memref<1x16x16x128xf32, #tpu.memory_space<vmem>>, %arg3: memref<9x128xf32, #tpu.memory_space<vmem>>, %arg4: memref<1x128xf32, #tpu.memory_space<vmem>>, %arg5: memref<1x128xf32, #tpu.memory_space<vmem>>, %arg6: memref<1x128xf32, #tpu.memory_space<vmem>>, %arg7: memref<128x512xbf16, #tpu.memory_space<vmem>>, %arg8: memref<1x512xf32, #tpu.memory_space<vmem>>, %arg9: memref<512x128xbf16, #tpu.memory_space<vmem>>, %arg10: memref<1x128xf32, #tpu.memory_space<vmem>>, %arg11: memref<1x8x16x128xf32, #tpu.memory_space<vmem>>, %arg12: memref<10x18x128xf32, #tpu.memory_space<vmem>>) attributes {dimension_semantics = [#tpu.dimension_semantics<parallel>, #tpu.dimension_semantics<parallel>], iteration_bounds = array<i64: 2, 2>, scalar_prefetch = 0 : i64, scratch_operands = 1 : i64, tpu.core_type = #tpu.core_type<tc>, window_params = [{transform_indices = @transform_0, window_bounds = array<i64: 1, 16, 16, 128>}, {pipeline_mode = #tpu.pipeline_mode<synchronous>, transform_indices = @transform_1, window_bounds = array<i64: 9, 128>}, {pipeline_mode = #tpu.pipeline_mode<synchronous>, transform_indices = @transform_2, window_bounds = array<i64: 1, 128>}, {pipeline_mode = #tpu.pipeline_mode<synchronous>, transform_indices = @transform_3, window_bounds = array<i64: 1, 128>}, {pipeline_mode = #tpu.pipeline_mode<synchronous>, transform_indices = @transform_4, window_bounds = array<i64: 1, 128>}, {pipeline_mode = #tpu.pipeline_mode<synchronous>, transform_indices = @transform_5, window_bounds = array<i64: 128, 512>}, {pipeline_mode = #tpu.pipeline_mode<synchronous>, transform_indices = @transform_6, window_bounds = array<i64: 1, 512>}, {pipeline_mode = #tpu.pipeline_mode<synchronous>, transform_indices = @transform_7, window_bounds = array<i64: 512, 128>}, {pipeline_mode = #tpu.pipeline_mode<synchronous>, transform_indices = @transform_8, window_bounds = array<i64: 1, 128>}, {transform_indices = @transform_9, window_bounds = array<i64: 1, 8, 16, 128>}]} {
    %c8_i32 = arith.constant 8 : i32
    %0 = arith.muli %arg1, %c8_i32 : i32
    %1 = tpu.assume_multiple %0, 8 : i32
    %cst = arith.constant 0.000000e+00 : f32
    %2 = vector.broadcast %cst : f32 to vector<10x18x128xf32>
    %c0 = arith.constant 0 : index
    %c0_0 = arith.constant 0 : index
    %c0_1 = arith.constant 0 : index
    %3 = vector.load %arg12[%c0, %c0_0, %c0_1] : memref<10x18x128xf32, #tpu.memory_space<vmem>>, vector<10x18x128xf32>
    tpu.vector_store %arg12[%c0, %c0_0, %c0_1], %2 {strides = array<i32>} : memref<10x18x128xf32, #tpu.memory_space<vmem>>, vector<10x18x128xf32>,
    %c0_2 = arith.constant 0 : index
    %4 = arith.index_cast %1 : i32 to index
    %c0_3 = arith.constant 0 : index
    %c0_4 = arith.constant 0 : index
    %5 = vector.load %arg2[%c0_2, %4, %c0_3, %c0_4] : memref<1x16x16x128xf32, #tpu.memory_space<vmem>>, vector<1x8x16x128xf32>
    %6 = vector.shape_cast %5 : vector<1x8x16x128xf32> to vector<8x16x128xf32>
    %c1 = arith.constant 1 : index
    %c1_5 = arith.constant 1 : index
    %c0_6 = arith.constant 0 : index
    %7 = vector.load %arg12[%c1, %c1_5, %c0_6] : memref<10x18x128xf32, #tpu.memory_space<vmem>>, vector<8x16x128xf32>
    tpu.vector_store %arg12[%c1, %c1_5, %c0_6], %6 {strides = array<i32>} : memref<10x18x128xf32, #tpu.memory_space<vmem>>, vector<8x16x128xf32>,
    %c0_i32 = arith.constant 0 : i32
    %8 = arith.cmpi sgt, %arg1, %c0_i32 : i32
    %9 = arith.extui %8 : i1 to i32
    %c0_i32_7 = arith.constant 0 : i32
    %10 = arith.cmpi ne, %9, %c0_i32_7 : i32
    scf.if %10 {
      %c1_i32_87 = arith.constant 1 : i32
      %159 = arith.subi %1, %c1_i32_87 : i32
      %c0_88 = arith.constant 0 : index
      %160 = arith.index_cast %159 : i32 to index
      %c0_89 = arith.constant 0 : index
      %c0_90 = arith.constant 0 : index
      %161 = vector.load %arg2[%c0_88, %160, %c0_89, %c0_90] : memref<1x16x16x128xf32, #tpu.memory_space<vmem>>, vector<1x1x16x128xf32>
      %162 = vector.shape_cast %161 : vector<1x1x16x128xf32> to vector<1x16x128xf32>
      %c0_91 = arith.constant 0 : index
      %c1_92 = arith.constant 1 : index
      %c0_93 = arith.constant 0 : index
      %163 = vector.load %arg12[%c0_91, %c1_92, %c0_93] : memref<10x18x128xf32, #tpu.memory_space<vmem>>, vector<1x16x128xf32>
      tpu.vector_store %arg12[%c0_91, %c1_92, %c0_93], %162 {strides = array<i32>} : memref<10x18x128xf32, #tpu.memory_space<vmem>>, vector<1x16x128xf32>,
    } else {
    }
    %c1_i32 = arith.constant 1 : i32
    %11 = arith.cmpi slt, %arg1, %c1_i32 : i32
    %12 = arith.extui %11 : i1 to i32
    %c0_i32_8 = arith.constant 0 : i32
    %13 = arith.cmpi ne, %12, %c0_i32_8 : i32
    scf.if %13 {
      %c8_i32_87 = arith.constant 8 : i32
      %159 = arith.addi %1, %c8_i32_87 : i32
      %c0_88 = arith.constant 0 : index
      %160 = arith.index_cast %159 : i32 to index
      %c0_89 = arith.constant 0 : index
      %c0_90 = arith.constant 0 : index
      %161 = vector.load %arg2[%c0_88, %160, %c0_89, %c0_90] : memref<1x16x16x128xf32, #tpu.memory_space<vmem>>, vector<1x1x16x128xf32>
      %162 = vector.shape_cast %161 : vector<1x1x16x128xf32> to vector<1x16x128xf32>
      %c9 = arith.constant 9 : index
      %c1_91 = arith.constant 1 : index
      %c0_92 = arith.constant 0 : index
      %163 = vector.load %arg12[%c9, %c1_91, %c0_92] : memref<10x18x128xf32, #tpu.memory_space<vmem>>, vector<1x16x128xf32>
      tpu.vector_store %arg12[%c9, %c1_91, %c0_92], %162 {strides = array<i32>} : memref<10x18x128xf32, #tpu.memory_space<vmem>>, vector<1x16x128xf32>,
    } else {
    }
    %cst_9 = arith.constant 0.000000e+00 : f32
    %14 = vector.broadcast %cst_9 : f32 to vector<8x16x128xf32>
    %c0_10 = arith.constant 0 : index
    %c0_11 = arith.constant 0 : index
    %15 = vector.load %arg3[%c0_10, %c0_11] : memref<9x128xf32, #tpu.memory_space<vmem>>, vector<1x128xf32>
    %16 = vector.shape_cast %15 : vector<1x128xf32> to vector<1x1x128xf32>
    %c0_12 = arith.constant 0 : index
    %c0_13 = arith.constant 0 : index
    %c0_14 = arith.constant 0 : index
    %17 = vector.load %arg12[%c0_12, %c0_13, %c0_14] : memref<10x18x128xf32, #tpu.memory_space<vmem>>, vector<8x16x128xf32>
    %18 = vector.broadcast %16 : vector<1x1x128xf32> to vector<8x16x128xf32>
    %19 = arith.mulf %17, %18 : vector<8x16x128xf32>
    %20 = arith.addf %14, %19 : vector<8x16x128xf32>
    %c1_15 = arith.constant 1 : index
    %c0_16 = arith.constant 0 : index
    %21 = vector.load %arg3[%c1_15, %c0_16] : memref<9x128xf32, #tpu.memory_space<vmem>>, vector<1x128xf32>
    %22 = vector.shape_cast %21 : vector<1x128xf32> to vector<1x1x128xf32>
    %c0_17 = arith.constant 0 : index
    %c1_18 = arith.constant 1 : index
    %c0_19 = arith.constant 0 : index
    %23 = vector.load %arg12[%c0_17, %c1_18, %c0_19] : memref<10x18x128xf32, #tpu.memory_space<vmem>>, vector<8x16x128xf32>
    %24 = vector.broadcast %22 : vector<1x1x128xf32> to vector<8x16x128xf32>
    %25 = arith.mulf %23, %24 : vector<8x16x128xf32>
    %26 = arith.addf %20, %25 : vector<8x16x128xf32>
    %c2 = arith.constant 2 : index
    %c0_20 = arith.constant 0 : index
    %27 = vector.load %arg3[%c2, %c0_20] : memref<9x128xf32, #tpu.memory_space<vmem>>, vector<1x128xf32>
    %28 = vector.shape_cast %27 : vector<1x128xf32> to vector<1x1x128xf32>
    %c0_21 = arith.constant 0 : index
    %c2_22 = arith.constant 2 : index
    %c0_23 = arith.constant 0 : index
    %29 = vector.load %arg12[%c0_21, %c2_22, %c0_23] : memref<10x18x128xf32, #tpu.memory_space<vmem>>, vector<8x16x128xf32>
    %30 = vector.broadcast %28 : vector<1x1x128xf32> to vector<8x16x128xf32>
    %31 = arith.mulf %29, %30 : vector<8x16x128xf32>
    %32 = arith.addf %26, %31 : vector<8x16x128xf32>
    %c3 = arith.constant 3 : index
    %c0_24 = arith.constant 0 : index
    %33 = vector.load %arg3[%c3, %c0_24] : memref<9x128xf32, #tpu.memory_space<vmem>>, vector<1x128xf32>
    %34 = vector.shape_cast %33 : vector<1x128xf32> to vector<1x1x128xf32>
    %c1_25 = arith.constant 1 : index
    %c0_26 = arith.constant 0 : index
    %c0_27 = arith.constant 0 : index
    %35 = vector.load %arg12[%c1_25, %c0_26, %c0_27] : memref<10x18x128xf32, #tpu.memory_space<vmem>>, vector<8x16x128xf32>
    %36 = vector.broadcast %34 : vector<1x1x128xf32> to vector<8x16x128xf32>
    %37 = arith.mulf %35, %36 : vector<8x16x128xf32>
    %38 = arith.addf %32, %37 : vector<8x16x128xf32>
    %c4 = arith.constant 4 : index
    %c0_28 = arith.constant 0 : index
    %39 = vector.load %arg3[%c4, %c0_28] : memref<9x128xf32, #tpu.memory_space<vmem>>, vector<1x128xf32>
    %40 = vector.shape_cast %39 : vector<1x128xf32> to vector<1x1x128xf32>
    %c1_29 = arith.constant 1 : index
    %c1_30 = arith.constant 1 : index
    %c0_31 = arith.constant 0 : index
    %41 = vector.load %arg12[%c1_29, %c1_30, %c0_31] : memref<10x18x128xf32, #tpu.memory_space<vmem>>, vector<8x16x128xf32>
    %42 = vector.broadcast %40 : vector<1x1x128xf32> to vector<8x16x128xf32>
    %43 = arith.mulf %41, %42 : vector<8x16x128xf32>
    %44 = arith.addf %38, %43 : vector<8x16x128xf32>
    %c5 = arith.constant 5 : index
    %c0_32 = arith.constant 0 : index
    %45 = vector.load %arg3[%c5, %c0_32] : memref<9x128xf32, #tpu.memory_space<vmem>>, vector<1x128xf32>
    %46 = vector.shape_cast %45 : vector<1x128xf32> to vector<1x1x128xf32>
    %c1_33 = arith.constant 1 : index
    %c2_34 = arith.constant 2 : index
    %c0_35 = arith.constant 0 : index
    %47 = vector.load %arg12[%c1_33, %c2_34, %c0_35] : memref<10x18x128xf32, #tpu.memory_space<vmem>>, vector<8x16x128xf32>
    %48 = vector.broadcast %46 : vector<1x1x128xf32> to vector<8x16x128xf32>
    %49 = arith.mulf %47, %48 : vector<8x16x128xf32>
    %50 = arith.addf %44, %49 : vector<8x16x128xf32>
    %c6 = arith.constant 6 : index
    %c0_36 = arith.constant 0 : index
    %51 = vector.load %arg3[%c6, %c0_36] : memref<9x128xf32, #tpu.memory_space<vmem>>, vector<1x128xf32>
    %52 = vector.shape_cast %51 : vector<1x128xf32> to vector<1x1x128xf32>
    %c2_37 = arith.constant 2 : index
    %c0_38 = arith.constant 0 : index
    %c0_39 = arith.constant 0 : index
    %53 = vector.load %arg12[%c2_37, %c0_38, %c0_39] : memref<10x18x128xf32, #tpu.memory_space<vmem>>, vector<8x16x128xf32>
    %54 = vector.broadcast %52 : vector<1x1x128xf32> to vector<8x16x128xf32>
    %55 = arith.mulf %53, %54 : vector<8x16x128xf32>
    %56 = arith.addf %50, %55 : vector<8x16x128xf32>
    %c7 = arith.constant 7 : index
    %c0_40 = arith.constant 0 : index
    %57 = vector.load %arg3[%c7, %c0_40] : memref<9x128xf32, #tpu.memory_space<vmem>>, vector<1x128xf32>
    %58 = vector.shape_cast %57 : vector<1x128xf32> to vector<1x1x128xf32>
    %c2_41 = arith.constant 2 : index
    %c1_42 = arith.constant 1 : index
    %c0_43 = arith.constant 0 : index
    %59 = vector.load %arg12[%c2_41, %c1_42, %c0_43] : memref<10x18x128xf32, #tpu.memory_space<vmem>>, vector<8x16x128xf32>
    %60 = vector.broadcast %58 : vector<1x1x128xf32> to vector<8x16x128xf32>
    %61 = arith.mulf %59, %60 : vector<8x16x128xf32>
    %62 = arith.addf %56, %61 : vector<8x16x128xf32>
    %c8 = arith.constant 8 : index
    %c0_44 = arith.constant 0 : index
    %63 = vector.load %arg3[%c8, %c0_44] : memref<9x128xf32, #tpu.memory_space<vmem>>, vector<1x128xf32>
    %64 = vector.shape_cast %63 : vector<1x128xf32> to vector<1x1x128xf32>
    %c2_45 = arith.constant 2 : index
    %c2_46 = arith.constant 2 : index
    %c0_47 = arith.constant 0 : index
    %65 = vector.load %arg12[%c2_45, %c2_46, %c0_47] : memref<10x18x128xf32, #tpu.memory_space<vmem>>, vector<8x16x128xf32>
    %66 = vector.broadcast %64 : vector<1x1x128xf32> to vector<8x16x128xf32>
    %67 = arith.mulf %65, %66 : vector<8x16x128xf32>
    %68 = arith.addf %62, %67 : vector<8x16x128xf32>
    %69 = vector.shape_cast %68 : vector<8x16x128xf32> to vector<128x128xf32>
    %c0_48 = arith.constant 0 : index
    %c0_49 = arith.constant 0 : index
    %70 = vector.load %arg4[%c0_48, %c0_49] : memref<1x128xf32, #tpu.memory_space<vmem>>, vector<1x128xf32>
    %71 = vector.broadcast %70 : vector<1x128xf32> to vector<128x128xf32>
    %72 = arith.addf %69, %71 : vector<128x128xf32>
    %c0_50 = arith.constant 0 : index
    %c0_51 = arith.constant 0 : index
    %73 = vector.load %arg5[%c0_50, %c0_51] : memref<1x128xf32, #tpu.memory_space<vmem>>, vector<1x128xf32>
    %c0_52 = arith.constant 0 : index
    %c0_53 = arith.constant 0 : index
    %74 = vector.load %arg6[%c0_52, %c0_53] : memref<1x128xf32, #tpu.memory_space<vmem>>, vector<1x128xf32>
    %cst_54 = arith.constant dense<0.000000e+00> : vector<128xf32>
    %75 = vector.multi_reduction <add>, %72, %cst_54 [1] : vector<128x128xf32> to vector<128xf32>
    %76 = vector.shape_cast %75 : vector<128xf32> to vector<128x1xf32>
    %77 = arith.mulf %72, %72 : vector<128x128xf32>
    %cst_55 = arith.constant dense<0.000000e+00> : vector<128xf32>
    %78 = vector.multi_reduction <add>, %77, %cst_55 [1] : vector<128x128xf32> to vector<128xf32>
    %79 = vector.shape_cast %78 : vector<128xf32> to vector<128x1xf32>
    %cst_56 = arith.constant 7.812500e-03 : f32
    %80 = vector.broadcast %cst_56 : f32 to vector<128x1xf32>
    %81 = arith.mulf %76, %80 : vector<128x1xf32>
    %cst_57 = arith.constant 7.812500e-03 : f32
    %82 = vector.broadcast %cst_57 : f32 to vector<128x1xf32>
    %83 = arith.mulf %79, %82 : vector<128x1xf32>
    %84 = arith.mulf %81, %81 : vector<128x1xf32>
    %85 = arith.subf %83, %84 : vector<128x1xf32>
    %86 = vector.broadcast %81 : vector<128x1xf32> to vector<128x128xf32>
    %87 = arith.subf %72, %86 : vector<128x128xf32>
    %cst_58 = arith.constant 9.99999997E-7 : f32
    %88 = vector.broadcast %cst_58 : f32 to vector<128x1xf32>
    %89 = arith.addf %85, %88 : vector<128x1xf32>
    %90 = math.rsqrt %89 : vector<128x1xf32>
    %91 = vector.broadcast %90 : vector<128x1xf32> to vector<128x128xf32>
    %92 = arith.mulf %87, %91 : vector<128x128xf32>
    %93 = vector.broadcast %73 : vector<1x128xf32> to vector<128x128xf32>
    %94 = arith.mulf %92, %93 : vector<128x128xf32>
    %95 = vector.broadcast %74 : vector<1x128xf32> to vector<128x128xf32>
    %96 = arith.addf %94, %95 : vector<128x128xf32>
    %cst_59 = arith.constant 5.000000e-01 : f32
    %97 = vector.broadcast %cst_59 : f32 to vector<128x128xf32>
    %98 = arith.mulf %97, %96 : vector<128x128xf32>
    %cst_60 = arith.constant 0.707106769 : f32
    %99 = vector.broadcast %cst_60 : f32 to vector<128x128xf32>
    %100 = arith.mulf %96, %99 : vector<128x128xf32>
    %101 = math.erf %100 : vector<128x128xf32>
    %cst_61 = arith.constant 1.000000e+00 : f32
    %102 = vector.broadcast %cst_61 : f32 to vector<128x128xf32>
    %103 = arith.addf %102, %101 : vector<128x128xf32>
    %104 = arith.mulf %98, %103 : vector<128x128xf32>
    %105 = arith.truncf %104 : vector<128x128xf32> to vector<128x128xbf16>
    %c0_62 = arith.constant 0 : index
    %c0_63 = arith.constant 0 : index
    %106 = vector.load %arg7[%c0_62, %c0_63] : memref<128x512xbf16, #tpu.memory_space<vmem>>, vector<128x512xbf16>
    %cst_64 = arith.constant dense<0.000000e+00> : vector<128x512xf32>
    %107 = tpu.matmul %105, %106, %cst_64 {dimension_numbers = #tpu.dot_dimension_numbers<[1], [0], [0], [1], [0, 0, 1, 1], [], []>} : vector<128x128xbf16>, vector<128x512xbf16>, vector<128x512xf32> -> vector<128x512xf32>
    %c0_65 = arith.constant 0 : index
    %c0_66 = arith.constant 0 : index
    %108 = vector.load %arg8[%c0_65, %c0_66] : memref<1x512xf32, #tpu.memory_space<vmem>>, vector<1x512xf32>
    %109 = vector.broadcast %108 : vector<1x512xf32> to vector<128x512xf32>
    %110 = arith.addf %107, %109 : vector<128x512xf32>
    %cst_67 = arith.constant 5.000000e-01 : f32
    %111 = vector.broadcast %cst_67 : f32 to vector<128x512xf32>
    %112 = arith.mulf %111, %110 : vector<128x512xf32>
    %cst_68 = arith.constant 0.707106769 : f32
    %113 = vector.broadcast %cst_68 : f32 to vector<128x512xf32>
    %114 = arith.mulf %110, %113 : vector<128x512xf32>
    %115 = math.erf %114 : vector<128x512xf32>
    %cst_69 = arith.constant 1.000000e+00 : f32
    %116 = vector.broadcast %cst_69 : f32 to vector<128x512xf32>
    %117 = arith.addf %116, %115 : vector<128x512xf32>
    %118 = arith.mulf %112, %117 : vector<128x512xf32>
    %119 = arith.truncf %118 : vector<128x512xf32> to vector<128x512xbf16>
    %c0_70 = arith.constant 0 : index
    %c0_71 = arith.constant 0 : index
    %120 = vector.load %arg9[%c0_70, %c0_71] : memref<512x128xbf16, #tpu.memory_space<vmem>>, vector<512x128xbf16>
    %cst_72 = arith.constant dense<0.000000e+00> : vector<128x128xf32>
    %121 = tpu.matmul %119, %120, %cst_72 {dimension_numbers = #tpu.dot_dimension_numbers<[1], [0], [0], [1], [0, 0, 1, 1], [], []>} : vector<128x512xbf16>, vector<512x128xbf16>, vector<128x128xf32> -> vector<128x128xf32>
    %c0_73 = arith.constant 0 : index
    %c0_74 = arith.constant 0 : index
    %122 = vector.load %arg10[%c0_73, %c0_74] : memref<1x128xf32, #tpu.memory_space<vmem>>, vector<1x128xf32>
    %123 = vector.broadcast %122 : vector<1x128xf32> to vector<128x128xf32>
    %124 = arith.addf %121, %123 : vector<128x128xf32>
    %cst_75 = arith.constant dense<0.000000e+00> : vector<128xf32>
    %125 = vector.multi_reduction <add>, %124, %cst_75 [1] : vector<128x128xf32> to vector<128xf32>
    %126 = vector.shape_cast %125 : vector<128xf32> to vector<128x1xf32>
    %127 = arith.mulf %124, %124 : vector<128x128xf32>
    %cst_76 = arith.constant dense<0.000000e+00> : vector<128xf32>
    %128 = vector.multi_reduction <add>, %127, %cst_76 [1] : vector<128x128xf32> to vector<128xf32>
    %129 = vector.shape_cast %128 : vector<128xf32> to vector<128x1xf32>
    %cst_77 = arith.constant 7.812500e-03 : f32
    %130 = vector.broadcast %cst_77 : f32 to vector<128x1xf32>
    %131 = arith.mulf %126, %130 : vector<128x1xf32>
    %cst_78 = arith.constant 7.812500e-03 : f32
    %132 = vector.broadcast %cst_78 : f32 to vector<128x1xf32>
    %133 = arith.mulf %129, %132 : vector<128x1xf32>
    %134 = arith.mulf %131, %131 : vector<128x1xf32>
    %135 = arith.subf %133, %134 : vector<128x1xf32>
    %136 = vector.broadcast %131 : vector<128x1xf32> to vector<128x128xf32>
    %137 = arith.subf %124, %136 : vector<128x128xf32>
    %cst_79 = arith.constant 9.99999997E-7 : f32
    %138 = vector.broadcast %cst_79 : f32 to vector<128x1xf32>
    %139 = arith.addf %135, %138 : vector<128x1xf32>
    %140 = math.rsqrt %139 : vector<128x1xf32>
    %141 = vector.broadcast %140 : vector<128x1xf32> to vector<128x128xf32>
    %142 = arith.mulf %137, %141 : vector<128x128xf32>
    %143 = vector.broadcast %73 : vector<1x128xf32> to vector<128x128xf32>
    %144 = arith.mulf %142, %143 : vector<128x128xf32>
    %145 = vector.broadcast %74 : vector<1x128xf32> to vector<128x128xf32>
    %146 = arith.addf %144, %145 : vector<128x128xf32>
    %cst_80 = arith.constant 5.000000e-01 : f32
    %147 = vector.broadcast %cst_80 : f32 to vector<128x128xf32>
    %148 = arith.mulf %147, %146 : vector<128x128xf32>
    %cst_81 = arith.constant 0.707106769 : f32
    %149 = vector.broadcast %cst_81 : f32 to vector<128x128xf32>
    %150 = arith.mulf %146, %149 : vector<128x128xf32>
    %151 = math.erf %150 : vector<128x128xf32>
    %cst_82 = arith.constant 1.000000e+00 : f32
    %152 = vector.broadcast %cst_82 : f32 to vector<128x128xf32>
    %153 = arith.addf %152, %151 : vector<128x128xf32>
    %154 = arith.mulf %148, %153 : vector<128x128xf32>
    %155 = vector.shape_cast %154 : vector<128x128xf32> to vector<8x16x128xf32>
    %c0_83 = arith.constant 0 : index
    %c0_84 = arith.constant 0 : index
    %c0_85 = arith.constant 0 : index
    %c0_86 = arith.constant 0 : index
    %156 = vector.load %arg11[%c0_83, %c0_84, %c0_85, %c0_86] : memref<1x8x16x128xf32, #tpu.memory_space<vmem>>, vector<1x8x16x128xf32>
    %157 = vector.shape_cast %156 : vector<1x8x16x128xf32> to vector<8x16x128xf32>
    %158 = vector.shape_cast %155 : vector<8x16x128xf32> to vector<1x8x16x128xf32>
    tpu.vector_store %arg11[%c0_83, %c0_84, %c0_85, %c0_86], %158 {strides = array<i32>} : memref<1x8x16x128xf32, #tpu.memory_space<vmem>>, vector<1x8x16x128xf32>,
    return
  }
  func.func @transform_0(%arg0: i32, %arg1: i32) -> (i32, i32, i32, i32) {
    %c0_i32 = arith.constant 0 : i32
    %c0_i32_0 = arith.constant 0 : i32
    %c0_i32_1 = arith.constant 0 : i32
    %c0_i32_2 = arith.constant 0 : i32
    return %arg0, %c0_i32, %c0_i32_0, %c0_i32_1 : i32, i32, i32, i32
  }
  func.func @transform_1(%arg0: i32, %arg1: i32) -> (i32, i32) {
    %c0_i32 = arith.constant 0 : i32
    %c0_i32_0 = arith.constant 0 : i32
    %c0_i32_1 = arith.constant 0 : i32
    return %c0_i32, %c0_i32_0 : i32, i32
  }
  func.func @transform_2(%arg0: i32, %arg1: i32) -> (i32, i32) {
    %c0_i32 = arith.constant 0 : i32
    %c0_i32_0 = arith.constant 0 : i32
    %c0_i32_1 = arith.constant 0 : i32
    return %c0_i32, %c0_i32_0 : i32, i32
  }
  func.func @transform_3(%arg0: i32, %arg1: i32) -> (i32, i32) {
    %c0_i32 = arith.constant 0 : i32
    %c0_i32_0 = arith.constant 0 : i32
    %c0_i32_1 = arith.constant 0 : i32
    return %c0_i32, %c0_i32_0 : i32, i32
  }
  func.func @transform_4(%arg0: i32, %arg1: i32) -> (i32, i32) {
    %c0_i32 = arith.constant 0 : i32
    %c0_i32_0 = arith.constant 0 : i32
    %c0_i32_1 = arith.constant 0 : i32
    return %c0_i32, %c0_i32_0 : i32, i32
  }
  func.func @transform_5(%arg0: i32, %arg1: i32) -> (i32, i32) {
    %c0_i32 = arith.constant 0 : i32
    %c0_i32_0 = arith.constant 0 : i32
    %c0_i32_1 = arith.constant 0 : i32
    return %c0_i32, %c0_i32_0 : i32, i32
  }
  func.func @transform_6(%arg0: i32, %arg1: i32) -> (i32, i32) {
    %c0_i32 = arith.constant 0 : i32
    %c0_i32_0 = arith.constant 0 : i32
    %c0_i32_1 = arith.constant 0 : i32
    return %c0_i32, %c0_i32_0 : i32, i32
  }
  func.func @transform_7(%arg0: i32, %arg1: i32) -> (i32, i32) {
    %c0_i32 = arith.constant 0 : i32
    %c0_i32_0 = arith.constant 0 : i32
    %c0_i32_1 = arith.constant 0 : i32
    return %c0_i32, %c0_i32_0 : i32, i32
  }
  func.func @transform_8(%arg0: i32, %arg1: i32) -> (i32, i32) {
    %c0_i32 = arith.constant 0 : i32
    %c0_i32_0 = arith.constant 0 : i32
    %c0_i32_1 = arith.constant 0 : i32
    return %c0_i32, %c0_i32_0 : i32, i32
  }
  func.func @transform_9(%arg0: i32, %arg1: i32) -> (i32, i32, i32, i32) {
    %c0_i32 = arith.constant 0 : i32
    %c0_i32_0 = arith.constant 0 : i32
    %c0_i32_1 = arith.constant 0 : i32
    return %arg0, %arg1, %c0_i32, %c0_i32_0 : i32, i32, i32, i32
  }
}

</mosaic_0001>

<bundles_post_ra>
// kernel: sepconv_forward.1
= control target key start
LH: loop header
LB: loop body
LE: loop exit
PB: predicated region body
PF: predicated region fallthrough
CT: control target
= control target key end

     0   :  { %s5456_s0 = inlined_call_operand.vmem [shape: f32[2,16,16,128], index: 0, kind: input, shape index: {}]   ;;  %s5457_s1 = inlined_call_operand.vmem [shape: f32[9,128], index: 1, kind: input, shape index: {}]   ;;  %s5458_s2 = inlined_call_operand.vmem [shape: f32[1,128], index: 2, kind: input, shape index: {}]   ;;  %s5459_s3 = inlined_call_operand.vmem [shape: f32[1,128], index: 3, kind: input, shape index: {}]   ;;  %s5460_s4 = inlined_call_operand.vmem [shape: f32[1,128], index: 4, kind: input, shape index: {}]   ;;  %s5461_s5 = inlined_call_operand.vmem [shape: bf16[128,512], index: 5, kind: input, shape index: {}]   ;;  %s5462_s6 = inlined_call_operand.vmem [shape: f32[1,512], index: 6, kind: input, shape index: {}]   ;;  %s5463_s7 = inlined_call_operand.vmem [shape: bf16[512,128], index: 7, kind: input, shape index: {}]   ;;  %s5464_s8 = inlined_call_operand.vmem [shape: f32[1,128], index: 8, kind: input, shape index: {}]   ;;  %s5465_s9 = inlined_call_operand.hbm [shape: f32[2,16,16,128], index: 9, kind: output, shape index: {}]  }
   0x1   :  { %5468 = sst [smem:[#allocation7_spill]] %s5456_s0 }
   0x2   :  { %5469 = sst [smem:[#allocation8_spill]] %s5457_s1 }
   0x3   :  { %14 = vsyncpa [#allocation4], 0 }
   0x4   :  { %16 = vsyncpa [#allocation4 + $0x1], 0  ;;  %s3763_s30 = smov 0   ;;  %s3765_s10 = smov 0  }
   0x5   :  { %s3767_s11 = smov 0   ;;  %s3769_s12 = smov 0  }
   0x6   :  { %s3771_s13 = smov 0   ;;  %s3773_s14 = smov 0  }
   0x7   :  { %s3775_s15 = smov 0   ;;  %s3777_s16 = smov 0  }
   0x8 LB: > { %s2965_s17 = sadd.s32 4294967295, %s3706_s16   ;;  %s2966_s18 = sadd.s32 4294967294, %s3706_s16   ;;  %s3706_s16 = sphi %s3777_s16, %s22_s16   ;;  %s3702_s15 = sphi %s3775_s15, %s5484_s15   ;;  %s3698_s14 = sphi %s3773_s14, %s5483_s14   ;;  %s3694_s13 = sphi %s3771_s13, %s5482_s13   ;;  %s3690_s12 = sphi %s3769_s12, %s5481_s12   ;;  %s3686_s11 = sphi %s3767_s11, %s5480_s11   ;;  %s3682_s10 = sphi %s3765_s10, %s5479_s10   ;;  %s3678_s30 = sphi %s3763_s30, %s5478_s30  }
   0x9   : > { %s31_s19 = sadd.s32 1, %s3698_s14  ;;  %s34_s20 = sadd.s32 1, %s3702_s15 }
   0xa   : > { %p32_p0 = scmp.ge.s32.totalorder %s31_s19, 2  ;;  %p247_p1 = scmp.ne.s32.totalorder %s3686_s11, %s3682_s10 }
   0xb   : > { %p248_p2 = scmp.eq.s32.totalorder %s2965_s17, 3  ;;  %p253_p5 = scmp.ne.s32.totalorder %s3682_s10, %s3678_s30 }
   0xc   : > { %s5486_s19 = smov (%p32_p0, %s31_s19), 0  ;;  %s5488_s20 = smov (!%p32_p0, %s34_s20), %s3702_s15 }
   0xd   : > { %s233_s21 = ssub.s32 %s3698_s14, %s5486_s19  ;;  %p3814_p3 = por %p248_p2, %p247_p1 }
   0xe   : > { %p36_p4 = scmp.ge.s32.totalorder %s5488_s20, 2  ;;  %p254_p6 = scmp.eq.s32.totalorder %s2966_s18, 3 }
   0xf   : > { %p2969_p7 = scmp.ge.s32.totalorder %s3706_s16, 1  ;;  %p304_p9 = scmp.lt.s32.totalorder %s3706_s16, 5 }
  0x10   : > { %s5490_s20 = smov (%p36_p4, %s5488_s20), 0  ;;  %p3823_p8 = por %p254_p6, %p253_p5 }
  0x11   : > { %5471 = sst [smem:[#allocation6_spill]] %s5490_s20  ;;  %s232_s24 = ssub.s32 %s3702_s15, %s5490_s20 }
  0x12   : > { %s237_s25 = sadd.s32 1, %s3686_s11  ;;  %s234_s26 = sor.u32 %s233_s21, %s232_s24 }
  0x13   : > { %p305_p10 = pnand %p2969_p7, %p304_p9  ;;  %p235_p11 = scmp.eq.s32.totalorder %s234_s26, 0 }
  0x14   : > { %s5467_s28 = sand.u32 (!%p305_p10), 1, %s3682_s10   ;;  %v3708_v0 = vmov (!%p305_p10), 0.0   ;;  %p340_p12 = scmp.lt.s32.totalorder (!%p305_p10), %s3694_s13, 1 }
  0x15   : > { %s3832_s27 = scalar_select %p235_p11, %s3686_s11, %s237_s25  }
  0x16   : > { %308 = sbr.rel (%p305_p10) target bundleno = 1022 (0x3fe), region = 56  ;;  %351 = vst [vmem:[#allocation2 + $0x18] sm:$0xff] (!%p305_p10), %v3708_v0  ;;  %348 = vst [vmem:[#allocation2] sm:$0xff] (!%p305_p10), %v3708_v0  ;;  %s3838_s17 = sshll.u32 (!%p305_p10), %s5467_s28, 7 }
  0x17   : > { %349 = vst [vmem:[#allocation2 + $0x8] sm:$0xff] (!%p305_p10), %v3708_v0  ;;  %350 = vst [vmem:[#allocation2 + $0x10] sm:$0x3] (!%p305_p10), %v3708_v0  ;;  %s3068_s21 = sshll.u32 (!%p305_p10), %s3690_s12, 7  ;;  %s5473_s0 = sld [smem:[#allocation7_spill]] (!%p305_p10) }
  0x18   : > { %352 = vst [vmem:[#allocation2 + $0x20] sm:$0xff] (!%p305_p10), %v3708_v0  ;;  %353 = vst [vmem:[#allocation2 + $0x28] sm:$0x3] (!%p305_p10), %v3708_v0  ;;  %p2975_p13 = scmp.le.s32.totalorder (!%p305_p10), %s3690_s12, 0 }
  0x19   : > { %354 = vst [vmem:[#allocation2 + $0x30] sm:$0xff] (!%p305_p10), %v3708_v0  ;;  %355 = vst [vmem:[#allocation2 + $0x38] sm:$0xff] (!%p305_p10), %v3708_v0 }
  0x1a   : > { %356 = vst [vmem:[#allocation2 + $0x40] sm:$0x3] (!%p305_p10), %v3708_v0  ;;  %357 = vst [vmem:[#allocation2 + $0x48] sm:$0xff] (!%p305_p10), %v3708_v0 }
  0x1b   : > { %358 = vst [vmem:[#allocation2 + $0x50] sm:$0xff] (!%p305_p10), %v3708_v0  ;;  %359 = vst [vmem:[#allocation2 + $0x58] sm:$0x3] (!%p305_p10), %v3708_v0 }
  0x1c   : > { %360 = vst [vmem:[#allocation2 + $0x60] sm:$0xff] (!%p305_p10), %v3708_v0  ;;  %361 = vst [vmem:[#allocation2 + $0x68] sm:$0xff] (!%p305_p10), %v3708_v0 }
  0x1d   : > { %362 = vst [vmem:[#allocation2 + $0x70] sm:$0x3] %v3708_v0  ;;  %363 = vst [vmem:[#allocation2 + $0x78] sm:$0xff] %v3708_v0  ;;  %s341_s18 = scalar_select %p340_p12, %s3694_s13, 1 }
  0x1e   : > { %364 = vst [vmem:[#allocation2 + $0x80] sm:$0xff] %v3708_v0  ;;  %365 = vst [vmem:[#allocation2 + $0x88] sm:$0x3] %v3708_v0 }
  0x1f   : > { %366 = vst [vmem:[#allocation2 + $0x90] sm:$0xff] %v3708_v0  ;;  %367 = vst [vmem:[#allocation2 + $0x98] sm:$0xff] %v3708_v0  ;;  %s3067_s24 = sshll.u32 %s341_s18, 8  ;;  %s3868_s18 = scalar_lea.vmem [#allocation3], %s3838_s17 }
  0x20   : > { %368 = vst [vmem:[#allocation2 + $0xa0] sm:$0x3] %v3708_v0  ;;  %369 = vst [vmem:[#allocation2 + $0xa8] sm:$0xff] %v3708_v0  ;;  %s3846_s29 = scalar_lea.vmem %s5473_s0, %s3067_s24 }
  0x21   : > { %370 = vst [vmem:[#allocation2 + $0xb0] sm:$0xff] %v3708_v0  ;;  %371 = vst [vmem:[#allocation2 + $0xb8] sm:$0x3] %v3708_v0  ;;  %s3849_s20 = scalar_lea.vmem %s3846_s29, %s3068_s21  ;;  %s5474_s21 = sshll.u32 (!%p2975_p13), %s3690_s12, 3 }
  0x22   : > { %372 = vst [vmem:[#allocation2 + $0xc0] sm:$0xff] %v3708_v0  ;;  %373 = vst [vmem:[#allocation2 + $0xc8] sm:$0xff] %v3708_v0  ;;  %v380_v1 = vld [vmem:[%s3849_s20] sm:$0xff]  ;;  %v381_v2 = vld [vmem:[%s3849_s20 + $0x8] sm:$0xff]  ;;  %s2976_s24 = sadd.s32 (!%p2975_p13), 4294967295, %s5474_s21 }
  0x23   : > { %374 = vst [vmem:[#allocation2 + $0xd0] sm:$0x3] %v3708_v0  ;;  %375 = vst [vmem:[#allocation2 + $0xd8] sm:$0xff] %v3708_v0  ;;  %v382_v3 = vld [vmem:[%s3849_s20 + $0x10] sm:$0xff]  ;;  %v383_v4 = vld [vmem:[%s3849_s20 + $0x18] sm:$0xff]  ;;  %s2977_s25 = sshll.u32 (!%p2975_p13), %s2976_s24, 4 }
  0x24   : > { %376 = vst [vmem:[#allocation2 + $0xe0] sm:$0xff] %v3708_v0  ;;  %377 = vst [vmem:[#allocation2 + $0xe8] sm:$0x3] %v3708_v0  ;;  %v384_v5 = vld [vmem:[%s3849_s20 + $0x20] sm:$0xff]  ;;  %v385_v6 = vld [vmem:[%s3849_s20 + $0x28] sm:$0xff]  ;;  %s419_s26 = scalar_lea.vmem (!%p2975_p13), %s3846_s29, %s2977_s25 }
  0x25   : > { %397 = vst [vmem:[#allocation2 + $0x19] sm:$0xff] %v380_v1  ;;  %398 = vst [vmem:[#allocation2 + $0x21] sm:$0xff] %v381_v2  ;;  %v386_v7 = vld [vmem:[%s3849_s20 + $0x30] sm:$0xff]  ;;  %v387_v8 = vld [vmem:[%s3849_s20 + $0x38] sm:$0xff] }
  0x26   : > { %399 = vst [vmem:[#allocation2 + $0x31] sm:$0xff] %v382_v3  ;;  %400 = vst [vmem:[#allocation2 + $0x39] sm:$0xff] %v383_v4  ;;  %v388_v9 = vld [vmem:[%s3849_s20 + $0x40] sm:$0xff]  ;;  %v389_v10 = vld [vmem:[%s3849_s20 + $0x48] sm:$0xff]  ;;  %416 = sbr.rel (%p2975_p13) target bundleno = 46 (0x2e), region = 60 }
  0x27   : > { %401 = vst [vmem:[#allocation2 + $0x49] sm:$0xff] %v384_v5  ;;  %402 = vst [vmem:[#allocation2 + $0x51] sm:$0xff] %v385_v6  ;;  %v390_v11 = vld [vmem:[%s3849_s20 + $0x50] sm:$0xff]  ;;  %v391_v12 = vld [vmem:[%s3849_s20 + $0x58] sm:$0xff] }
  0x28   : > { %403 = vst [vmem:[#allocation2 + $0x61] sm:$0xff] %v386_v7  ;;  %404 = vst [vmem:[#allocation2 + $0x69] sm:$0xff] %v387_v8  ;;  %v392_v13 = vld [vmem:[%s3849_s20 + $0x60] sm:$0xff]  ;;  %v393_v14 = vld [vmem:[%s3849_s20 + $0x68] sm:$0xff] }
  0x29   : > { %405 = vst [vmem:[#allocation2 + $0x79] sm:$0xff] %v388_v9  ;;  %406 = vst [vmem:[#allocation2 + $0x81] sm:$0xff] %v389_v10  ;;  %v394_v15 = vld [vmem:[%s3849_s20 + $0x70] sm:$0xff]  ;;  %v395_v16 = vld [vmem:[%s3849_s20 + $0x78] sm:$0xff] }
  0x2a   : > { %407 = vst [vmem:[#allocation2 + $0x91] sm:$0xff] %v390_v11  ;;  %408 = vst [vmem:[#allocation2 + $0x99] sm:$0xff] %v391_v12  ;;  %v420_v17 = vld [vmem:[%s419_s26] sm:$0xff] (!%p2975_p13)  ;;  %v421_v18 = vld [vmem:[%s419_s26 + $0x8] sm:$0xff] (!%p2975_p13) }
  0x2b   : > { %409 = vst [vmem:[#allocation2 + $0xa9] sm:$0xff] %v392_v13  ;;  %410 = vst [vmem:[#allocation2 + $0xb1] sm:$0xff] %v393_v14 }
  0x2c   : > { %411 = vst [vmem:[#allocation2 + $0xc1] sm:$0xff] %v394_v15  ;;  %412 = vst [vmem:[#allocation2 + $0xc9] sm:$0xff] %v395_v16 }
  0x2d   : > { %422 = vst [vmem:[#allocation2 + $0x1] sm:$0xff] %v420_v17  ;;  %423 = vst [vmem:[#allocation2 + $0x9] sm:$0xff] %v421_v18 }
  0x2e PF: > { %p2978_p0 = scmp.ge.s32.totalorder %s3690_s12, 1 }
  0x2f   : > { %v2981_v19 = vld [vmem:[%s3849_s20 + $0x80] sm:$0xff] (!%p2978_p0)  ;;  %v2982_v20 = vld [vmem:[%s3849_s20 + $0x88] sm:$0xff] (!%p2978_p0) }
  0x30   : > { %427 = sbr.rel (%p2978_p0) target bundleno = 55 (0x37), region = 64  ;;  %434 = vst [vmem:[#allocation2 + $0xd9] sm:$0xff] (!%p2978_p0), %v2981_v19  ;;  %435 = vst [vmem:[#allocation2 + $0xe1] sm:$0xff] (!%p2978_p0), %v2982_v20 }
  0x37 PF: > { %s5475_s1 = sld [smem:[#allocation8_spill]]  ;;  %v437_v22 = vld [vmem:[#allocation2] sm:$0xff]  ;;  %v596_v31 = vld [vmem:[#allocation2 + $0x18] sm:$0xff]  ;;  %v756_v40 = vld [vmem:[#allocation2 + $0x30] sm:$0xff]  ;;  %s3070_s29 = sshll.u32 %s3690_s12, 4 }
  0x38   : > { %v490_v25 = vld [vmem:[#allocation2 + $0x1] sm:$0xff]  ;;  %v649_v33 = vld [vmem:[#allocation2 + $0x19] sm:$0xff]  ;;  %v809_v46 = vld [vmem:[#allocation2 + $0x31] sm:$0xff]  ;;  %s3063_s21 = sshll.u32 %s3694_s13, 5  ;;  %s2881_s20 = sshll.u32 %s3868_s18, 4  ;;  %s5398_s20 = int_to_ptr.vmem [resolvable:$true] %s2881_s20 }
  0x39   : > { %v543_v27 = vld [vmem:[#allocation2 + $0x2] sm:$0xff]  ;;  %v702_v35 = vld [vmem:[#allocation2 + $0x1a] sm:$0xff]  ;;  %v862_v48 = vld [vmem:[#allocation2 + $0x32] sm:$0xff]  ;;  %s2878_s24 = sadd.s32 %s3070_s29, %s3063_s21  ;;  %s5476_s0 = sand.u32 1, %s3682_s10  }
  0x3a   : > { %v438_v50 = vld [vmem:[#allocation2 + $0x8] sm:$0xff]  ;;  %v597_v59 = vld [vmem:[#allocation2 + $0x20] sm:$0xff]  ;;  %v3939_v2 = vld [vmem:[#allocation2 + $0x38] sm:$0xff]  ;;  %s3064_s25 = sshll.u32 %s2878_s24, 7  ;;  %s3612_s26 = scalar_lea.vmem %s5398_s20, 2048 }
  0x3b   : > { %v491_v51 = vld [vmem:[#allocation2 + $0x9] sm:$0xff]  ;;  %v650_v60 = vld [vmem:[#allocation2 + $0x21] sm:$0xff]  ;;  %v3941_v3 = vld [vmem:[#allocation2 + $0x39] sm:$0xff]  ;;  %s5396_s13 = scalar_lea.hbm %s5465_s9, %s3064_s25  ;;  %p3613_p1 = scmp.ne.s32.totalorder %s5398_s20, %s3612_s26 }
  0x3c   : > { %v544_v58 = vld [vmem:[#allocation2 + $0xa] sm:$0xff]  ;;  %v703_v1 = vld [vmem:[#allocation2 + $0x22] sm:$0xff]  ;;  %v3946_v8 = vld [vmem:[#allocation2 + $0x3a] sm:$0xff]  ;;  %s3710_s17 = smov [#allocation3]  }
  0x3d   : > { %v3880_v21 = vld [vmem:[%s5475_s1] ss:$0 sm:$0xff]  ;;  %v3885_v23 = vld [vmem:[%s5475_s1 + $0x1] ss:$0 sm:$0xff]  ;;  %v3891_v26 = vld [vmem:[%s5475_s1 + $0x2] ss:$0 sm:$0xff]  ;;  %p3614_p2 = pnand %p3613_p1, %p3814_p3 }
  0x3e   : > { %v457_v24 = vmul.f32 %v3880_v21, %v437_v22  ;;  %v510_v28 = vmul.f32 %v3885_v23, %v490_v25  ;;  %v563_v29 = vmul.f32 %v3891_v26, %v543_v27  ;;  %v3898_v30 = vld [vmem:[%s5475_s1 + $0x3] ss:$0 sm:$0xff]  ;;  %v3903_v32 = vld [vmem:[%s5475_s1 + $0x4] ss:$0 sm:$0xff]  ;;  %v3908_v34 = vld [vmem:[%s5475_s1 + $0x5] ss:$0 sm:$0xff]  ;;  %v459_v36 = vmul.f32 %v3880_v21, %v596_v31 }
  0x3f   : > { %v616_v38 = vmul.f32 %v3898_v30, %v596_v31  ;;  %v3915_v39 = vld [vmem:[%s5475_s1 + $0x6] ss:$0 sm:$0xff]  ;;  %v3920_v41 = vld [vmem:[%s5475_s1 + $0x7] ss:$0 sm:$0xff]  ;;  %v512_v42 = vmul.f32 %v3885_v23, %v649_v33  ;;  %v669_v43 = vmul.f32 %v3903_v32, %v649_v33  ;;  %v722_v44 = vmul.f32 %v3908_v34, %v702_v35  ;;  %v3929_v47 = vld [vmem:[%s5475_s1 + $0x8] ss:$0 sm:$0xff]  ;;  %p3615_p4 = pneg %p3614_p2 }
  0x40   : > { %v526_v37 = vadd.f32 %v510_v28, %v457_v24  ;;  %v776_v45 = vmul.f32 %v3915_v39, %v756_v40  ;;  %v565_v53 = vmul.f32 %v3891_v26, %v702_v35  ;;  %v618_v54 = vmul.f32 %v3898_v30, %v756_v40  ;;  %v3952_v14 = vld [vmem:[#allocation2 + $0x48] sm:$0xff]  ;;  %s5404_s1 = scalar_lea.sflag [#allocation4], %s5476_s0  ;;  %s3616_s29 = sshll.u32 %s3710_s17, 4  ;;  %s3617_s29 = int_to_ptr.vmem [resolvable:$false] %s3616_s29 }
  0x41   : > { %v528_v52 = vadd.f32 %v512_v42, %v459_v36  ;;  %v829_v55 = vmul.f32 %v3920_v41, %v809_v46  ;;  %v458_v56 = vmul.f32 %v3880_v21, %v438_v50  ;;  %v511_v57 = vmul.f32 %v3885_v23, %v491_v51  ;;  %v3954_v15 = vld [vmem:[#allocation2 + $0x49] sm:$0xff]  ;;  %s3618_s21 = scalar_lea.vmem %s3617_s29, 4096  ;;  %p3619_p5 = scmp.lt.s32.totalorder %s5398_s20, %s3617_s29 }
  0x42   : > { %v579_v49 = vadd.f32 %v563_v29, %v526_v37  ;;  %v461_v61 = vmul.f32 %v3880_v21, %v756_v40  ;;  %v882_v63 = vmul.f32 %v3929_v47, %v862_v48  ;;  %v564_v0 = vmul.f32 %v3891_v26, %v544_v58  ;;  %v3956_v16 = vld [vmem:[#allocation2 + $0x4a] sm:$0xff]  ;;  %p3620_p6 = scmp.lt.s32.totalorder %s3618_s21, %s3612_s26 }
  0x43   : > { %v671_v4 = vmul.f32 %v3903_v32, %v809_v46  ;;  %v527_v5 = vadd.f32 %v511_v57, %v458_v56  ;;  %v617_v6 = vmul.f32 %v3898_v30, %v597_v59  ;;  %v670_v7 = vmul.f32 %v3903_v32, %v650_v60  ;;  %v3973_v40 = vld [vmem:[#allocation2 + $0x50] sm:$0xff] }
  0x44   : > { %v632_v62 = vadd.f32 %v616_v38, %v579_v49  ;;  %v724_v9 = vmul.f32 %v3908_v34, %v862_v48  ;;  %v723_v11 = vmul.f32 %v3908_v34, %v703_v1  ;;  %v777_v12 = vmul.f32 %v3915_v39, %v3939_v2  ;;  %v3979_v49 = vld [vmem:[#allocation2 + $0x51] sm:$0xff]  ;;  %p3621_p7 = por %p3620_p6, %p3619_p5 }
  0x45   : > { %v581_v13 = vadd.f32 %v565_v53, %v528_v52  ;;  %v580_v17 = vadd.f32 %v564_v0, %v527_v5  ;;  %v830_v18 = vmul.f32 %v3920_v41, %v3941_v3  ;;  %v883_v19 = vmul.f32 %v3929_v47, %v3946_v8 }
  0x46   : > { %v685_v10 = vadd.f32 %v669_v43, %v632_v62  ;;  %v460_v20 = vmul.f32 %v3880_v21, %v597_v59  ;;  %v513_v25 = vmul.f32 %v3885_v23, %v650_v60  ;;  %v566_v27 = vmul.f32 %v3891_v26, %v703_v1  ;;  %v3992_v60 = vld [vmem:[#allocation2 + $0x60] sm:$0xff]  ;;  %p3622_p9 = pnand %p3621_p7, %p3615_p4 }
  0x47   : > { %v634_v24 = vadd.f32 %v618_v54, %v581_v13  ;;  %v633_v28 = vadd.f32 %v617_v6, %v580_v17  ;;  %v778_v29 = vmul.f32 %v3915_v39, %v3952_v14  ;;  %v831_v31 = vmul.f32 %v3920_v41, %v3954_v15  ;;  %v3986_v54 = vld [vmem:[%s5458_s2] ss:$0 sm:$0xff]  ;;  %v4005_v13 = vld [vmem:[#allocation2 + $0x61] sm:$0xff] }
  0x48   : > { %v738_v22 = vadd.f32 %v722_v44, %v685_v10  ;;  %v884_v33 = vmul.f32 %v3929_v47, %v3956_v16  ;;  %v529_v37 = vadd.f32 %v513_v25, %v460_v20  ;;  %v619_v38 = vmul.f32 %v3898_v30, %v3939_v2  ;;  %v865_v10 = vld [vmem:[#allocation2 + $0x52] sm:$0xff]  ;;  %v4014_v25 = vld [vmem:[#allocation2 + $0x62] sm:$0xff] }
  0x49   : > { %v687_v36 = vadd.f32 %v671_v4, %v634_v24  ;;  %v686_v42 = vadd.f32 %v670_v7, %v633_v28  ;;  %v672_v43 = vmul.f32 %v3903_v32, %v3941_v3  ;;  %v725_v44 = vmul.f32 %v3908_v34, %v3946_v8 }
  0x4a   : > { %v792_v35 = vadd.f32 %v776_v45, %v738_v22  ;;  %v514_v50 = vmul.f32 %v3885_v23, %v809_v46  ;;  %v582_v52 = vadd.f32 %v566_v27, %v529_v37  ;;  %v567_v53 = vmul.f32 %v3891_v26, %v862_v48 }
  0x4b   : > { %v740_v45 = vadd.f32 %v724_v9, %v687_v36  ;;  %v739_v56 = vadd.f32 %v723_v11, %v686_v42  ;;  %v779_v57 = vmul.f32 %v3915_v39, %v3973_v40  ;;  %v620_v59 = vmul.f32 %v3898_v30, %v3952_v14  ;;  %v4025_v36 = vld [vmem:[#allocation2 + $0x69] sm:$0xff] }
  0x4c   : > { %v845_v51 = vadd.f32 %v829_v55, %v792_v35  ;;  %v530_v58 = vadd.f32 %v514_v50, %v461_v61  ;;  %v635_v62 = vadd.f32 %v619_v38, %v582_v52  ;;  %v832_v48 = vmul.f32 %v3920_v41, %v3979_v49  ;;  %v4032_v42 = vld [vmem:[#allocation2 + $0x6a] sm:$0xff] }
  0x4d   : > { %v794_v55 = vadd.f32 %v778_v29, %v740_v45  ;;  %v793_v0 = vadd.f32 %v777_v12, %v739_v56  ;;  %v673_v4 = vmul.f32 %v3903_v32, %v3954_v15  ;;  %v726_v5 = vmul.f32 %v3908_v34, %v3956_v16 }
  0x4e   : > { %v898_v46 = vadd.f32 %v882_v63, %v845_v51  ;;  %v583_v1 = vadd.f32 %v567_v53, %v530_v58  ;;  %v688_v7 = vadd.f32 %v672_v43, %v635_v62  ;;  %v780_v63 = vmul.f32 %v3915_v39, %v3992_v60  ;;  %v4053_v62 = vld [vmem:[#allocation2 + $0x79] sm:$0xff] }
  0x4f   : > { %v847_v6 = vadd.f32 %v831_v31, %v794_v55  ;;  %v846_v9 = vadd.f32 %v830_v18, %v793_v0  ;;  %v462_v12 = vmul.f32 %v3880_v21, %v3939_v2  ;;  %v515_v17 = vmul.f32 %v3885_v23, %v3941_v3  ;;  %v4020_v31 = vld [vmem:[#allocation2 + $0x68] sm:$0xff]  ;;  %v4051_v55 = vld [vmem:[#allocation2 + $0x78] sm:$0xff] }
  0x50   : > { %v4001_v61 = vadd.f32 %v3986_v54, %v898_v46  ;;  %v636_v11 = vadd.f32 %v620_v59, %v583_v1  ;;  %v741_v24 = vadd.f32 %v725_v44, %v688_v7  ;;  %v568_v18 = vmul.f32 %v3891_v26, %v3946_v8 }
  0x51   : > { %v900_v22 = vadd.f32 %v884_v33, %v847_v6  ;;  %v899_v27 = vadd.f32 %v883_v19, %v846_v9  ;;  %v531_v29 = vadd.f32 %v515_v17, %v462_v12  ;;  %v621_v2 = vmul.f32 %v3898_v30, %v3973_v40 }
  0x52   : > { %939 = vadd.xlane.f32.xlu0 %v4001_v61  ;;  %v971_v20 = vmul.f32 %v4001_v61, %v4001_v61  ;;  %v689_v28 = vadd.f32 %v673_v4, %v636_v11  ;;  %v795_v3 = vadd.f32 %v779_v57, %v741_v24  ;;  %v885_v35 = vmul.f32 %v3929_v47, %v865_v10  ;;  %v4059_v4 = vld [vmem:[#allocation2 + $0x7a] sm:$0xff] }
  0x53   : > { %v833_v33 = vmul.f32 %v3920_v41, %v4005_v13  ;;  %v4028_v37 = vadd.f32 %v3986_v54, %v899_v27  ;;  %v584_v19 = vadd.f32 %v568_v18, %v531_v29  ;;  %v674_v38 = vmul.f32 %v3903_v32, %v3979_v49  ;;  %v4078_v24 = vld [vmem:[#allocation2 + $0x80] sm:$0xff] }
  0x54   : > { %987 = vadd.xlane.f32.xlu1 %v971_v20  ;;  %v742_v8 = vadd.f32 %v726_v5, %v689_v28  ;;  %v4035_v43 = vadd.f32 %v3986_v54, %v900_v22  ;;  %v848_v44 = vadd.f32 %v832_v48, %v795_v3  ;;  %v886_v50 = vmul.f32 %v3929_v47, %v4014_v25  ;;  %v4091_v3 = vld [vmem:[#allocation2 + $0x81] sm:$0xff] }
  0x55   : > { %v727_v51 = vmul.f32 %v3908_v34, %v865_v10  ;;  %v972_v45 = vmul.f32 %v4028_v37, %v4028_v37  ;;  %v637_v53 = vadd.f32 %v621_v2, %v584_v19  ;;  %v463_v56 = vmul.f32 %v3880_v21, %v3952_v14 }
  0x56   : > { %941 = vadd.xlane.f32.xlu0 %v4028_v37  ;;  %v796_v52 = vadd.f32 %v780_v63, %v742_v8  ;;  %v901_v57 = vadd.f32 %v885_v35, %v848_v44  ;;  %v781_v58 = vmul.f32 %v3915_v39, %v4020_v31  ;;  %v516_v59 = vmul.f32 %v3885_v23, %v3954_v15  ;;  %v4093_v35 = vld [vmem:[#allocation2 + $0x82] sm:$0xff] }
  0x57   : > { %v569_v46 = vmul.f32 %v3891_v26, %v3956_v16  ;;  %v973_v48 = vmul.f32 %v4035_v43, %v4035_v43  ;;  %v690_v14 = vadd.f32 %v674_v38, %v637_v53  ;;  %v834_v1 = vmul.f32 %v3920_v41, %v4025_v36 }
  0x58   : > { %989 = vadd.xlane.f32.xlu1 %v972_v45  ;;  %v849_v0 = vadd.f32 %v833_v33, %v796_v52  ;;  %v4062_v15 = vadd.f32 %v3986_v54, %v901_v57  ;;  %v887_v16 = vmul.f32 %v3929_v47, %v4032_v42  ;;  %v532_v5 = vadd.f32 %v516_v59, %v463_v56 }
  0x59   : > { %v622_v6 = vmul.f32 %v3898_v30, %v3992_v60  ;;  %v743_v63 = vadd.f32 %v727_v51, %v690_v14  ;;  %v675_v9 = vmul.f32 %v3903_v32, %v4005_v13  ;;  %v464_v11 = vmul.f32 %v3880_v21, %v3973_v40 }
  0x5a   : > { %943 = vadd.xlane.f32.xlu0 %v4035_v43  ;;  %v902_v7 = vadd.f32 %v886_v50, %v849_v0  ;;  %v585_v12 = vadd.f32 %v569_v46, %v532_v5  ;;  %v728_v17 = vmul.f32 %v3908_v34, %v4014_v25  ;;  %v517_v20 = vmul.f32 %v3885_v23, %v3979_v49  ;;  %v4118_v0 = vld [vmem:[#allocation2 + $0x92] sm:$0xff] }
  0x5b   : > { %v570_v22 = vmul.f32 %v3891_v26, %v865_v10  ;;  %v974_v18 = vmul.f32 %v4062_v15, %v4062_v15  ;;  %v797_v27 = vadd.f32 %v781_v58, %v743_v63  ;;  %v782_v40 = vmul.f32 %v3915_v39, %v4051_v55  ;;  %v4112_v58 = vld [vmem:[#allocation2 + $0x90] sm:$0xff] }
  0x5c   : > { %945 = vadd.xlane.f32.xlu1 %v4062_v15  ;;  %v835_v28 = vmul.f32 %v3920_v41, %v4053_v62  ;;  %v638_v29 = vadd.f32 %v622_v6, %v585_v12  ;;  %v888_v49 = vmul.f32 %v3929_v47, %v4059_v4  ;;  %v533_v2 = vadd.f32 %v517_v20, %v464_v11 }
  0x5d   : > { %v623_v10 = vmul.f32 %v3898_v30, %v4020_v31  ;;  %v4096_v33 = vadd.f32 %v3986_v54, %v902_v7  ;;  %v850_v8 = vadd.f32 %v834_v1, %v797_v27  ;;  %v676_v19 = vmul.f32 %v3903_v32, %v4025_v36  ;;  %v4143_v27 = vld [vmem:[#allocation2 + $0x98] sm:$0xff] }
  0x5e   : > { %991 = vadd.xlane.f32.xlu0 %v973_v48  ;;  %v729_v38 = vmul.f32 %v3908_v34, %v4032_v42  ;;  %v691_v44 = vadd.f32 %v675_v9, %v638_v29  ;;  %v586_v50 = vadd.f32 %v570_v22, %v533_v2  ;;  %v465_v51 = vmul.f32 %v3880_v21, %v3992_v60 }
  0x5f   : > { %v518_v45 = vmul.f32 %v3885_v23, %v4005_v13  ;;  %v903_v52 = vadd.f32 %v887_v16, %v850_v8  ;;  %v975_v53 = vmul.f32 %v4096_v33, %v4096_v33  ;;  %v783_v56 = vmul.f32 %v3915_v39, %v4078_v24  ;;  %v4116_v13 = vld [vmem:[#allocation2 + $0x91] sm:$0xff] }
  0x60   : > { %993 = vadd.xlane.f32.xlu1 %v974_v18  ;;  %v571_v57 = vmul.f32 %v3891_v26, %v4014_v25  ;;  %v744_v59 = vadd.f32 %v728_v17, %v691_v44  ;;  %v639_v46 = vadd.f32 %v623_v10, %v586_v50  ;;  %v624_v60 = vmul.f32 %v3898_v30, %v4051_v55 }
  0x61   : > { %v534_v48 = vadd.f32 %v518_v45, %v465_v51  ;;  %v4122_v14 = vadd.f32 %v3986_v54, %v903_v52  ;;  %v836_v25 = vmul.f32 %v3920_v41, %v4091_v3  ;;  %v889_v1 = vmul.f32 %v3929_v47, %v4093_v35 }
  0x62   : > { %947 = vadd.xlane.f32.xlu0 %v4096_v33  ;;  %v677_v16 = vmul.f32 %v3903_v32, %v4053_v62  ;;  %v798_v5 = vadd.f32 %v782_v40, %v744_v59  ;;  %v692_v6 = vadd.f32 %v676_v19, %v639_v46  ;;  %v466_v63 = vmul.f32 %v3880_v21, %v4020_v31 }
  0x63   : > { %v587_v7 = vadd.f32 %v571_v57, %v534_v48  ;;  %v976_v9 = vmul.f32 %v4122_v14, %v4122_v14  ;;  %v730_v11 = vmul.f32 %v3908_v34, %v4059_v4  ;;  %v519_v12 = vmul.f32 %v3885_v23, %v4025_v36 }
  0x64   : > { %949 = vadd.xlane.f32.xlu1 %v4122_v14  ;;  %v572_v17 = vmul.f32 %v3891_v26, %v4032_v42  ;;  %v851_v20 = vadd.f32 %v835_v28, %v798_v5  ;;  %v745_v22 = vadd.f32 %v729_v38, %v692_v6  ;;  %v784_v31 = vmul.f32 %v3915_v39, %v4112_v58  ;;  %v4151_v42 = vld [vmem:[#allocation2 + $0x99] sm:$0xff] }
  0x65   : > { %v640_v18 = vadd.f32 %v624_v60, %v587_v7  ;;  %v837_v40 = vmul.f32 %v3920_v41, %v4116_v13  ;;  %v890_v29 = vmul.f32 %v3929_v47, %v4118_v0  ;;  %v535_v2 = vadd.f32 %v519_v12, %v466_v63  ;;  %v4175_v60 = vld [vmem:[#allocation2 + $0x9a] sm:$0xff] }
  0x66   : > { %995 = vadd.xlane.f32.xlu0 %v975_v53  ;;  %v625_v36 = vmul.f32 %v3898_v30, %v4078_v24  ;;  %v904_v28 = vadd.f32 %v888_v49, %v851_v20  ;;  %v799_v10 = vadd.f32 %v783_v56, %v745_v22  ;;  %v678_v19 = vmul.f32 %v3903_v32, %v4091_v3 }
  0x67   : > { %v693_v8 = vadd.f32 %v677_v16, %v640_v18  ;;  %v588_v38 = vadd.f32 %v572_v17, %v535_v2  ;;  %v467_v44 = vmul.f32 %v3880_v21, %v4051_v55  ;;  %v520_v50 = vmul.f32 %v3885_v23, %v4053_v62  ;;  %v4199_v2 = vld [vmem:[#allocation2 + $0xaa] sm:$0xff] }
  0x68   : > { %997 = vadd.xlane.f32.xlu1 %v976_v9  ;;  %v573_v51 = vmul.f32 %v3891_v26, %v4059_v4  ;;  %v4162_v45 = vadd.f32 %v3986_v54, %v904_v28  ;;  %v852_v49 = vadd.f32 %v836_v25, %v799_v10  ;;  %v731_v53 = vmul.f32 %v3908_v34, %v4093_v35  ;;  %v4177_v25 = vld [vmem:[#allocation2 + $0xa8] sm:$0xff] }
  0x69   : > { %v746_v52 = vadd.f32 %v730_v11, %v693_v8  ;;  %v641_v56 = vadd.f32 %v625_v36, %v588_v38  ;;  %v785_v57 = vmul.f32 %v3915_v39, %v4143_v27  ;;  %v536_v59 = vadd.f32 %v520_v50, %v467_v44 }
  0x6a   : > { %v626_v55 = vmul.f32 %v3898_v30, %v4112_v58  ;;  %951 = vadd.xlane.f32.xlu0 %v4162_v45  ;;  %v905_v62 = vadd.f32 %v889_v1, %v852_v49  ;;  %v977_v4 = vmul.f32 %v4162_v45, %v4162_v45  ;;  %v838_v48 = vmul.f32 %v3920_v41, %v4151_v42  ;;  %v4183_v1 = vld [vmem:[#allocation2 + $0xa9] sm:$0xff] }
  0x6b   : > { %v800_v46 = vadd.f32 %v784_v31, %v746_v52  ;;  %v694_v16 = vadd.f32 %v678_v19, %v641_v56  ;;  %v589_v5 = vadd.f32 %v573_v51, %v536_v59  ;;  %v679_v6 = vmul.f32 %v3903_v32, %v4116_v13  ;;  %v4214_v51 = vld [vmem:[#allocation2 + $0xb0] sm:$0xff] }
  0x6c   : > { %v732_v7 = vmul.f32 %v3908_v34, %v4118_v0  ;;  %v4186_v63 = vadd.f32 %v3986_v54, %v905_v62  ;;  %v468_v11 = vmul.f32 %v3880_v21, %v4078_v24  ;;  %v521_v12 = vmul.f32 %v3885_v23, %v4091_v3  ;;  %v4221_v56 = vld [vmem:[#allocation2 + $0xb1] sm:$0xff] }
  0x6d   : > { %v853_v9 = vadd.f32 %v837_v40, %v800_v46  ;;  %v747_v17 = vadd.f32 %v731_v53, %v694_v16  ;;  %v642_v20 = vadd.f32 %v626_v55, %v589_v5  ;;  %v574_v22 = vmul.f32 %v3891_v26, %v4093_v35  ;;  %v3276_v5 = vld [vmem:[%s5461_s5 + $0xc] ss:$16 sps:$4 sm:$0xff]  }
  0x6e   : > { %v627_v18 = vmul.f32 %v3898_v30, %v4143_v27  ;;  %953 = vadd.xlane.f32.xlu1 %v4186_v63  ;;  %999 = vadd.xlane.f32.xlu0 %v977_v4  ;;  %v978_v31 = vmul.f32 %v4186_v63, %v4186_v63  ;;  %v537_v24 = vadd.f32 %v521_v12, %v468_v11  ;;  %v3274_v4 = vld [vmem:[%s5461_s5 + $0x4] ss:$16 sps:$4 sm:$0xff]   ;;  %v3278_v11 = vld [vmem:[%s5461_s5] ss:$16 sps:$4 sm:$0xff]  }
  0x6f   : > { %v906_v40 = vadd.f32 %v890_v29, %v853_v9  ;;  %v801_v36 = vadd.f32 %v785_v57, %v747_v17  ;;  %v891_v3 = vmul.f32 %v3929_v47, %v4175_v60  ;;  %v695_v28 = vadd.f32 %v679_v6, %v642_v20  ;;  %v4244_v9 = vld [vmem:[#allocation2 + $0xb2] sm:$0xff]  ;;  %1493 = vmatprep.subr.bf16.mxu0 %v3274_v4 }
  0x70   : > { %v786_v35 = vmul.f32 %v3915_v39, %v4177_v25  ;;  %v839_v8 = vmul.f32 %v3920_v41, %v4183_v1  ;;  %v590_v19 = vadd.f32 %v574_v22, %v537_v24  ;;  %v680_v29 = vmul.f32 %v3903_v32, %v4151_v42  ;;  %v768_v22 = vld [vmem:[#allocation2 + $0xc0] sm:$0xff]  ;;  %1606 = vmatprep.subr.bf16.mxu1 %v3276_v5 }
  0x71   : > { %v4206_v10 = vadd.f32 %v3986_v54, %v906_v40  ;;  %v854_v38 = vadd.f32 %v838_v48, %v801_v36  ;;  %v748_v44 = vadd.f32 %v732_v7, %v695_v28  ;;  %v733_v50 = vmul.f32 %v3908_v34, %v4175_v60  ;;  %v821_v36 = vld [vmem:[#allocation2 + $0xc1] sm:$0xff]  ;;  %1494 = vmatpush1.bf16.msra.mxu0 %v3278_v11 }
  0x72   : > { %v469_v49 = vmul.f32 %v3880_v21, %v4112_v58  ;;  %1001 = vadd.xlane.f32.xlu1 %v978_v31  ;;  %v643_v53 = vadd.f32 %v627_v18, %v590_v19  ;;  %v522_v57 = vmul.f32 %v3885_v23, %v4116_v13  ;;  %v892_v62 = vmul.f32 %v3929_v47, %v4199_v2  ;;  %v3279_v31 = vld [vmem:[%s5461_s5 + $0x8] ss:$16 sps:$4 sm:$0xff]  }
  0x73   : > { %955 = vadd.xlane.f32.xlu0 %v4206_v10  ;;  %v979_v52 = vmul.f32 %v4206_v10, %v4206_v10  ;;  %v907_v59 = vadd.f32 %v891_v3, %v854_v38  ;;  %v802_v55 = vadd.f32 %v786_v35, %v748_v44  ;;  %v575_v58 = vmul.f32 %v3891_v26, %v4118_v0 }
  0x74   : > { %v696_v46 = vadd.f32 %v680_v29, %v643_v53  ;;  %v787_v48 = vmul.f32 %v3915_v39, %v4214_v51  ;;  %v538_v16 = vadd.f32 %v522_v57, %v469_v49  ;;  %v628_v13 = vmul.f32 %v3898_v30, %v4177_v25  ;;  %v874_v57 = vld [vmem:[#allocation2 + $0xc2] sm:$0xff]  ;;  %1607 = vmatpush1.bf16.msra.mxu1 %v3279_v31 }
  0x75   : > { %v4240_v6 = vadd.f32 %v3986_v54, %v907_v59  ;;  %v855_v0 = vadd.f32 %v839_v8, %v802_v55  ;;  %v840_v7 = vmul.f32 %v3920_v41, %v4221_v56  ;;  %v681_v20 = vmul.f32 %v3903_v32, %v4183_v1  ;;  %v3284_v55 = vld [vmem:[%s5461_s5 + $0x20] ss:$16 sps:$4 sm:$0xff]  }
  0x76   : > { %v749_v12 = vadd.f32 %v733_v50, %v696_v46  ;;  %v591_v17 = vadd.f32 %v575_v58, %v538_v16  ;;  %v470_v18 = vmul.f32 %v3880_v21, %v4143_v27  ;;  %v523_v3 = vmul.f32 %v3885_v23, %v4151_v42  ;;  %v3282_v50 = vld [vmem:[%s5461_s5 + $0x2c] ss:$16 sps:$4 sm:$0xff]  }
  0x77   : > { %1003 = vadd.xlane.f32.xlu0 %v979_v52  ;;  %957 = vadd.xlane.f32.xlu1 %v4240_v6  ;;  %v980_v40 = vmul.f32 %v4240_v6, %v4240_v6  ;;  %v908_v24 = vadd.f32 %v892_v62, %v855_v0  ;;  %v576_v28 = vmul.f32 %v3891_v26, %v4175_v60  ;;  %v3280_v60 = vld [vmem:[%s5461_s5 + $0x24] ss:$16 sps:$4 sm:$0xff]   ;;  %v769_v16 = vld [vmem:[#allocation2 + $0xc8] sm:$0xff] }
  0x78   : > { %v803_v35 = vadd.f32 %v787_v48, %v749_v12  ;;  %v893_v27 = vmul.f32 %v3929_v47, %v4244_v9  ;;  %v644_v8 = vadd.f32 %v628_v13, %v591_v17  ;;  %v734_v19 = vmul.f32 %v3908_v34, %v4199_v2  ;;  %1495 = vmatprep.subr.bf16.mxu0 %v3280_v60  ;;  %v3291_v60 = vld [vmem:[%s5461_s5 + $0x48] ss:$16 sps:$4 sm:$0xff]  }
  0x79   : > { %v4268_v29 = vadd.f32 %v3986_v54, %v908_v24  ;;  %v788_v38 = vmul.f32 %v3915_v39, %v768_v22  ;;  %v539_v44 = vadd.f32 %v523_v3, %v470_v18  ;;  %v629_v42 = vmul.f32 %v3898_v30, %v4214_v51  ;;  %1608 = vmatprep.subr.bf16.mxu1 %v3282_v50  ;;  %v3286_v18 = vld [vmem:[%s5461_s5 + $0x44] ss:$16 sps:$4 sm:$0xff]  }
  0x7a   : > { %v856_v49 = vadd.f32 %v840_v7, %v803_v35  ;;  %v697_v52 = vadd.f32 %v681_v20, %v644_v8  ;;  %v841_v53 = vmul.f32 %v3920_v41, %v821_v36  ;;  %v682_v59 = vmul.f32 %v3903_v32, %v4221_v56  ;;  %1496 = vmatpush1.bf16.msra.mxu0 %v3284_v55 }
  0x7b   : > { %1005 = vadd.xlane.f32.xlu1 %v980_v40  ;;  %959 = vadd.xlane.f32.xlu0 %v4268_v29  ;;  %v981_v62 = vmul.f32 %v4268_v29, %v4268_v29  ;;  %v592_v58 = vadd.f32 %v576_v28, %v539_v44  ;;  %v471_v4 = vmul.f32 %v3880_v21, %v4177_v25  ;;  %v3285_v25 = vld [vmem:[%s5461_s5 + $0x28] ss:$16 sps:$4 sm:$0xff]   ;;  %v3288_v28 = vld [vmem:[%s5461_s5 + $0x4c] ss:$16 sps:$4 sm:$0xff]  }
  0x7c   : > { %v909_v46 = vadd.f32 %v893_v27, %v856_v49  ;;  %v750_v48 = vadd.f32 %v734_v19, %v697_v52  ;;  %v524_v13 = vmul.f32 %v3885_v23, %v4183_v1  ;;  %v577_v5 = vmul.f32 %v3891_v26, %v4199_v2  ;;  %v822_v1 = vld [vmem:[#allocation2 + $0xc9] sm:$0xff]  ;;  %v770_v19 = vld [vmem:[#allocation2 + $0xd8] sm:$0xff]  ;;  %1609 = vmatpush1.bf16.msra.mxu1 %v3285_v25  ;;  %v3298_v25 = vld [vmem:[%s5461_s5 + $0x84] ss:$16 sps:$4 sm:$0xff]  }
  0x7d   : > { %v894_v0 = vmul.f32 %v3929_v47, %v874_v57  ;;  %v645_v7 = vadd.f32 %v629_v42, %v592_v58  ;;  %v735_v11 = vmul.f32 %v3908_v34, %v4244_v9  ;;  %v630_v2 = vmul.f32 %v3898_v30, %v768_v22  ;;  %v875_v27 = vld [vmem:[#allocation2 + $0xca] sm:$0xff]  ;;  %1497 = vmatprep.subr.bf16.mxu0 %v3286_v18 }
  0x7e   : > { %v4301_v12 = vadd.f32 %v3986_v54, %v909_v46  ;;  %v804_v17 = vadd.f32 %v788_v38, %v750_v48  ;;  %v540_v20 = vadd.f32 %v524_v13, %v471_v4  ;;  %v789_v40 = vmul.f32 %v3915_v39, %v769_v16  ;;  %1610 = vmatprep.subr.bf16.mxu1 %v3288_v28  ;;  %v3296_v4 = vld [vmem:[%s5461_s5 + $0x60] ss:$16 sps:$4 sm:$0xff]   ;;  %v3303_v28 = vld [vmem:[%s5461_s5 + $0x88] ss:$16 sps:$4 sm:$0xff]  }
  0x7f   : > { %1007 = vadd.xlane.f32.xlu0 %v981_v62  ;;  %v698_v31 = vadd.f32 %v682_v59, %v645_v7  ;;  %v683_v24 = vmul.f32 %v3903_v32, %v821_v36  ;;  %v472_v3 = vmul.f32 %v3880_v21, %v4214_v51  ;;  %v525_v38 = vmul.f32 %v3885_v23, %v4221_v56  ;;  %v3290_v21 = vld [vmem:[%s5461_s5 + $0x40] ss:$16 sps:$4 sm:$0xff]  }
  0x80   : > { %961 = vadd.xlane.f32.xlu1 %v4301_v12  ;;  %v982_v22 = vmul.f32 %v4301_v12, %v4301_v12  ;;  %v857_v35 = vadd.f32 %v841_v53, %v804_v17  ;;  %v593_v8 = vadd.f32 %v577_v5, %v540_v20  ;;  %v842_v36 = vmul.f32 %v3920_v41, %v822_v1  ;;  %v823_v23 = vld [vmem:[#allocation2 + $0xd9] sm:$0xff]  ;;  %v3292_v53 = vld [vmem:[%s5461_s5 + $0x64] ss:$16 sps:$4 sm:$0xff]  }
  0x81   : > { %v751_v51 = vadd.f32 %v735_v11, %v698_v31  ;;  %v736_v44 = vmul.f32 %v3908_v34, %v874_v57  ;;  %v578_v42 = vmul.f32 %v3891_v26, %v4244_v9  ;;  %v541_v56 = vadd.f32 %v525_v38, %v472_v3  ;;  %v3294_v26 = vld [vmem:[%s5461_s5 + $0x6c] ss:$16 sps:$4 sm:$0xff]   ;;  %1498 = vmatpush1.bf16.msra.mxu0 %v3290_v21  ;;  %v771_v5 = vld [vmem:[#allocation2 + $0xe0] sm:$0xff] }
  0x82   : > { %v910_v50 = vadd.f32 %v894_v0, %v857_v35  ;;  %v646_v49 = vadd.f32 %v630_v2, %v593_v8  ;;  %v631_v52 = vmul.f32 %v3898_v30, %v769_v16  ;;  %v895_v57 = vmul.f32 %v3929_v47, %v875_v27  ;;  %v876_v16 = vld [vmem:[#allocation2 + $0xda] sm:$0xff]  ;;  %1611 = vmatpush1.bf16.msra.mxu1 %v3291_v60  ;;  %v877_v3 = vld [vmem:[#allocation2 + $0xe2] sm:$0xff] }
  0x83   : > { %v805_v9 = vadd.f32 %v789_v40, %v751_v51  ;;  %v790_v59 = vmul.f32 %v3915_v39, %v770_v19  ;;  %v684_v55 = vmul.f32 %v3903_v32, %v822_v1  ;;  %v594_v58 = vadd.f32 %v578_v42, %v541_v56  ;;  %1499 = vmatprep.subr.bf16.mxu0 %v3292_v53  ;;  %v3297_v32 = vld [vmem:[%s5461_s5 + $0x68] ss:$16 sps:$4 sm:$0xff]   ;;  %v3302_v40 = vld [vmem:[%s5461_s5 + $0x80] ss:$16 sps:$4 sm:$0xff]   ;;  %v3306_v8 = vld [vmem:[%s5461_s5 + $0xac] ss:$16 sps:$4 sm:$0xff]  }
  0x84   : > { %1009 = vadd.xlane.f32.xlu1 %v982_v22  ;;  %v4340_v30 = vadd.f32 %v3986_v54, %v910_v50  ;;  %v699_v62 = vadd.f32 %v683_v24, %v646_v49  ;;  %v843_v48 = vmul.f32 %v3920_v41, %v823_v23  ;;  %v737_v13 = vmul.f32 %v3908_v34, %v875_v27  ;;  %v3300_v34 = vld [vmem:[%s5461_s5 + $0x8c] ss:$16 sps:$4 sm:$0xff]   ;;  %v824_v1 = vld [vmem:[#allocation2 + $0xe1] sm:$0xff] }
  0x85   : > { %v858_v46 = vadd.f32 %v842_v36, %v805_v9  ;;  %v647_v11 = vadd.f32 %v631_v52, %v594_v58  ;;  %1612 = vmatprep.subr.bf16.mxu1 %v3294_v26  ;;  %v896_v2 = vmul.f32 %v3929_v47, %v876_v16  ;;  %v791_v31 = vmul.f32 %v3915_v39, %v771_v5  ;;  %v3304_v27 = vld [vmem:[%s5461_s5 + $0xa4] ss:$16 sps:$4 sm:$0xff]   ;;  %v3309_v36 = vld [vmem:[%s5461_s5 + $0xa8] ss:$16 sps:$4 sm:$0xff]   ;;  %v3312_v60 = vld [vmem:[%s5461_s5 + $0xcc] ss:$16 sps:$4 sm:$0xff]  }
  0x86   : > { %963 = vadd.xlane.f32.xlu0 %v4340_v30  ;;  %v983_v0 = vmul.f32 %v4340_v30, %v4340_v30  ;;  %v752_v7 = vadd.f32 %v736_v44, %v699_v62  ;;  %1500 = vmatpush1.bf16.msra.mxu0 %v3296_v4  ;;  %v844_v39 = vmul.f32 %v3920_v41, %v824_v1  ;;  %v3308_v41 = vld [vmem:[%s5461_s5 + $0xa0] ss:$16 sps:$4 sm:$0xff]   ;;  %v3315_v56 = vld [vmem:[%s5461_s5 + $0xc8] ss:$16 sps:$4 sm:$0xff]   ;;  %v3316_v53 = vld [vmem:[%s5461_s5 + $0xe4] ss:$16 sps:$4 sm:$0xff]  }
  0x87   : > { %v911_v17 = vadd.f32 %v895_v57, %v858_v46  ;;  %v700_v18 = vadd.f32 %v684_v55, %v647_v11  ;;  %1613 = vmatpush1.bf16.msra.mxu1 %v3297_v32  ;;  %1501 = vmatprep.subr.bf16.mxu0 %v3298_v25  ;;  %v897_v51 = vmul.f32 %v3929_v47, %v877_v3  ;;  %v3310_v47 = vld [vmem:[%s5461_s5 + $0xc4] ss:$16 sps:$4 sm:$0xff]   ;;  %v3314_v23 = vld [vmem:[%s5461_s5 + $0xc0] ss:$16 sps:$4 sm:$0xff]   ;;  %v3318_v26 = vld [vmem:[%s5461_s5 + $0xec] ss:$16 sps:$4 sm:$0xff]  }
  0x88   : > { %v806_v20 = vadd.f32 %v790_v59, %v752_v7  ;;  %1614 = vmatprep.subr.bf16.mxu1 %v3300_v34  ;;  %v3321_v57 = vld [vmem:[%s5461_s5 + $0xe8] ss:$16 sps:$4 sm:$0xff]   ;;  %v3709_v59 = vmov 0   ;;  %v3322_v55 = vld [vmem:[%s5463_s7 + $0x40] sm:$0xff]  }
  0x89   : > { %v4365_v24 = vadd.f32 %v3986_v54, %v911_v17  ;;  %v753_v35 = vadd.f32 %v737_v13, %v700_v18  ;;  %1525 = vmatprep.mubr.bf16.mxu0 %v3709_v59  ;;  %1638 = vmatprep.mubr.bf16.mxu1 %v3709_v59  ;;  %v3324_v62 = vld [vmem:[%s5463_s7 + $0xc0] sm:$0xff]  }
  0x8a   : > { %1011 = vadd.xlane.f32.xlu0 %v983_v0  ;;  %v859_v22 = vadd.f32 %v843_v48, %v806_v20  ;;  %1502 = vmatpush1.bf16.msra.mxu0 %v3302_v40 }
  0x8b   : > { %965 = vadd.xlane.f32.xlu1 %v4365_v24  ;;  %v984_v19 = vmul.f32 %v4365_v24, %v4365_v24  ;;  %v807_v21 = vadd.f32 %v791_v31, %v753_v35  ;;  %1615 = vmatpush1.bf16.msra.mxu1 %v3303_v28 }
  0x8c   : > { %v912_v38 = vadd.f32 %v896_v2, %v859_v22  ;;  %1503 = vmatprep.subr.bf16.mxu0 %v3304_v27  ;;  %1616 = vmatprep.subr.bf16.mxu1 %v3306_v8 }
  0x8d   : > { %v860_v42 = vadd.f32 %v844_v39, %v807_v21 }
  0x8e   : > { %v4388_v44 = vadd.f32 %v3986_v54, %v912_v38  ;;  %1504 = vmatpush1.bf16.msra.mxu0 %v3308_v41 }
  0x8f   : > { %1013 = vadd.xlane.f32.xlu1 %v984_v19  ;;  %v913_v50 = vadd.f32 %v897_v51, %v860_v42  ;;  %1617 = vmatpush1.bf16.msra.mxu1 %v3309_v36 }
  0x90   : > { %967 = vadd.xlane.f32.xlu0 %v4388_v44  ;;  %v985_v49 = vmul.f32 %v4388_v44, %v4388_v44  ;;  %1505 = vmatprep.subr.bf16.mxu0 %v3310_v47  ;;  %v4439_v47 = vld [vmem:[%s5459_s3] ss:$0 sm:$0xff] }
  0x91   : > { %v4406_v52 = vadd.f32 %v3986_v54, %v913_v50  ;;  %1618 = vmatprep.subr.bf16.mxu1 %v3312_v60  ;;  %v3320_v54 = vld [vmem:[%s5461_s5 + $0xe0] ss:$16 sps:$4 sm:$0xff]  }
  0x92   : > { %1506 = vmatpush1.bf16.msra.mxu0 %v3314_v23 }
  0x93   : > { %969 = vadd.xlane.f32.xlu1 %v4406_v52  ;;  %v986_v9 = vmul.f32 %v4406_v52, %v4406_v52  ;;  %1619 = vmatpush1.bf16.msra.mxu1 %v3315_v56 }
  0x94   : > { %1015 = vadd.xlane.f32.xlu0 %v985_v49  ;;  %1507 = vmatprep.subr.bf16.mxu0 %v3316_v53 }
  0x95   : > { %1620 = vmatprep.subr.bf16.mxu1 %v3318_v26 }
  0x96   : > { %1508 = vmatpush1.bf16.msra.mxu0 %v3320_v54 }
  0x97   : > { %1017 = vadd.xlane.f32.xlu1 %v986_v9  ;;  %1621 = vmatpush1.bf16.msra.mxu1 %v3321_v57 }
  0x98   : > { %3071 = vmatprep.subr.bf16.mxu0 %v3322_v55  ;;  %3135 = vmatprep.subr.bf16.mxu1 %v3324_v62 }
  0xdf   : > { %v940_v58 = vpop.xlane.xlu0 %939 }
  0xe0   : > { %v1019_v4 = vmul.f32 0.0078125, %v940_v58 }
  0xe1   : > { %v988_v46 = vpop.xlane.xlu1 %987 }
  0xe2   : > { %v1051_v48 = vmul.f32 %v1019_v4, %v1019_v4  ;;  %v1035_v16 = vmul.f32 0.0078125, %v988_v46  ;;  %v1083_v51 = vsub.f32 %v4001_v61, %v1019_v4  ;;  %v4446_v61 = vld [vmem:[%s5460_s4] ss:$0 sm:$0xff] }
  0xe3   : > { %v942_v5 = vpop.xlane.xlu0 %941 }
  0xe4   : > { %v1067_v13 = vsub.f32 %v1035_v16, %v1051_v48  ;;  %v1020_v32 = vmul.f32 0.0078125, %v942_v5 }
  0xe5   : > { %v990_v7 = vpop.xlane.xlu1 %989 }
  0xe6   : > { %v1099_v0 = vadd.f32 1e-06, %v1067_v13  ;;  %v1052_v11 = vmul.f32 %v1020_v32, %v1020_v32  ;;  %v1036_v25 = vmul.f32 0.0078125, %v990_v7  ;;  %v1084_v56 = vsub.f32 %v4028_v37, %v1020_v32 }
  0xe7   : > { %v944_v34 = vpop.xlane.xlu0 %943 }
  0xe8   : > { %3354 = vrsqrt.f32 %v1099_v0  ;;  %v1068_v17 = vsub.f32 %v1036_v25, %v1052_v11  ;;  %v1021_v1 = vmul.f32 0.0078125, %v944_v34 }
  0xe9   : > { %v946_v20 = vpop.xlane.xlu1 %945 }
  0xea   : > { %v1100_v2 = vadd.f32 1e-06, %v1068_v17  ;;  %v1053_v18 = vmul.f32 %v1021_v1, %v1021_v1  ;;  %v1022_v31 = vmul.f32 0.0078125, %v946_v20  ;;  %v1085_v11 = vsub.f32 %v4035_v43, %v1021_v1 }
  0xeb   : > { %v992_v40 = vpop.xlane.xlu0 %991 }
  0xec   : > { %3356 = vrsqrt.f32 %v1100_v2  ;;  %v1037_v3 = vmul.f32 0.0078125, %v992_v40  ;;  %v1054_v22 = vmul.f32 %v1022_v31, %v1022_v31  ;;  %v1086_v40 = vsub.f32 %v4062_v15, %v1022_v31 }
  0xed   : > { %v994_v28 = vpop.xlane.xlu1 %993 }
  0xee   : > { %v1069_v35 = vsub.f32 %v1037_v3, %v1053_v18  ;;  %v1038_v39 = vmul.f32 0.0078125, %v994_v28 }
  0xef   : > { %v948_v27 = vpop.xlane.xlu0 %947 }
  0xf0   : > { %v1101_v8 = vadd.f32 1e-06, %v1069_v35  ;;  %v1070_v19 = vsub.f32 %v1038_v39, %v1054_v22  ;;  %v4431_v38 = vmul.f32 0.0078125, %v948_v27 }
  0xf1   : > { %v950_v41 = vpop.xlane.xlu1 %949 }
  0xf2   : > { %v3355_v21 = vpop.eup %3354  ;;  %3358 = vrsqrt.f32 %v1101_v8  ;;  %v1102_v36 = vadd.f32 1e-06, %v1070_v19  ;;  %v1055_v42 = vmul.f32 %v4431_v38, %v4431_v38  ;;  %v4441_v60 = vmul.f32 0.0078125, %v950_v41 }
  0xf3   : > { %v996_v50 = vpop.xlane.xlu0 %995  ;;  %v1131_v49 = vmul.f32 %v3355_v21, %v1083_v51  ;;  %v1087_v15 = vsub.f32 %v4096_v33, %v4431_v38 }
  0xf4   : > { %3360 = vrsqrt.f32 %v1102_v36  ;;  %v1039_v23 = vmul.f32 0.0078125, %v996_v50  ;;  %v1056_v54 = vmul.f32 %v4441_v60, %v4441_v60 }
  0xf5   : > { %v998_v53 = vpop.xlane.xlu1 %997  ;;  %v1153_v26 = vmul.f32 %v4439_v47, %v1131_v49 }
  0xf6   : > { %v3357_v9 = vpop.eup %3356  ;;  %v1071_v57 = vsub.f32 %v1039_v23, %v1055_v42  ;;  %v1040_v55 = vmul.f32 0.0078125, %v998_v53 }
  0xf7   : > { %v1132_v62 = vmul.f32 %v3357_v9, %v1084_v56  ;;  %v1175_v58 = vadd.f32 %v4446_v61, %v1153_v26  ;;  %v952_v48 = vpop.xlane.xlu0 %951  ;;  %v1088_v56 = vsub.f32 %v4122_v14, %v4441_v60 }
  0xf8   : > { %v1103_v4 = vadd.f32 1e-06, %v1071_v57  ;;  %v1072_v46 = vsub.f32 %v1040_v55, %v1056_v54  ;;  %v4453_v16 = vmul.f32 0.0078125, %v952_v48 }
  0xf9   : > { %v1154_v13 = vmul.f32 %v4439_v47, %v1132_v62  ;;  %v1207_v37 = vmul.f32 0.70710677, %v1175_v58 }
  0xfa   : > { %3362 = vrsqrt.f32 %v1103_v4  ;;  %v1104_v5 = vadd.f32 1e-06, %v1072_v46  ;;  %v1057_v32 = vmul.f32 %v4453_v16, %v4453_v16  ;;  %v1191_v46 = vmul.f32 0.5, %v1175_v58 }
  0xfb   : > { %v1176_v0 = vadd.f32 %v4446_v61, %v1154_v13  ;;  %3364 = verf.f32 %v1207_v37  ;;  %v954_v25 = vpop.xlane.xlu1 %953  ;;  %v1000_v34 = vpop.xlane.xlu0 %999 }
  0xfc   : > { %v3359_v7 = vpop.eup %3358  ;;  %3366 = vrsqrt.f32 %v1104_v5  ;;  %v4460_v17 = vmul.f32 0.0078125, %v954_v25  ;;  %v1041_v20 = vmul.f32 0.0078125, %v1000_v34 }
  0xfd   : > { %v1208_v2 = vmul.f32 0.70710677, %v1176_v0  ;;  %v1133_v3 = vmul.f32 %v3359_v7, %v1085_v11  ;;  %v1192_v48 = vmul.f32 0.5, %v1176_v0  ;;  %v1089_v0 = vsub.f32 %v4162_v45, %v4453_v16 }
  0xfe   : > { %v3361_v18 = vpop.eup %3360  ;;  %v1073_v28 = vsub.f32 %v1041_v20, %v1057_v32  ;;  %v1058_v43 = vmul.f32 %v4460_v17, %v4460_v17 }
  0xff   : > { %3368 = verf.f32 %v1208_v2  ;;  %v1002_v22 = vpop.xlane.xlu1 %1001  ;;  %v1134_v39 = vmul.f32 %v3361_v18, %v1086_v40  ;;  %v1155_v27 = vmul.f32 %v4439_v47, %v1133_v3 }
 0x100   : > { %v956_v35 = vpop.xlane.xlu0 %955  ;;  %v1105_v1 = vadd.f32 1e-06, %v1073_v28  ;;  %v1042_v8 = vmul.f32 0.0078125, %v1002_v22 }
 0x101   : > { %v4466_v19 = vmul.f32 0.0078125, %v956_v35  ;;  %v1156_v21 = vmul.f32 %v4439_v47, %v1134_v39  ;;  %v4470_v51 = vadd.f32 %v4446_v61, %v1155_v27 }
 0x102   : > { %3370 = vrsqrt.f32 %v1105_v1  ;;  %v1074_v31 = vsub.f32 %v1042_v8, %v1058_v43  ;;  %v3323_v8 = vld [vmem:[%s5463_s7] sm:$0xff]  }
 0x103   : > { %v1059_v41 = vmul.f32 %v4466_v19, %v4466_v19  ;;  %v4477_v50 = vadd.f32 %v4446_v61, %v1156_v21  ;;  %v1209_v49 = vmul.f32 0.70710677, %v4470_v51  ;;  %v3325_v21 = vld [vmem:[%s5463_s7 + $0x80] sm:$0xff]  }
 0x104   : > { %v3363_v36 = vpop.eup %3362  ;;  %v1004_v42 = vpop.xlane.xlu0 %1003  ;;  %v1106_v53 = vadd.f32 1e-06, %v1074_v31  ;;  %v3326_v31 = vld [vmem:[%s5463_s7 + $0x48] sm:$0xff]  }
 0x105   : > { %v3365_v23 = vpop.eup %3364  ;;  %v958_v26 = vpop.xlane.xlu1 %957  ;;  %v1043_v9 = vmul.f32 0.0078125, %v1004_v42  ;;  %v1135_v33 = vmul.f32 %v3363_v36, %v1087_v15  ;;  %v1210_v57 = vmul.f32 0.70710677, %v4477_v50  ;;  %v1090_v36 = vsub.f32 %v4186_v63, %v4460_v17  ;;  %v3327_v17 = vld [vmem:[%s5463_s7 + $0x8] sm:$0xff]  }
 0x106   : > { %v3367_v38 = vpop.eup %3366  ;;  %v4482_v54 = vmul.f32 0.0078125, %v958_v26  ;;  %3372 = vrsqrt.f32 %v1106_v53  ;;  %v1239_v13 = vadd.f32 1.0, %v3365_v23  ;;  %v1091_v53 = vsub.f32 %v4206_v10, %v4466_v19 }
 0x107   : > { %v1075_v55 = vsub.f32 %v1043_v9, %v1059_v41  ;;  %v1136_v62 = vmul.f32 %v3367_v38, %v1088_v56  ;;  %v1157_v4 = vmul.f32 %v4439_v47, %v1135_v33  ;;  %3374 = verf.f32 %v1209_v49  ;;  %v3328_v41 = vld [vmem:[%s5463_s7 + $0xc8] sm:$0xff]  }
 0x108   : > { %v960_v5 = vpop.xlane.xlu0 %959  ;;  %3376 = verf.f32 %v1210_v57  ;;  %v1060_v11 = vmul.f32 %v4482_v54, %v4482_v54  ;;  %v1255_v3 = vmul.f32 %v1239_v13, %v1191_v46  ;;  %v3329_v38 = vld [vmem:[%s5463_s7 + $0x88] sm:$0xff]   ;;  %v3332_v46 = vld [vmem:[%s5463_s7 + $0xd0] sm:$0xff]   ;;  %v1194_v13 = vmul.f32 0.5, %v4477_v50 }
 0x109   : > { %v3369_v37 = vpop.eup %3368  ;;  %v1107_v14 = vadd.f32 1e-06, %v1075_v55  ;;  %v1006_v60 = vpop.xlane.xlu1 %1005  ;;  %v1158_v32 = vmul.f32 %v4439_v47, %v1136_v62  ;;  %v4488_v7 = vadd.f32 %v4446_v61, %v1157_v4  ;;  %v4492_v34 = vmul.f32 0.0078125, %v960_v5  ;;  %v3330_v4 = vld [vmem:[%s5463_s7 + $0x50] sm:$0xff]  }
 0x10a   : > { %v1044_v25 = vmul.f32 0.0078125, %v1006_v60  ;;  %v1240_v58 = vadd.f32 1.0, %v3369_v37  ;;  %v1193_v55 = vmul.f32 0.5, %v4470_v51 }
 0x10b   : > { %3378 = vrsqrt.f32 %v1107_v14  ;;  %v4497_v20 = vadd.f32 %v4446_v61, %v1158_v32  ;;  %v1211_v2 = vmul.f32 0.70710677, %v4488_v7  ;;  %v1061_v40 = vmul.f32 %v4492_v34, %v4492_v34 }
 0x10c   : > { %v1076_v18 = vsub.f32 %v1044_v25, %v1060_v11  ;;  %v1256_v28 = vmul.f32 %v1240_v58, %v1192_v48  ;;  %v3371_v22 = vpop.eup %3370  ;;  %v1008_v35 = vpop.xlane.xlu0 %1007 }
 0x10d   : > { %v1212_v39 = vmul.f32 0.70710677, %v4497_v20  ;;  %3380 = verf.f32 %v1211_v2  ;;  %v962_v43 = vpop.xlane.xlu1 %961  ;;  %v1045_v45 = vmul.f32 0.0078125, %v1008_v35  ;;  %v1137_v1 = vmul.f32 %v3371_v22, %v1089_v0 }
 0x10e   : > { %v1108_v27 = vadd.f32 1e-06, %v1076_v18  ;;  %v1271_v16 = vpack.c.bf16 %v1256_v28, %v1255_v3  ;;  %v4509_v15 = vmul.f32 0.0078125, %v962_v43 }
 0x10f   : > { %3382 = verf.f32 %v1212_v39  ;;  %v1077_v42 = vsub.f32 %v1045_v45, %v1061_v40  ;;  %v1159_v49 = vmul.f32 %v4439_v47, %v1137_v1  ;;  %v1092_v40 = vsub.f32 %v4240_v6, %v4482_v54  ;;  %v3331_v39 = vld [vmem:[%s5463_s7 + $0x10] sm:$0xff]   ;;  %v3334_v54 = vld [vmem:[%s5463_s7 + $0x58] sm:$0xff]  }
 0x110   : > { %3384 = vrsqrt.f32 %v1108_v27  ;;  %1526 = vmatmul.mubr.bf16.vlgmr.msra.gmra.mrb[0].mxu0 %v1271_v16  ;;  %1639 = vmatmul.mubr.bf16.vlgmr.msra.gmra.mrb[0].mxu1 %v1271_v16  ;;  %v3373_v23 = vpop.eup %3372  ;;  %v1062_v10 = vmul.f32 %v4509_v15, %v4509_v15  ;;  %v3333_v27 = vld [vmem:[%s5463_s7 + $0x90] sm:$0xff]   ;;  %v1195_v1 = vmul.f32 0.5, %v4488_v7 }
 0x111   : > { %1535 = vmatprep.mubr.bf16.mxu0 %v3709_v59  ;;  %1648 = vmatprep.mubr.bf16.mxu1 %v3709_v59  ;;  %v3375_v56 = vpop.eup %3374  ;;  %v1109_v26 = vadd.f32 1e-06, %v1077_v42  ;;  %v1010_v9 = vpop.xlane.xlu1 %1009  ;;  %v1138_v33 = vmul.f32 %v3373_v23, %v1090_v36  ;;  %v4525_v63 = vadd.f32 %v4446_v61, %v1159_v49 }
 0x112   : > { %3072 = vmatpush3.bf16.msra.mxu0 %v3323_v8  ;;  %3136 = vmatpush3.bf16.msra.mxu1 %v3325_v21  ;;  %v3377_v57 = vpop.eup %3376  ;;  %v1046_v19 = vmul.f32 0.0078125, %v1010_v9  ;;  %v1241_v62 = vadd.f32 1.0, %v3375_v56  ;;  %v3336_v8 = vld [vmem:[%s5463_s7 + $0xd8] sm:$0xff]  }
 0x113   : > { %3073 = vmatprep.subr.bf16.mxu0 %v3326_v31  ;;  %3137 = vmatprep.subr.bf16.mxu1 %v3328_v41  ;;  %3386 = vrsqrt.f32 %v1109_v26  ;;  %v964_v48 = vpop.xlane.xlu0 %963  ;;  %v1242_v37 = vadd.f32 1.0, %v3377_v57  ;;  %v1160_v14 = vmul.f32 %v4439_v47, %v1138_v33  ;;  %v1213_v11 = vmul.f32 0.70710677, %v4525_v63  ;;  %v3338_v57 = vld [vmem:[%s5463_s7 + $0x60] sm:$0xff]  }
 0x114   : > { %v1078_v51 = vsub.f32 %v1046_v19, %v1062_v10  ;;  %v4544_v5 = vmul.f32 0.0078125, %v964_v48  ;;  %v1257_v32 = vmul.f32 %v1241_v62, %v1193_v55  ;;  %v1196_v41 = vmul.f32 0.5, %v4497_v20  ;;  %v3337_v20 = vld [vmem:[%s5463_s7 + $0x98] sm:$0xff]   ;;  %v3340_v10 = vld [vmem:[%s5463_s7 + $0xe0] sm:$0xff]  }
 0x115   : > { %v3379_v60 = vpop.eup %3378  ;;  %v1258_v25 = vmul.f32 %v1242_v37, %v1194_v13  ;;  %v4548_v58 = vadd.f32 %v4446_v61, %v1160_v14  ;;  %3388 = verf.f32 %v1213_v11  ;;  %v1093_v26 = vsub.f32 %v4268_v29, %v4492_v34  ;;  %v3339_v37 = vld [vmem:[%s5463_s7 + $0x20] sm:$0xff]  }
 0x116   : > { %v1139_v0 = vmul.f32 %v3379_v60, %v1091_v53  ;;  %3074 = vmatpush3.bf16.msra.mxu0 %v3327_v17  ;;  %3138 = vmatpush3.bf16.msra.mxu1 %v3329_v38  ;;  %v1110_v18 = vadd.f32 1e-06, %v1078_v51  ;;  %v1063_v50 = vmul.f32 %v4544_v5, %v4544_v5  ;;  %v3335_v53 = vld [vmem:[%s5463_s7 + $0x18] sm:$0xff]   ;;  %v3341_v14 = vld [vmem:[%s5463_s7 + $0xa0] sm:$0xff]   ;;  %v1094_v11 = vsub.f32 %v4301_v12, %v4509_v15 }
 0x117   : > { %v3381_v2 = vpop.eup %3380  ;;  %3075 = vmatprep.subr.bf16.mxu0 %v3330_v4  ;;  %3139 = vmatprep.subr.bf16.mxu1 %v3332_v46  ;;  %v1012_v3 = vpop.xlane.xlu0 %1011  ;;  %v1272_v28 = vpack.c.bf16 %v1258_v25, %v1257_v32  ;;  %v1214_v35 = vmul.f32 0.70710677, %v4548_v58  ;;  %v1197_v12 = vmul.f32 0.5, %v4525_v63 }
 0x118   : > { %v1243_v22 = vadd.f32 1.0, %v3381_v2  ;;  %3390 = vrsqrt.f32 %v1110_v18  ;;  %v966_v45 = vpop.xlane.xlu1 %965  ;;  %v1047_v16 = vmul.f32 0.0078125, %v1012_v3  ;;  %v1161_v6 = vmul.f32 %v4439_v47, %v1139_v0 }
 0x119   : > { %v3383_v43 = vpop.eup %3382  ;;  %v4569_v31 = vmul.f32 0.0078125, %v966_v45  ;;  %1536 = vmatmul.mubr.bf16.gmra.mrb[4].mxu0 %v1272_v28  ;;  %1649 = vmatmul.mubr.bf16.gmra.mrb[4].mxu1 %v1272_v28  ;;  %3392 = verf.f32 %v1214_v35 }
 0x11a   : > { %v3385_v21 = vpop.eup %3384  ;;  %v1244_v36 = vadd.f32 1.0, %v3383_v43  ;;  %v1079_v7 = vsub.f32 %v1047_v16, %v1063_v50  ;;  %1545 = vmatprep.mubr.bf16.mxu0 %v3709_v59  ;;  %1658 = vmatprep.mubr.bf16.mxu1 %v3709_v59  ;;  %v4575_v49 = vadd.f32 %v4446_v61, %v1161_v6  ;;  %v1259_v23 = vmul.f32 %v1243_v22, %v1195_v1 }
 0x11b   : > { %v1140_v42 = vmul.f32 %v3385_v21, %v1092_v40  ;;  %3076 = vmatpush3.bf16.msra.mxu0 %v3331_v39  ;;  %3140 = vmatpush3.bf16.msra.mxu1 %v3333_v27  ;;  %v1064_v29 = vmul.f32 %v4569_v31, %v4569_v31  ;;  %v1198_v27 = vmul.f32 0.5, %v4548_v58 }
 0x11c   : > { %v1260_v56 = vmul.f32 %v1244_v36, %v1196_v41  ;;  %v1111_v9 = vadd.f32 1e-06, %v1079_v7  ;;  %v1014_v33 = vpop.xlane.xlu1 %1013  ;;  %v1215_v38 = vmul.f32 0.70710677, %v4575_v49  ;;  %3077 = vmatprep.subr.bf16.mxu0 %v3334_v54  ;;  %3141 = vmatprep.subr.bf16.mxu1 %v3336_v8  ;;  %v1095_v41 = vsub.f32 %v4340_v30, %v4544_v5 }
 0x11d   : > { %v1162_v17 = vmul.f32 %v4439_v47, %v1140_v42  ;;  %v3387_v19 = vpop.eup %3386  ;;  %v1048_v34 = vmul.f32 0.0078125, %v1014_v33  ;;  %v968_v55 = vpop.xlane.xlu0 %967 }
 0x11e   : > { %v1273_v62 = vpack.c.bf16 %v1260_v56, %v1259_v23  ;;  %3394 = vrsqrt.f32 %v1111_v9  ;;  %v4595_v4 = vmul.f32 0.0078125, %v968_v55  ;;  %v1141_v48 = vmul.f32 %v3387_v19, %v1093_v26 }
 0x11f   : > { %v4598_v46 = vadd.f32 %v4446_v61, %v1162_v17  ;;  %v1080_v13 = vsub.f32 %v1048_v34, %v1064_v29  ;;  %3396 = verf.f32 %v1215_v38  ;;  %3078 = vmatpush3.bf16.msra.mxu0 %v3335_v53  ;;  %3142 = vmatpush3.bf16.msra.mxu1 %v3337_v20  ;;  %v3389_v60 = vpop.eup %3388  ;;  %v1096_v9 = vsub.f32 %v4365_v24, %v4569_v31 }
 0x120   : > { %v1065_v51 = vmul.f32 %v4595_v4, %v4595_v4  ;;  %3079 = vmatprep.subr.bf16.mxu0 %v3338_v57  ;;  %3143 = vmatprep.subr.bf16.mxu1 %v3340_v10  ;;  %v970_v0 = vpop.xlane.xlu1 %969  ;;  %v1245_v18 = vadd.f32 1.0, %v3389_v60  ;;  %v1163_v50 = vmul.f32 %v4439_v47, %v1141_v48  ;;  %v1199_v17 = vmul.f32 0.5, %v4575_v49 }
 0x121   : > { %v1216_v32 = vmul.f32 0.70710677, %v4598_v46  ;;  %v1112_v25 = vadd.f32 1e-06, %v1080_v13  ;;  %v1016_v2 = vpop.xlane.xlu0 %1015  ;;  %1546 = vmatmul.mubr.bf16.gmra.mrb[8].mxu0 %v1273_v62  ;;  %1659 = vmatmul.mubr.bf16.gmra.mrb[8].mxu1 %v1273_v62  ;;  %v4612_v3 = vmul.f32 0.0078125, %v970_v0  ;;  %v1200_v38 = vmul.f32 0.5, %v4598_v46 }
 0x122   : > { %v3391_v40 = vpop.eup %3390  ;;  %v1049_v28 = vmul.f32 0.0078125, %v1016_v2  ;;  %1555 = vmatprep.mubr.bf16.mxu0 %v3709_v59  ;;  %1668 = vmatprep.mubr.bf16.mxu1 %v3709_v59  ;;  %v1185_v35 = vadd.f32 %v4446_v61, %v1163_v50  ;;  %v1261_v16 = vmul.f32 %v1245_v18, %v1197_v12  ;;  %v1097_v13 = vsub.f32 %v4388_v44, %v4595_v4 }
 0x123   : > { %3398 = verf.f32 %v1216_v32  ;;  %v3393_v22 = vpop.eup %3392  ;;  %v1142_v15 = vmul.f32 %v3391_v40, %v1094_v11  ;;  %3080 = vmatpush3.bf16.msra.mxu0 %v3339_v37  ;;  %3144 = vmatpush3.bf16.msra.mxu1 %v3341_v14  ;;  %v1066_v54 = vmul.f32 %v4612_v3, %v4612_v3 }
 0x124   : > { %3400 = vrsqrt.f32 %v1112_v25  ;;  %v1081_v39 = vsub.f32 %v1049_v28, %v1065_v51  ;;  %v1246_v43 = vadd.f32 1.0, %v3393_v22  ;;  %v1018_v45 = vpop.xlane.xlu1 %1017  ;;  %v1217_v6 = vmul.f32 0.70710677, %v1185_v35 }
 0x125   : > { %v1164_v1 = vmul.f32 %v4439_v47, %v1142_v15  ;;  %v1050_v21 = vmul.f32 0.0078125, %v1018_v45  ;;  %v1098_v51 = vsub.f32 %v4406_v52, %v4612_v3  ;;  %v1201_v32 = vmul.f32 0.5, %v1185_v35 }
 0x126   : > { %v1113_v8 = vadd.f32 1e-06, %v1081_v39  ;;  %v1262_v63 = vmul.f32 %v1246_v43, %v1198_v27  ;;  %3402 = verf.f32 %v1217_v6 }
 0x127   : > { %v1186_v36 = vadd.f32 %v4446_v61, %v1164_v1  ;;  %v1082_v58 = vsub.f32 %v1050_v21, %v1066_v54 }
 0x128   : > { %v3395_v7 = vpop.eup %3394  ;;  %3404 = vrsqrt.f32 %v1113_v8  ;;  %v1274_v42 = vpack.c.bf16 %v1262_v63, %v1261_v16 }
 0x129   : > { %v3397_v23 = vpop.eup %3396  ;;  %v1218_v56 = vmul.f32 0.70710677, %v1186_v36  ;;  %v1143_v53 = vmul.f32 %v3395_v7, %v1095_v41  ;;  %v1114_v20 = vadd.f32 1e-06, %v1082_v58  ;;  %v1202_v11 = vmul.f32 0.5, %v1186_v36  ;;  %v3342_v7 = vld [vmem:[%s5463_s7 + $0x68] sm:$0xff]  }
 0x12a   : > { %1556 = vmatmul.mubr.bf16.gmra.mrb[12].mxu0 %v1274_v42  ;;  %1669 = vmatmul.mubr.bf16.gmra.mrb[12].mxu1 %v1274_v42  ;;  %v1247_v26 = vadd.f32 1.0, %v3397_v23  ;;  %v3344_v58 = vld [vmem:[%s5463_s7 + $0xe8] sm:$0xff]   ;;  %v3346_v23 = vld [vmem:[%s5463_s7 + $0x70] sm:$0xff]  }
 0x12b   : > { %1565 = vmatprep.mubr.bf16.mxu0 %v3709_v59  ;;  %1678 = vmatprep.mubr.bf16.mxu1 %v3709_v59  ;;  %3406 = verf.f32 %v1218_v56  ;;  %v1165_v30 = vmul.f32 %v4439_v47, %v1143_v53  ;;  %v3345_v42 = vld [vmem:[%s5463_s7 + $0xa8] sm:$0xff]   ;;  %v3348_v56 = vld [vmem:[%s5463_s7 + $0xf0] sm:$0xff]  }
 0x12c   : > { %3408 = vrsqrt.f32 %v1114_v20  ;;  %v1263_v29 = vmul.f32 %v1247_v26, %v1199_v17  ;;  %3081 = vmatprep.subr.bf16.mxu0 %v3342_v7  ;;  %3145 = vmatprep.subr.bf16.mxu1 %v3344_v58  ;;  %v3347_v53 = vld [vmem:[%s5463_s7 + $0x30] sm:$0xff]   ;;  %v3350_v26 = vld [vmem:[%s5463_s7 + $0x78] sm:$0xff]  }
 0x12d   : > { %v3399_v5 = vpop.eup %3398  ;;  %v1187_v10 = vadd.f32 %v4446_v61, %v1165_v30  ;;  %3146 = vmatpush3.bf16.msra.mxu1 %v3345_v42  ;;  %v3349_v20 = vld [vmem:[%s5463_s7 + $0xb0] sm:$0xff]   ;;  %v3351_v30 = vld [vmem:[%s5463_s7 + $0x38] sm:$0xff]  }
 0x12e   : > { %v3401_v33 = vpop.eup %3400  ;;  %v1248_v57 = vadd.f32 1.0, %v3399_v5  ;;  %3147 = vmatprep.subr.bf16.mxu1 %v3348_v56  ;;  %v3352_v5 = vld [vmem:[%s5463_s7 + $0xf8] sm:$0xff]  }
 0x12f   : > { %v1144_v19 = vmul.f32 %v3401_v33, %v1096_v9  ;;  %v1219_v55 = vmul.f32 0.70710677, %v1187_v10  ;;  %v1203_v39 = vmul.f32 0.5, %v1187_v10  ;;  %v3353_v9 = vld [vmem:[%s5463_s7 + $0xb8] sm:$0xff]   ;;  %v1313_v33 = vlaneseq  ;;  %v1311_v10 = vld [vmem:[%s5462_s6] sm:$0xf] }
 0x130   : > { %v1264_v34 = vmul.f32 %v1248_v57, %v1200_v38  ;;  %v3403_v48 = vpop.eup %3402 }
 0x131   : > { %v1166_v62 = vmul.f32 %v4439_v47, %v1144_v19  ;;  %3410 = verf.f32 %v1219_v55  ;;  %v1249_v46 = vadd.f32 1.0, %v3403_v48  ;;  %3148 = vmatpush3.bf16.msra.mxu1 %v3349_v20  ;;  %v1314_v17 = vshrl.u32 %v1313_v33, 7 }
 0x132   : > { %v1275_v24 = vpack.c.bf16 %v1264_v34, %v1263_v29  ;;  %v3405_v31 = vpop.eup %3404  ;;  %3149 = vmatprep.subr.bf16.mxu1 %v3352_v5 }
 0x133   : > { %v1188_v37 = vadd.f32 %v4446_v61, %v1166_v62  ;;  %v1145_v49 = vmul.f32 %v3405_v31, %v1097_v13  ;;  %v1265_v18 = vmul.f32 %v1249_v46, %v1201_v32  ;;  %v1315_v38 = vsub.s32 0, %v1314_v17 }
 0x134   : > { %1566 = vmatmul.mubr.bf16.gmra.mrb[16].mxu0 %v1275_v24  ;;  %1679 = vmatmul.mubr.bf16.gmra.mrb[16].mxu1 %v1275_v24  ;;  %v1323_v57 = vsub.s32 2, %v1314_v17  ;;  %v1319_v19 = vsub.s32 1, %v1314_v17  ;;  %v1327_v29 = vsub.s32 3, %v1314_v17 }
 0x135   : > { %1575 = vmatprep.mubr.bf16.mxu0 %v3709_v59  ;;  %1688 = vmatprep.mubr.bf16.mxu1 %v3709_v59  ;;  %v1220_v14 = vmul.f32 0.70710677, %v1188_v37  ;;  %v3407_v60 = vpop.eup %3406  ;;  %v1167_v44 = vmul.f32 %v4439_v47, %v1145_v49  ;;  %v1204_v27 = vmul.f32 0.5, %v1188_v37  ;;  %v4688_v34 = vrot.slane %v1311_v10, %v1315_v38 }
 0x136   : > { %v3409_v4 = vpop.eup %3408  ;;  %v1250_v25 = vadd.f32 1.0, %v3407_v60  ;;  %3150 = vmatpush3.bf16.msra.mxu1 %v3353_v9  ;;  %v4690_v55 = vrot.slane %v1311_v10, %v1323_v57  ;;  %v4692_v62 = vrot.slane %v1311_v10, %v1319_v19  ;;  %v4694_v48 = vrot.slane %v1311_v10, %v1327_v29 }
 0x137   : > { %3412 = verf.f32 %v1220_v14  ;;  %v1146_v0 = vmul.f32 %v3409_v4, %v1098_v51  ;;  %v1189_v2 = vadd.f32 %v4446_v61, %v1167_v44 }
 0x138   : > { %v1266_v50 = vmul.f32 %v1250_v25, %v1202_v11 }
 0x139   : > { %v1168_v40 = vmul.f32 %v4439_v47, %v1146_v0  ;;  %v1221_v28 = vmul.f32 0.70710677, %v1189_v2  ;;  %v1205_v54 = vmul.f32 0.5, %v1189_v2 }
 0x13a   : > { %v1276_v22 = vpack.c.bf16 %v1266_v50, %v1265_v18 }
 0x13b   : > { %v1190_v12 = vadd.f32 %v4446_v61, %v1168_v40  ;;  %3414 = verf.f32 %v1221_v28  ;;  %v3411_v52 = vpop.eup %3410 }
 0x13c   : > { %1576 = vmatmul.mubr.bf16.gmra.mrb[20].mxu0 %v1276_v22  ;;  %1689 = vmatmul.mubr.bf16.gmra.mrb[20].mxu1 %v1276_v22  ;;  %v1251_v15 = vadd.f32 1.0, %v3411_v52 }
 0x13d   : > { %1585 = vmatprep.mubr.bf16.mxu0 %v3709_v59  ;;  %1698 = vmatprep.mubr.bf16.mxu1 %v3709_v59  ;;  %v1222_v3 = vmul.f32 0.70710677, %v1190_v12  ;;  %v1206_v8 = vmul.f32 0.5, %v1190_v12 }
 0x13e   : > { %v1267_v47 = vmul.f32 %v1251_v15, %v1203_v39 }
 0x13f   : > { %3416 = verf.f32 %v1222_v3 }
 0x141   : > { %v3413_v35 = vpop.eup %3412 }
 0x142   : > { %v1252_v43 = vadd.f32 1.0, %v3413_v35 }
 0x144   : > { %v1268_v45 = vmul.f32 %v1252_v43, %v1204_v27 }
 0x145   : > { %v3415_v16 = vpop.eup %3414 }
 0x146   : > { %v1277_v1 = vpack.c.bf16 %v1268_v45, %v1267_v47  ;;  %v1253_v61 = vadd.f32 1.0, %v3415_v16 }
 0x148   : > { %1586 = vmatmul.mubr.bf16.gmra.mrb[24].mxu0 %v1277_v1  ;;  %1699 = vmatmul.mubr.bf16.gmra.mrb[24].mxu1 %v1277_v1  ;;  %v1269_v63 = vmul.f32 %v1253_v61, %v1205_v54 }
 0x149   : > { %1595 = vmatprep.mubr.bf16.mxu0 %v3709_v59  ;;  %1708 = vmatprep.mubr.bf16.mxu1 %v3709_v59  ;;  %v3417_v6 = vpop.eup %3416  ;;  %v3343_v59 = vld [vmem:[%s5463_s7 + $0x28] sm:$0xff]  }
 0x14a   : > { %v1254_v21 = vadd.f32 1.0, %v3417_v6  ;;  %3082 = vmatpush3.bf16.msra.mxu0 %v3343_v59 }
 0x14b   : > { %3083 = vmatprep.subr.bf16.mxu0 %v3346_v23 }
 0x14c   : > { %v1270_v41 = vmul.f32 %v1254_v21, %v1206_v8 }
 0x14e   : > { %v1278_v36 = vpack.c.bf16 %v1270_v41, %v1269_v63  ;;  %3084 = vmatpush3.bf16.msra.mxu0 %v3347_v53 }
 0x14f   : > { %3085 = vmatprep.subr.bf16.mxu0 %v3350_v26 }
 0x150   : > { %1596 = vmatmul.mubr.bf16.gmra.mrb[28].mxu0 %v1278_v36  ;;  %1709 = vmatmul.mubr.bf16.gmra.mrb[28].mxu1 %v1278_v36 }
 0x152   : > { %3086 = vmatpush3.bf16.msra.mxu0 %v3351_v30 }
 0x1e3   : > { %v1527_v13 = vpop.f32.mrb[0].mxu0  ;;  %v1640_v24 = vpop.f32.mrb[0].mxu1 }
 0x1e4   : > { %v1528_v31 = vadd.f32 %v1527_v13, %v4688_v34  ;;  %v1641_v37 = vadd.f32 %v1640_v24, %v4690_v55  ;;  %v1529_v49 = vpop.f32.mrb[1].mxu0  ;;  %v1642_v46 = vpop.f32.mrb[1].mxu1 }
 0x1e5   : > { %v1530_v14 = vadd.f32 %v1529_v49, %v4692_v62  ;;  %v1531_v60 = vpop.f32.mrb[2].mxu0  ;;  %v1644_v51 = vpop.f32.mrb[2].mxu1  ;;  %v1643_v32 = vadd.f32 %v1642_v46, %v4694_v48 }
 0x1e6   : > { %v1783_v44 = vmul.f32 0.70710677, %v1528_v31  ;;  %v1785_v4 = vmul.f32 0.70710677, %v1641_v37  ;;  %v1532_v25 = vadd.f32 %v1531_v60, %v4688_v34  ;;  %v1645_v0 = vadd.f32 %v1644_v51, %v4690_v55  ;;  %v1533_v2 = vpop.f32.mrb[3].mxu0  ;;  %v1646_v18 = vpop.f32.mrb[3].mxu1 }
 0x1e7   : > { %v1784_v11 = vmul.f32 0.70710677, %v1530_v14  ;;  %v1534_v50 = vadd.f32 %v1533_v2, %v4692_v62  ;;  %v1647_v40 = vadd.f32 %v1646_v18, %v4694_v48  ;;  %v1786_v28 = vmul.f32 0.70710677, %v1643_v32 }
 0x1e8   : > { %3418 = verf.f32 %v1783_v44  ;;  %v1787_v22 = vmul.f32 0.70710677, %v1532_v25  ;;  %v1789_v12 = vmul.f32 0.70710677, %v1645_v0  ;;  %v1719_v8 = vmul.f32 0.5, %v1528_v31 }
 0x1e9   : > { %3420 = verf.f32 %v1785_v4  ;;  %v1788_v52 = vmul.f32 0.70710677, %v1534_v50  ;;  %v1790_v3 = vmul.f32 0.70710677, %v1647_v40  ;;  %v1721_v21 = vmul.f32 0.5, %v1641_v37 }
 0x1ea   : > { %3422 = verf.f32 %v1784_v11  ;;  %v4708_v63 = vmul.f32 0.5, %v1530_v14  ;;  %v4710_v7 = vmul.f32 0.5, %v1643_v32  ;;  %v1723_v53 = vmul.f32 0.5, %v1532_v25 }
 0x1eb   : > { %3424 = verf.f32 %v1787_v22  ;;  %v1725_v20 = vmul.f32 0.5, %v1645_v0  ;;  %v4714_v5 = vmul.f32 0.5, %v1534_v50  ;;  %v4717_v38 = vmul.f32 0.5, %v1647_v40 }
 0x1ec   : > { %3426 = verf.f32 %v1789_v12  ;;  %v1537_v15 = vpop.f32.mrb[4].mxu0  ;;  %v1650_v35 = vpop.f32.mrb[4].mxu1 }
 0x1ed   : > { %3428 = verf.f32 %v1786_v28  ;;  %v1538_v39 = vadd.f32 %v1537_v15, %v4688_v34  ;;  %v1651_v27 = vadd.f32 %v1650_v35, %v4690_v55  ;;  %v1539_v43 = vpop.f32.mrb[5].mxu0  ;;  %v1652_v47 = vpop.f32.mrb[5].mxu1 }
 0x1ee   : > { %3430 = verf.f32 %v1788_v52  ;;  %v1540_v45 = vadd.f32 %v1539_v43, %v4692_v62  ;;  %v1653_v16 = vadd.f32 %v1652_v47, %v4694_v48  ;;  %v1541_v1 = vpop.f32.mrb[6].mxu0  ;;  %v1654_v61 = vpop.f32.mrb[6].mxu1 }
 0x1ef   : > { %3432 = verf.f32 %v1790_v3  ;;  %v1791_v6 = vmul.f32 0.70710677, %v1538_v39  ;;  %v1793_v54 = vmul.f32 0.70710677, %v1651_v27  ;;  %v1542_v58 = vadd.f32 %v1541_v1, %v4688_v34  ;;  %v1543_v42 = vpop.f32.mrb[7].mxu0  ;;  %v1656_v23 = vpop.f32.mrb[7].mxu1 }
 0x1f0   : > { %v1792_v41 = vmul.f32 0.70710677, %v1540_v45  ;;  %v1655_v59 = vadd.f32 %v1654_v61, %v4690_v55  ;;  %v1794_v26 = vmul.f32 0.70710677, %v1653_v16  ;;  %v1544_v33 = vadd.f32 %v1543_v42, %v4692_v62 }
 0x1f1   : > { %3434 = verf.f32 %v1791_v6  ;;  %v1795_v9 = vmul.f32 0.70710677, %v1542_v58  ;;  %v4719_v57 = vmul.f32 0.5, %v1538_v39  ;;  %v1657_v10 = vadd.f32 %v1656_v23, %v4694_v48 }
 0x1f2   : > { %v3419_v36 = vpop.eup %3418  ;;  %3436 = verf.f32 %v1793_v54  ;;  %v4722_v31 = vmul.f32 0.5, %v1651_v27  ;;  %v1797_v37 = vmul.f32 0.70710677, %v1655_v59  ;;  %v4724_v51 = vmul.f32 0.5, %v1540_v45 }
 0x1f3   : > { %v3421_v56 = vpop.eup %3420  ;;  %v1911_v30 = vadd.f32 1.0, %v3419_v36  ;;  %3438 = verf.f32 %v1792_v41  ;;  %v4726_v44 = vmul.f32 0.5, %v1653_v16  ;;  %v1796_v2 = vmul.f32 0.70710677, %v1544_v33 }
 0x1f4   : > { %v3423_v17 = vpop.eup %3422  ;;  %v1547_v19 = vpop.f32.mrb[8].mxu0  ;;  %v1913_v24 = vadd.f32 1.0, %v3421_v56  ;;  %3440 = verf.f32 %v1794_v26  ;;  %v1798_v12 = vmul.f32 0.70710677, %v1657_v10  ;;  %v4740_v43 = vmul.f32 0.5, %v1542_v58 }
 0x1f5   : > { %v1660_v29 = vpop.f32.mrb[8].mxu1  ;;  %v3425_v13 = vpop.eup %3424  ;;  %v4728_v25 = vmul.f32 %v1911_v30, %v1719_v8  ;;  %3442 = verf.f32 %v1795_v9  ;;  %v1912_v28 = vadd.f32 1.0, %v3423_v17  ;;  %v1548_v35 = vadd.f32 %v1547_v19, %v4688_v34 }
 0x1f6   : > { %v1549_v49 = vpop.f32.mrb[9].mxu0  ;;  %v1662_v46 = vpop.f32.mrb[9].mxu1  ;;  %v1915_v60 = vadd.f32 1.0, %v3425_v13  ;;  %3444 = verf.f32 %v1797_v37  ;;  %v4732_v3 = vmul.f32 %v1913_v24, %v1721_v21  ;;  %v1661_v39 = vadd.f32 %v1660_v29, %v4690_v55 }
 0x1f7   : > { %v3427_v14 = vpop.eup %3426  ;;  %v1551_v4 = vpop.f32.mrb[10].mxu0  ;;  %v4742_v47 = vmul.f32 0.5, %v1655_v59  ;;  %v1550_v45 = vadd.f32 %v1549_v49, %v4692_v62  ;;  %3446 = verf.f32 %v1796_v2  ;;  %v1799_v6 = vmul.f32 0.70710677, %v1548_v35 }
 0x1f8   : > { %v1664_v32 = vpop.f32.mrb[10].mxu1  ;;  %v3429_v11 = vpop.eup %3428  ;;  %v1917_v0 = vadd.f32 1.0, %v3427_v14  ;;  %v4730_v22 = vmul.f32 %v1915_v60, %v1723_v53  ;;  %3448 = verf.f32 %v1798_v12  ;;  %v1801_v41 = vmul.f32 0.70710677, %v1661_v39 }
 0x1f9   : > { %v1553_v18 = vpop.f32.mrb[11].mxu0  ;;  %v1666_v50 = vpop.f32.mrb[11].mxu1  ;;  %v1914_v1 = vadd.f32 1.0, %v3429_v11  ;;  %v4748_v36 = vmul.f32 %v1912_v28, %v4708_v63  ;;  %3450 = verf.f32 %v1799_v6  ;;  %v1800_v58 = vmul.f32 0.70710677, %v1550_v45 }
 0x1fa   : > { %v3431_v40 = vpop.eup %3430  ;;  %v4734_v15 = vmul.f32 %v1917_v0, %v1725_v20  ;;  %v2039_v27 = vpack.c.bf16 %v4730_v22, %v4728_v25  ;;  %v1663_v59 = vadd.f32 %v1662_v46, %v4694_v48  ;;  %v4751_v20 = vmul.f32 0.5, %v1544_v33 }
 0x1fb   : > { %v3433_v52 = vpop.eup %3432  ;;  %v1916_v8 = vadd.f32 1.0, %v3431_v40  ;;  %3452 = verf.f32 %v1801_v41  ;;  %v1552_v26 = vadd.f32 %v1551_v4, %v4688_v34  ;;  %v4755_v17 = vmul.f32 %v1914_v1, %v4710_v7 }
 0x1fc   : > { %v3435_v16 = vpop.eup %3434  ;;  %v2041_v61 = vpack.c.bf16 %v4734_v15, %v4732_v3  ;;  %v1918_v21 = vadd.f32 1.0, %v3433_v52  ;;  %v4757_v19 = vmul.f32 0.5, %v1657_v10  ;;  %3454 = verf.f32 %v1800_v58 }
 0x1fd   : > { %v3437_v54 = vpop.eup %3436  ;;  %v1557_v42 = vpop.f32.mrb[12].mxu0  ;;  %v1919_v53 = vadd.f32 1.0, %v3435_v16  ;;  %v1980_v33 = vmul.f32 %v1916_v8, %v4714_v5  ;;  %v4767_v49 = vmul.f32 0.5, %v1548_v35  ;;  %v1802_v46 = vmul.f32 0.70710677, %v1663_v59 }
 0x1fe   : > { %v1670_v23 = vpop.f32.mrb[12].mxu1  ;;  %v3439_v56 = vpop.eup %3438  ;;  %v1921_v63 = vadd.f32 1.0, %v3437_v54  ;;  %v4765_v37 = vmul.f32 %v1918_v21, %v4717_v38  ;;  %v1803_v4 = vmul.f32 0.70710677, %v1552_v26  ;;  %v1665_v11 = vadd.f32 %v1664_v32, %v4690_v55 }
 0x1ff   : > { %v1559_v30 = vpop.f32.mrb[13].mxu0  ;;  %v1672_v9 = vpop.f32.mrb[13].mxu1  ;;  %v1920_v60 = vadd.f32 1.0, %v3439_v56  ;;  %v1554_v0 = vadd.f32 %v1553_v18, %v4692_v62  ;;  %v4776_v5 = vmul.f32 %v1919_v53, %v4719_v57  ;;  %v4778_v38 = vmul.f32 0.5, %v1661_v39 }
 0x200   : > { %v4759_v29 = vpop.f32.mrb[14].mxu0  ;;  %v4761_v13 = vpop.f32.mrb[14].mxu1  ;;  %v4780_v40 = vmul.f32 0.5, %v1550_v45  ;;  %v1667_v28 = vadd.f32 %v1666_v50, %v4694_v48  ;;  %v4784_v12 = vmul.f32 %v1921_v63, %v4722_v31  ;;  %3456 = verf.f32 %v1802_v46 }
 0x201   : > { %v3441_v24 = vpop.eup %3440  ;;  %v4769_v14 = vpop.f32.mrb[15].mxu0  ;;  %v1805_v35 = vmul.f32 0.70710677, %v1665_v11  ;;  %v4786_v32 = vmul.f32 0.5, %v1663_v59  ;;  %3458 = verf.f32 %v1803_v4  ;;  %v1804_v18 = vmul.f32 0.70710677, %v1554_v0 }
 0x202   : > { %v4771_v7 = vpop.f32.mrb[15].mxu1  ;;  %v3443_v10 = vpop.eup %3442  ;;  %v1922_v52 = vadd.f32 1.0, %v3441_v24  ;;  %v4789_v57 = vmul.f32 %v1920_v60, %v4724_v51  ;;  %v1806_v45 = vmul.f32 0.70710677, %v1667_v28  ;;  %v1558_v31 = vadd.f32 %v1557_v42, %v4688_v34 }
 0x203   : > { %v3445_v2 = vpop.eup %3444  ;;  %v1923_v16 = vadd.f32 1.0, %v3443_v10  ;;  %3460 = verf.f32 %v1805_v35  ;;  %v1671_v50 = vadd.f32 %v1670_v23, %v4690_v55  ;;  %v1560_v54 = vadd.f32 %v1559_v30, %v4692_v62 }
 0x204   : > { %v3447_v1 = vpop.eup %3446  ;;  %v1925_v39 = vadd.f32 1.0, %v3445_v2  ;;  %3462 = verf.f32 %v1804_v18  ;;  %v4799_v58 = vmul.f32 %v1922_v52, %v4726_v44  ;;  %v4801_v51 = vmul.f32 0.5, %v1552_v26 }
 0x205   : > { %v3449_v6 = vpop.eup %3448  ;;  %v1673_v59 = vadd.f32 %v1672_v9, %v4694_v48  ;;  %v2040_v56 = vpack.c.bf16 %v1980_v33, %v4748_v36  ;;  %v4810_v30 = vmul.f32 %v1923_v16, %v4740_v43  ;;  %v1924_v63 = vadd.f32 1.0, %v3447_v1 }
 0x206   : > { %v3451_v41 = vpop.eup %3450  ;;  %v4812_v24 = vmul.f32 0.5, %v1665_v11  ;;  %v1807_v46 = vmul.f32 0.70710677, %v1558_v31  ;;  %v4817_v10 = vmul.f32 %v1925_v39, %v4742_v47  ;;  %3464 = verf.f32 %v1806_v45 }
 0x207   : > { %v4794_v8 = vpop.f32.mrb[16].mxu0  ;;  %v4796_v21 = vpop.f32.mrb[16].mxu1  ;;  %v1809_v36 = vmul.f32 0.70710677, %v1671_v50  ;;  %v1808_v9 = vmul.f32 0.70710677, %v1560_v54  ;;  %2366 = vmatprep.mubr.bf16.mxu0 %v2040_v56  ;;  %v2042_v52 = vpack.c.bf16 %v4765_v37, %v4755_v17  ;;  %v1675_v25 = vadd.f32 %v4761_v13, %v4690_v55 }
 0x208   : > { %v4805_v53 = vpop.f32.mrb[17].mxu0  ;;  %v4807_v42 = vpop.f32.mrb[17].mxu1  ;;  %v1926_v33 = vadd.f32 1.0, %v3449_v6  ;;  %v1927_v60 = vadd.f32 1.0, %v3451_v41  ;;  %v4819_v4 = vmul.f32 0.5, %v1554_v0  ;;  %3466 = verf.f32 %v1807_v46  ;;  %2367 = vmatmul.mubr.bf16.vlgmr.msra.gmra.mrb[32].mxu0 %v2039_v27 }
 0x209   : > { %v3453_v23 = vpop.eup %3452  ;;  %v4814_v44 = vpop.f32.mrb[18].mxu0  ;;  %3468 = verf.f32 %v1809_v36  ;;  %v1810_v47 = vmul.f32 0.70710677, %v1673_v59  ;;  %v1562_v0 = vadd.f32 %v4759_v29, %v4688_v34  ;;  %v4836_v27 = vmul.f32 0.5, %v1667_v28  ;;  %2463 = vmatprep.mubr.bf16.mxu1 %v2042_v52 }
 0x20a   : > { %v3455_v26 = vpop.eup %3454  ;;  %v4824_v43 = vpop.f32.mrb[18].mxu1  ;;  %v1929_v2 = vadd.f32 1.0, %v3453_v23  ;;  %3470 = verf.f32 %v1808_v9  ;;  %v1564_v18 = vadd.f32 %v4769_v14, %v4692_v62  ;;  %v1677_v17 = vadd.f32 %v4771_v7, %v4694_v48  ;;  %2464 = vmatmul.mubr.bf16.vlgmr.msra.gmra.mrb[32].mxu1 %v2041_v61 }
 0x20b   : > { %v4826_v11 = vpop.f32.mrb[19].mxu0  ;;  %v4830_v35 = vpop.f32.mrb[19].mxu1  ;;  %v1928_v16 = vadd.f32 1.0, %v3455_v26  ;;  %3472 = verf.f32 %v1810_v47  ;;  %v1988_v1 = vmul.f32 %v1924_v63, %v4751_v20  ;;  %v4843_v39 = vmul.f32 0.5, %v1558_v31 }
 0x20c   : > { %v3457_v22 = vpop.eup %3456  ;;  %v4845_v29 = vmul.f32 0.5, %v1671_v50  ;;  %v1811_v45 = vmul.f32 0.70710677, %v1562_v0  ;;  %v1990_v28 = vmul.f32 %v1926_v33, %v4757_v19  ;;  %v4851_v6 = vmul.f32 0.5, %v1560_v54 }
 0x20d   : > { %v3459_v37 = vpop.eup %3458  ;;  %v1813_v14 = vmul.f32 0.70710677, %v1675_v25  ;;  %v1812_v41 = vmul.f32 0.70710677, %v1564_v18  ;;  %v4856_v20 = vmul.f32 %v1927_v60, %v4767_v49  ;;  %v4859_v31 = vmul.f32 %v1929_v2, %v4778_v38 }
 0x20e   : > { %v3461_v13 = vpop.eup %3460  ;;  %v4862_v50 = vmul.f32 %v1928_v16, %v4780_v40  ;;  %v4864_v3 = vmul.f32 0.5, %v1673_v59  ;;  %v1930_v19 = vadd.f32 1.0, %v3457_v22  ;;  %3474 = verf.f32 %v1811_v45 }
 0x20f   : > { %v4853_v7 = vpop.f32.mrb[20].mxu0  ;;  %v3463_v56 = vpop.eup %3462  ;;  %v1814_v54 = vmul.f32 0.70710677, %v1677_v17  ;;  %v1568_v23 = vadd.f32 %v4794_v8, %v4688_v34  ;;  %v1931_v38 = vadd.f32 1.0, %v3459_v37  ;;  %v4876_v46 = vmul.f32 0.5, %v1562_v0 }
 0x210   : > { %v4866_v15 = vpop.f32.mrb[20].mxu1  ;;  %v4868_v61 = vpop.f32.mrb[21].mxu0  ;;  %3476 = verf.f32 %v1813_v14  ;;  %v1681_v40 = vadd.f32 %v4796_v21, %v4690_v55  ;;  %v1933_v9 = vadd.f32 1.0, %v3461_v13  ;;  %v1932_v33 = vadd.f32 1.0, %v3463_v56 }
 0x211   : > { %v4872_v49 = vpop.f32.mrb[21].mxu1  ;;  %v4874_v63 = vpop.f32.mrb[22].mxu0  ;;  %3478 = verf.f32 %v1812_v41  ;;  %v1815_v8 = vmul.f32 0.70710677, %v1568_v23  ;;  %v4886_v47 = vmul.f32 0.5, %v1675_v25  ;;  %v1570_v16 = vadd.f32 %v4805_v53, %v4692_v62 }
 0x212   : > { %v4880_v59 = vpop.f32.mrb[22].mxu1  ;;  %v4882_v26 = vpop.f32.mrb[23].mxu0  ;;  %3480 = verf.f32 %v1814_v54  ;;  %v1817_v52 = vmul.f32 0.70710677, %v1681_v40  ;;  %v4891_v0 = vmul.f32 %v1930_v19, %v4786_v32  ;;  %v1683_v22 = vadd.f32 %v4807_v42, %v4694_v48 }
 0x213   : > { %v3465_v36 = vpop.eup %3464  ;;  %v4884_v60 = vpop.f32.mrb[23].mxu1  ;;  %3482 = verf.f32 %v1815_v8  ;;  %v2044_v37 = vpack.c.bf16 %v1988_v1, %v4789_v57  ;;  %v4897_v13 = vmul.f32 %v1931_v38, %v4801_v51  ;;  %v4899_v25 = vmul.f32 0.5, %v1564_v18 }
 0x214   : > { %v3467_v2 = vpop.eup %3466  ;;  %v4901_v14 = vmul.f32 0.5, %v1677_v17  ;;  %v1816_v41 = vmul.f32 0.70710677, %v1570_v16  ;;  %v4904_v56 = vmul.f32 %v1933_v9, %v4812_v24  ;;  %v4907_v32 = vmul.f32 %v1932_v33, %v4819_v4 }
 0x215   : > { %v3469_v21 = vpop.eup %3468  ;;  %v1934_v19 = vadd.f32 1.0, %v3465_v36  ;;  %v1818_v42 = vmul.f32 0.70710677, %v1683_v22  ;;  %2374 = vmatprep.mubr.bf16.mxu0 %v2044_v37  ;;  %v1935_v57 = vadd.f32 1.0, %v3467_v2  ;;  %3484 = verf.f32 %v1817_v52 }
 0x216   : > { %v3471_v45 = vpop.eup %3470  ;;  %v1937_v1 = vadd.f32 1.0, %v3469_v21  ;;  %v2046_v51 = vpack.c.bf16 %v1990_v28, %v4799_v58  ;;  %v1572_v17 = vadd.f32 %v4814_v44, %v4688_v34  ;;  %v1685_v24 = vadd.f32 %v4824_v43, %v4690_v55 }
 0x217   : > { %v3473_v53 = vpop.eup %3472  ;;  %v1936_v18 = vadd.f32 1.0, %v3471_v45  ;;  %3486 = verf.f32 %v1816_v41  ;;  %v2043_v4 = vpack.c.bf16 %v4810_v30, %v4776_v5  ;;  %v2045_v38 = vpack.c.bf16 %v4817_v10, %v4784_v12 }
 0x218   : > { %v1938_v54 = vadd.f32 1.0, %v3473_v53  ;;  %2471 = vmatprep.mubr.bf16.mxu1 %v2046_v51  ;;  %v1574_v36 = vadd.f32 %v4826_v11, %v4692_v62  ;;  %v3475_v9 = vpop.eup %3474  ;;  %v4925_v44 = vmul.f32 %v1934_v19, %v4836_v27  ;;  %v4927_v43 = vmul.f32 0.5, %v1568_v23 }
 0x219   : > { %3488 = verf.f32 %v1818_v42  ;;  %v1819_v33 = vmul.f32 0.70710677, %v1572_v17  ;;  %v4932_v12 = vmul.f32 %v1935_v57, %v4843_v39  ;;  %v4934_v30 = vmul.f32 0.5, %v1681_v40  ;;  %2375 = vmatmul.mubr.bf16.gmra.mrb[36].mxu0 %v2043_v4  ;;  %2472 = vmatmul.mubr.bf16.gmra.mrb[36].mxu1 %v2045_v38 }
 0x21a   : > { %v3477_v5 = vpop.eup %3476  ;;  %v4936_v10 = vmul.f32 0.5, %v1570_v16  ;;  %v1821_v11 = vmul.f32 0.70710677, %v1685_v24  ;;  %v4939_v27 = vmul.f32 %v1937_v1, %v4845_v29  ;;  %v4941_v23 = vmul.f32 0.5, %v1683_v22 }
 0x21b   : > { %v4920_v58 = vpop.f32.mrb[24].mxu0  ;;  %v4922_v28 = vpop.f32.mrb[24].mxu1  ;;  %v1820_v52 = vmul.f32 0.70710677, %v1574_v36  ;;  %v1687_v21 = vadd.f32 %v4830_v35, %v4694_v48  ;;  %v4950_v16 = vmul.f32 %v1936_v18, %v4851_v6  ;;  %v4953_v45 = vmul.f32 %v1938_v54, %v4864_v3 }
 0x21c   : > { %v4929_v8 = vpop.f32.mrb[25].mxu0  ;;  %v3479_v2 = vpop.eup %3478  ;;  %v1939_v41 = vadd.f32 1.0, %v3475_v9  ;;  %v1578_v29 = vadd.f32 %v4853_v7, %v4688_v34  ;;  %v1941_v19 = vadd.f32 1.0, %v3477_v5  ;;  %v4961_v42 = vmul.f32 0.5, %v1572_v17 }
 0x21d   : > { %v4945_v37 = vpop.f32.mrb[25].mxu1  ;;  %v4947_v39 = vpop.f32.mrb[26].mxu0  ;;  %3490 = verf.f32 %v1819_v33  ;;  %v1822_v57 = vmul.f32 0.70710677, %v1687_v21  ;;  %v1940_v6 = vadd.f32 1.0, %v3479_v2  ;;  %v4965_v51 = vmul.f32 0.5, %v1685_v24 }
 0x21e   : > { %v3481_v40 = vpop.eup %3480  ;;  %v4957_v22 = vpop.f32.mrb[26].mxu1  ;;  %3492 = verf.f32 %v1821_v11  ;;  %v1823_v3 = vmul.f32 0.70710677, %v1578_v29  ;;  %v1691_v7 = vadd.f32 %v4866_v15, %v4690_v55  ;;  %v1580_v54 = vadd.f32 %v4868_v61, %v4692_v62 }
 0x21f   : > { %v4959_v53 = vpop.f32.mrb[27].mxu0  ;;  %v3483_v35 = vpop.eup %3482  ;;  %v1942_v18 = vadd.f32 1.0, %v3481_v40  ;;  %3494 = verf.f32 %v1820_v52  ;;  %v1693_v38 = vadd.f32 %v4872_v49, %v4694_v48  ;;  %v2048_v24 = vpack.c.bf16 %v4907_v32, %v4862_v50 }
 0x220   : > { %v4963_v1 = vpop.f32.mrb[27].mxu1  ;;  %v3485_v4 = vpop.eup %3484  ;;  %v1943_v17 = vadd.f32 1.0, %v3483_v35  ;;  %3496 = verf.f32 %v1822_v57  ;;  %v4976_v9 = vmul.f32 %v1939_v41, %v4876_v46  ;;  %v4979_v33 = vmul.f32 %v1941_v19, %v4886_v47 }
 0x221   : > { %v4981_v5 = vmul.f32 0.5, %v1574_v36  ;;  %v1825_v15 = vmul.f32 0.70710677, %v1691_v7  ;;  %v3487_v2 = vpop.eup %3486  ;;  %v4988_v52 = vmul.f32 %v1940_v6, %v4899_v25  ;;  %v4990_v49 = vmul.f32 0.5, %v1687_v21  ;;  %2382 = vmatprep.mubr.bf16.mxu0 %v2048_v24 }
 0x222   : > { %3498 = verf.f32 %v1823_v3  ;;  %v1824_v50 = vmul.f32 0.70710677, %v1580_v54  ;;  %v4995_v32 = vmul.f32 %v1942_v18, %v4901_v14  ;;  %v1945_v36 = vadd.f32 1.0, %v3485_v4 }
 0x223   : > { %v4983_v11 = vpop.f32.mrb[28].mxu0  ;;  %v4985_v61 = vpop.f32.mrb[28].mxu1  ;;  %v1826_v40 = vmul.f32 0.70710677, %v1693_v38  ;;  %v2050_v41 = vpack.c.bf16 %v4925_v44, %v4891_v0  ;;  %v5004_v21 = vmul.f32 %v1943_v17, %v4927_v43  ;;  %v5006_v19 = vmul.f32 0.5, %v1578_v29 }
 0x224   : > { %v4992_v46 = vpop.f32.mrb[29].mxu0  ;;  %v3489_v47 = vpop.eup %3488  ;;  %v1582_v57 = vadd.f32 %v4874_v63, %v4688_v34  ;;  %v1695_v14 = vadd.f32 %v4880_v59, %v4690_v55  ;;  %3500 = verf.f32 %v1825_v15  ;;  %v2047_v0 = vpack.c.bf16 %v4897_v13, %v4856_v20 }
 0x225   : > { %v4999_v35 = vpop.f32.mrb[29].mxu1  ;;  %v5001_v25 = vpop.f32.mrb[30].mxu0  ;;  %2479 = vmatprep.mubr.bf16.mxu1 %v2050_v41  ;;  %v2049_v44 = vpack.c.bf16 %v4904_v56, %v4859_v31  ;;  %v1584_v43 = vadd.f32 %v4882_v26, %v4692_v62  ;;  %v1944_v63 = vadd.f32 1.0, %v3487_v2  ;;  %v1946_v18 = vadd.f32 1.0, %v3489_v47 }
 0x226   : > { %v5012_v6 = vpop.f32.mrb[30].mxu1  ;;  %v5014_v3 = vpop.f32.mrb[31].mxu0  ;;  %3502 = verf.f32 %v1824_v50  ;;  %v1827_v59 = vmul.f32 0.70710677, %v1582_v57  ;;  %v5025_v17 = vmul.f32 %v1945_v36, %v4934_v30  ;;  %v1829_v24 = vmul.f32 0.70710677, %v1695_v14  ;;  %2383 = vmatmul.mubr.bf16.gmra.mrb[40].mxu0 %v2047_v0 }
 0x227   : > { %v5022_v29 = vpop.f32.mrb[31].mxu1  ;;  %v3491_v4 = vpop.eup %3490  ;;  %3504 = verf.f32 %v1826_v40  ;;  %2480 = vmatmul.mubr.bf16.gmra.mrb[40].mxu1 %v2049_v44  ;;  %v1828_v20 = vmul.f32 0.70710677, %v1584_v43  ;;  %v5027_v31 = vmul.f32 0.5, %v1691_v7  ;;  %v5029_v56 = vmul.f32 0.5, %v1580_v54 }
 0x228   : > { %v3493_v13 = vpop.eup %3492  ;;  %3506 = verf.f32 %v1827_v59  ;;  %v1697_v26 = vadd.f32 %v4884_v60, %v4694_v48  ;;  %v5033_v2 = vmul.f32 0.5, %v1693_v38  ;;  %v1588_v30 = vadd.f32 %v4920_v58, %v4688_v34 }
 0x229   : > { %v3495_v15 = vpop.eup %3494  ;;  %3508 = verf.f32 %v1829_v24  ;;  %v1701_v50 = vadd.f32 %v4922_v28, %v4690_v55  ;;  %v5040_v7 = vmul.f32 %v1944_v63, %v4936_v10  ;;  %v5043_v54 = vmul.f32 %v1946_v18, %v4941_v23 }
 0x22a   : > { %v3497_v47 = vpop.eup %3496  ;;  %v1947_v36 = vadd.f32 1.0, %v3491_v4  ;;  %3510 = verf.f32 %v1828_v20  ;;  %v1949_v60 = vadd.f32 1.0, %v3493_v13  ;;  %v5045_v40 = vmul.f32 0.5, %v1582_v57 }
 0x22b   : > { %v1830_v38 = vmul.f32 0.70710677, %v1697_v26  ;;  %v1831_v41 = vmul.f32 0.70710677, %v1588_v30  ;;  %v1948_v44 = vadd.f32 1.0, %v3495_v15  ;;  %v5047_v58 = vmul.f32 0.5, %v1695_v14 }
 0x22c   : > { %v3499_v0 = vpop.eup %3498  ;;  %v1833_v59 = vmul.f32 0.70710677, %v1701_v50  ;;  %v1590_v28 = vadd.f32 %v4929_v8, %v4692_v62  ;;  %v1950_v10 = vadd.f32 1.0, %v3497_v47  ;;  %v1703_v23 = vadd.f32 %v4945_v37, %v4694_v48 }
 0x22d   : > { %3512 = verf.f32 %v1830_v38  ;;  %v2052_v63 = vpack.c.bf16 %v4988_v52, %v4950_v16  ;;  %v5056_v57 = vmul.f32 %v1947_v36, %v4961_v42  ;;  %v5058_v18 = vmul.f32 0.5, %v1584_v43 }
 0x22e   : > { %3514 = verf.f32 %v1831_v41  ;;  %v1832_v14 = vmul.f32 0.70710677, %v1590_v28  ;;  %v3501_v4 = vpop.eup %3500  ;;  %v5061_v24 = vmul.f32 %v1949_v60, %v4965_v51  ;;  %v1951_v8 = vadd.f32 1.0, %v3499_v0 }
 0x22f   : > { %3516 = verf.f32 %v1833_v59  ;;  %v1834_v20 = vmul.f32 0.70710677, %v1703_v23  ;;  %2390 = vmatprep.mubr.bf16.mxu0 %v2052_v63  ;;  %v5064_v37 = vmul.f32 %v1948_v44, %v4981_v5  ;;  %v1766_v16 = vmul.f32 0.5, %v1697_v26 }
 0x230   : > { %v3503_v13 = vpop.eup %3502  ;;  %v5066_v52 = vmul.f32 0.5, %v1588_v30  ;;  %v2054_v42 = vpack.c.bf16 %v4995_v32, %v4953_v45  ;;  %v5071_v15 = vmul.f32 %v1950_v10, %v4990_v49  ;;  %3518 = verf.f32 %v1832_v14 }
 0x231   : > { %v3505_v43 = vpop.eup %3504  ;;  %v1592_v51 = vadd.f32 %v4947_v39, %v4688_v34  ;;  %v1705_v47 = vadd.f32 %v4957_v22, %v4690_v55  ;;  %v5077_v5 = vmul.f32 0.5, %v1701_v50  ;;  %v2051_v26 = vpack.c.bf16 %v4976_v9, %v4932_v12 }
 0x232   : > { %v3507_v36 = vpop.eup %3506  ;;  %2487 = vmatprep.mubr.bf16.mxu1 %v2054_v42  ;;  %v2053_v45 = vpack.c.bf16 %v4979_v33, %v4939_v27  ;;  %v1594_v49 = vadd.f32 %v4959_v53, %v4692_v62  ;;  %v5086_v30 = vmul.f32 %v1951_v8, %v5006_v19  ;;  %v1953_v39 = vadd.f32 1.0, %v3501_v4 }
 0x233   : > { %v3509_v32 = vpop.eup %3508  ;;  %3520 = verf.f32 %v1834_v20  ;;  %v1835_v22 = vmul.f32 0.70710677, %v1592_v51  ;;  %v1952_v50 = vadd.f32 1.0, %v3503_v13  ;;  %v1954_v38 = vadd.f32 1.0, %v3505_v43  ;;  %2391 = vmatmul.mubr.bf16.gmra.mrb[44].mxu0 %v2051_v26 }
 0x234   : > { %v3511_v60 = vpop.eup %3510  ;;  %v1837_v41 = vmul.f32 0.70710677, %v1705_v47  ;;  %2488 = vmatmul.mubr.bf16.gmra.mrb[44].mxu1 %v2053_v45  ;;  %v1836_v12 = vmul.f32 0.70710677, %v1594_v49  ;;  %v5088_v9 = vmul.f32 0.5, %v1590_v28  ;;  %v5090_v27 = vmul.f32 0.5, %v1703_v23 }
 0x235   : > { %3522 = verf.f32 %v1835_v22  ;;  %v1707_v53 = vadd.f32 %v4963_v1, %v4694_v48  ;;  %v1955_v33 = vadd.f32 1.0, %v3507_v36  ;;  %v1957_v19 = vadd.f32 1.0, %v3509_v32 }
 0x236   : > { %3524 = verf.f32 %v1837_v41  ;;  %v5096_v0 = vadd.f32 %v4983_v11, %v4688_v34  ;;  %v1956_v59 = vadd.f32 1.0, %v3511_v60  ;;  %v5100_v28 = vadd.f32 %v4985_v61, %v4690_v55 }
 0x237   : > { %v3513_v44 = vpop.eup %3512  ;;  %3526 = verf.f32 %v1836_v12  ;;  %v1838_v10 = vmul.f32 0.70710677, %v1707_v53  ;;  %v5103_v63 = vmul.f32 %v1953_v39, %v5027_v31  ;;  %v5106_v1 = vmul.f32 %v1952_v50, %v5029_v56 }
 0x238   : > { %v3515_v23 = vpop.eup %3514  ;;  %v5109_v14 = vmul.f32 %v1954_v38, %v5033_v2  ;;  %v1958_v11 = vadd.f32 1.0, %v3513_v44  ;;  %v1771_v8 = vmul.f32 0.5, %v1592_v51  ;;  %v1839_v20 = vmul.f32 0.70710677, %v5096_v0 }
 0x239   : > { %v3517_v4 = vpop.eup %3516  ;;  %3528 = verf.f32 %v1838_v10  ;;  %v5114_v61 = vadd.f32 %v4992_v46, %v4692_v62  ;;  %v1959_v13 = vadd.f32 1.0, %v3515_v23  ;;  %v1773_v42 = vmul.f32 0.5, %v1705_v47 }
 0x23a   : > { %v1772_v31 = vmul.f32 0.5, %v1594_v49  ;;  %v5118_v56 = vadd.f32 %v4999_v35, %v4694_v48  ;;  %v3519_v43 = vpop.eup %3518  ;;  %v5121_v2 = vmul.f32 %v1955_v33, %v5045_v40  ;;  %v5124_v51 = vmul.f32 %v1957_v19, %v5047_v58 }
 0x23b   : > { %v2020_v36 = vmul.f32 %v1956_v59, %v5058_v18  ;;  %v1841_v26 = vmul.f32 0.70710677, %v5100_v28  ;;  %v2022_v46 = vmul.f32 %v1958_v11, %v1766_v16  ;;  %v1961_v45 = vadd.f32 1.0, %v3517_v4 }
 0x23c   : > { %v1774_v32 = vmul.f32 0.5, %v1707_v53  ;;  %v1840_v47 = vmul.f32 0.70710677, %v5114_v61  ;;  %3530 = verf.f32 %v1839_v20  ;;  %v1842_v35 = vmul.f32 0.70710677, %v5118_v56 }
 0x23d   : > { %v3521_v49 = vpop.eup %3520  ;;  %v2056_v40 = vpack.c.bf16 %v5064_v37, %v5040_v7  ;;  %v2058_v58 = vpack.c.bf16 %v5071_v15, %v5043_v54  ;;  %v5135_v39 = vmul.f32 %v1959_v13, %v5066_v52  ;;  %v1960_v18 = vadd.f32 1.0, %v3519_v43 }
 0x23e   : > { %v1602_v16 = vadd.f32 %v5001_v25, %v4688_v34  ;;  %v5141_v22 = vadd.f32 %v5012_v6, %v4690_v55  ;;  %3532 = verf.f32 %v1841_v26  ;;  %v2055_v7 = vpack.c.bf16 %v5056_v57, %v5004_v21 }
 0x23f   : > { %v3523_v60 = vpop.eup %3522  ;;  %2398 = vmatprep.mubr.bf16.mxu0 %v2056_v40  ;;  %2495 = vmatprep.mubr.bf16.mxu1 %v2058_v58  ;;  %v2057_v54 = vpack.c.bf16 %v5061_v24, %v5025_v17  ;;  %v1604_v37 = vadd.f32 %v5014_v3, %v4692_v62  ;;  %v1962_v15 = vadd.f32 1.0, %v3521_v49  ;;  %3534 = verf.f32 %v1840_v47 }
 0x240   : > { %v3525_v52 = vpop.eup %3524  ;;  %v1963_v34 = vadd.f32 1.0, %v3523_v60  ;;  %v1843_v25 = vmul.f32 0.70710677, %v1602_v16  ;;  %3536 = verf.f32 %v1842_v35  ;;  %v1845_v50 = vmul.f32 0.70710677, %v5141_v22  ;;  %2399 = vmatmul.mubr.bf16.gmra.mrb[48].mxu0 %v2055_v7 }
 0x241   : > { %v3527_v55 = vpop.eup %3526  ;;  %v1965_v6 = vadd.f32 1.0, %v3525_v52  ;;  %2496 = vmatmul.mubr.bf16.gmra.mrb[48].mxu1 %v2057_v54  ;;  %v1844_v38 = vmul.f32 0.70710677, %v1604_v37  ;;  %v1717_v17 = vadd.f32 %v5022_v29, %v4694_v48  ;;  %v2060_v24 = vpack.c.bf16 %v2020_v36, %v5106_v1 }
 0x242   : > { %v2027_v21 = vmul.f32 %v1963_v34, %v1771_v8  ;;  %v1964_v57 = vadd.f32 1.0, %v3527_v55  ;;  %3538 = verf.f32 %v1843_v25  ;;  %v2062_v41 = vpack.c.bf16 %v2022_v46, %v5109_v14  ;;  %v5170_v34 = vld [vmem:[%s5464_s8] ss:$0 sm:$0xff] }
 0x243   : > { %v3529_v62 = vpop.eup %3528  ;;  %v2029_v3 = vmul.f32 %v1965_v6, %v1773_v42  ;;  %3540 = verf.f32 %v1845_v50  ;;  %v2024_v12 = vmul.f32 %v1960_v18, %v5088_v9  ;;  %v2025_v19 = vmul.f32 %v1961_v45, %v5077_v5  ;;  %2406 = vmatprep.mubr.bf16.mxu0 %v2060_v24 }
 0x244   : > { %v2028_v53 = vmul.f32 %v1964_v57, %v1772_v31  ;;  %v1966_v33 = vadd.f32 1.0, %v3529_v62  ;;  %3542 = verf.f32 %v1844_v38  ;;  %v1846_v44 = vmul.f32 0.70710677, %v1717_v17  ;;  %2503 = vmatprep.mubr.bf16.mxu1 %v2062_v41 }
 0x245   : > { %v2059_v48 = vpack.c.bf16 %v5121_v2, %v5086_v30  ;;  %v2061_v29 = vpack.c.bf16 %v5124_v51, %v5103_v63  ;;  %v2026_v59 = vmul.f32 %v1962_v15, %v5090_v27  ;;  %v2063_v9 = vpack.c.bf16 %v2027_v21, %v5135_v39 }
 0x246   : > { %v2030_v10 = vmul.f32 %v1966_v33, %v1774_v32  ;;  %v2064_v23 = vpack.c.bf16 %v2028_v53, %v2024_v12  ;;  %v3531_v1 = vpop.eup %3530  ;;  %3544 = verf.f32 %v1846_v44  ;;  %v2065_v14 = vpack.c.bf16 %v2029_v3, %v2025_v19 }
 0x247   : > { %v1967_v8 = vadd.f32 1.0, %v3531_v1  ;;  %v1775_v27 = vmul.f32 0.5, %v5096_v0  ;;  %v1779_v31 = vmul.f32 0.5, %v1602_v16  ;;  %v1777_v51 = vmul.f32 0.5, %v5100_v28 }
 0x248   : > { %v2066_v11 = vpack.c.bf16 %v2030_v10, %v2026_v59  ;;  %v3533_v5 = vpop.eup %3532  ;;  %2407 = vmatmul.mubr.bf16.gmra.mrb[52].mxu0 %v2059_v48  ;;  %v1776_v36 = vmul.f32 0.5, %v5114_v61  ;;  %v1781_v26 = vmul.f32 0.5, %v5141_v22  ;;  %v1780_v47 = vmul.f32 0.5, %v1604_v37 }
 0x249   : > { %2504 = vmatmul.mubr.bf16.gmra.mrb[52].mxu1 %v2061_v29  ;;  %v3535_v4 = vpop.eup %3534  ;;  %2414 = vmatprep.mubr.bf16.mxu0 %v2064_v23  ;;  %v1969_v63 = vadd.f32 1.0, %v3533_v5  ;;  %v2031_v45 = vmul.f32 %v1967_v8, %v1775_v27  ;;  %v1778_v28 = vmul.f32 0.5, %v5118_v56  ;;  %v1782_v60 = vmul.f32 0.5, %v1717_v17 }
 0x24a   : > { %2511 = vmatprep.mubr.bf16.mxu1 %v2066_v11  ;;  %v3537_v30 = vpop.eup %3536  ;;  %v1968_v42 = vadd.f32 1.0, %v3535_v4 }
 0x24b   : > { %v2033_v35 = vmul.f32 %v1969_v63, %v1777_v51  ;;  %v1970_v40 = vadd.f32 1.0, %v3537_v30 }
 0x24c   : > { %v3539_v20 = vpop.eup %3538  ;;  %v2032_v0 = vmul.f32 %v1968_v42, %v1776_v36 }
 0x24d   : > { %v3541_v13 = vpop.eup %3540  ;;  %v1971_v43 = vadd.f32 1.0, %v3539_v20  ;;  %v2034_v54 = vmul.f32 %v1970_v40, %v1778_v28 }
 0x24e   : > { %v3543_v2 = vpop.eup %3542  ;;  %v1973_v46 = vadd.f32 1.0, %v3541_v13 }
 0x24f   : > { %v2035_v32 = vmul.f32 %v1971_v43, %v1779_v31  ;;  %v1972_v49 = vadd.f32 1.0, %v3543_v2 }
 0x250   : > { %v2037_v58 = vmul.f32 %v1973_v46, %v1781_v26  ;;  %v3545_v39 = vpop.eup %3544  ;;  %2415 = vmatmul.mubr.bf16.gmra.mrb[56].mxu0 %v2063_v9 }
 0x251   : > { %v2036_v18 = vmul.f32 %v1972_v49, %v1780_v47  ;;  %2512 = vmatmul.mubr.bf16.gmra.mrb[56].mxu1 %v2065_v14  ;;  %v2067_v16 = vpack.c.bf16 %v2035_v32, %v2031_v45  ;;  %v1974_v61 = vadd.f32 1.0, %v3545_v39 }
 0x252   : > { %v2069_v7 = vpack.c.bf16 %v2037_v58, %v2033_v35 }
 0x253   : > { %v2068_v22 = vpack.c.bf16 %v2036_v18, %v2032_v0  ;;  %v2038_v52 = vmul.f32 %v1974_v61, %v1782_v60 }
 0x255   : > { %2422 = vmatprep.mubr.bf16.mxu0 %v2068_v22  ;;  %v2070_v37 = vpack.c.bf16 %v2038_v52, %v2034_v54 }
 0x257   : > { %2519 = vmatprep.mubr.bf16.mxu1 %v2070_v37 }
 0x258   : > { %2423 = vmatmul.mubr.bf16.gmra.mrb[60].mxu0 %v2067_v16 }
 0x259   : > { %2520 = vmatmul.mubr.bf16.gmra.mrb[60].mxu1 %v2069_v7 }
 0x2db   : > { %v3087_v15 = vpop.f32.mrb[32].mxu0 }
 0x2dc   : > { %v3088_v25 = vpop.f32.mrb[33].mxu0 }
 0x2dd   : > { %v3089_v55 = vadd.f32 %v3088_v25, %v3087_v15  ;;  %v3090_v56 = vpop.f32.mrb[34].mxu0  ;;  %v3151_v50 = vpop.f32.mrb[32].mxu1 }
 0x2de   : > { %v3091_v6 = vpop.f32.mrb[35].mxu0  ;;  %v3152_v57 = vpop.f32.mrb[33].mxu1 }
 0x2df   : > { %v2369_v38 = vadd.f32 %v3089_v55, %v5170_v34  ;;  %v3092_v21 = vadd.f32 %v3091_v6, %v3090_v56  ;;  %v3153_v17 = vadd.f32 %v3152_v57, %v3151_v50  ;;  %v3154_v62 = vpop.f32.mrb[34].mxu1 }
 0x2e0   : > { %v3155_v24 = vpop.f32.mrb[35].mxu1 }
 0x2e1   : > { %v2372_v3 = vadd.f32 %v3092_v21, %v5170_v34  ;;  %v5174_v41 = vadd.f32 %v3153_v17, %v2369_v38  ;;  %v3156_v12 = vadd.f32 %v3155_v24, %v3154_v62 }
 0x2e3   : > { %v5176_v53 = vadd.f32 %v3156_v12, %v2372_v3  ;;  %2528 = vadd.xlane.f32.xlu0 %v5174_v41  ;;  %v2560_v33 = vmul.f32 %v5174_v41, %v5174_v41 }
 0x2e5   : > { %2530 = vadd.xlane.f32.xlu1 %v5176_v53  ;;  %v2561_v19 = vmul.f32 %v5176_v53, %v5176_v53 }
 0x2e7   : > { %2576 = vadd.xlane.f32.xlu0 %v2560_v33 }
 0x2e9   : > { %2578 = vadd.xlane.f32.xlu1 %v2561_v19 }
 0x2ec   : > { %v3093_v44 = vpop.f32.mrb[36].mxu0  ;;  %v3157_v48 = vpop.f32.mrb[36].mxu1 }
 0x2ed   : > { %v3094_v29 = vpop.f32.mrb[37].mxu0  ;;  %v3158_v59 = vpop.f32.mrb[37].mxu1 }
 0x2ee   : > { %v3095_v10 = vadd.f32 %v3094_v29, %v3093_v44  ;;  %v3159_v23 = vadd.f32 %v3158_v59, %v3157_v48  ;;  %v3096_v9 = vpop.f32.mrb[38].mxu0  ;;  %v3160_v1 = vpop.f32.mrb[38].mxu1 }
 0x2ef   : > { %v3097_v14 = vpop.f32.mrb[39].mxu0  ;;  %v3161_v11 = vpop.f32.mrb[39].mxu1 }
 0x2f0   : > { %v2377_v5 = vadd.f32 %v3095_v10, %v5170_v34  ;;  %v3098_v4 = vadd.f32 %v3097_v14, %v3096_v9  ;;  %v3162_v30 = vadd.f32 %v3161_v11, %v3160_v1 }
 0x2f2   : > { %v5185_v8 = vadd.f32 %v3159_v23, %v2377_v5  ;;  %v2380_v20 = vadd.f32 %v3098_v4, %v5170_v34 }
 0x2f4   : > { %v5188_v63 = vadd.f32 %v3162_v30, %v2380_v20  ;;  %2532 = vadd.xlane.f32.xlu0 %v5185_v8  ;;  %v2562_v13 = vmul.f32 %v5185_v8, %v5185_v8 }
 0x2f6   : > { %2534 = vadd.xlane.f32.xlu1 %v5188_v63  ;;  %v2563_v27 = vmul.f32 %v5188_v63, %v5188_v63 }
 0x2f8   : > { %2580 = vadd.xlane.f32.xlu0 %v2562_v13 }
 0x2f9   : > { %v3099_v42 = vpop.f32.mrb[40].mxu0 }
 0x2fa   : > { %v3163_v31 = vpop.f32.mrb[40].mxu1  ;;  %v3100_v43 = vpop.f32.mrb[41].mxu0  ;;  %2582 = vadd.xlane.f32.xlu1 %v2563_v27 }
 0x2fb   : > { %v3164_v2 = vpop.f32.mrb[41].mxu1  ;;  %v3101_v51 = vadd.f32 %v3100_v43, %v3099_v42  ;;  %v3102_v26 = vpop.f32.mrb[42].mxu0 }
 0x2fc   : > { %v3165_v36 = vadd.f32 %v3164_v2, %v3163_v31  ;;  %v3166_v46 = vpop.f32.mrb[42].mxu1  ;;  %v3103_v45 = vpop.f32.mrb[43].mxu0 }
 0x2fd   : > { %v3167_v32 = vpop.f32.mrb[43].mxu1  ;;  %v2385_v47 = vadd.f32 %v3101_v51, %v5170_v34  ;;  %v3104_v49 = vadd.f32 %v3103_v45, %v3102_v26 }
 0x2fe   : > { %v3168_v35 = vadd.f32 %v3167_v32, %v3166_v46 }
 0x2ff   : > { %v5197_v40 = vadd.f32 %v3165_v36, %v2385_v47  ;;  %v2388_v58 = vadd.f32 %v3104_v49, %v5170_v34 }
 0x301   : > { %v5200_v39 = vadd.f32 %v3168_v35, %v2388_v58  ;;  %2536 = vadd.xlane.f32.xlu0 %v5197_v40  ;;  %v2564_v0 = vmul.f32 %v5197_v40, %v5197_v40 }
 0x303   : > { %2538 = vadd.xlane.f32.xlu1 %v5200_v39  ;;  %v2565_v18 = vmul.f32 %v5200_v39, %v5200_v39 }
 0x305   : > { %2584 = vadd.xlane.f32.xlu0 %v2564_v0 }
 0x306   : > { %v3105_v16 = vpop.f32.mrb[44].mxu0 }
 0x307   : > { %v3169_v28 = vpop.f32.mrb[44].mxu1  ;;  %v3106_v60 = vpop.f32.mrb[45].mxu0  ;;  %2586 = vadd.xlane.f32.xlu1 %v2565_v18 }
 0x308   : > { %v3170_v61 = vpop.f32.mrb[45].mxu1  ;;  %v3107_v7 = vadd.f32 %v3106_v60, %v3105_v16  ;;  %v3108_v54 = vpop.f32.mrb[46].mxu0 }
 0x309   : > { %v3171_v22 = vadd.f32 %v3170_v61, %v3169_v28  ;;  %v3172_v52 = vpop.f32.mrb[46].mxu1  ;;  %v3109_v37 = vpop.f32.mrb[47].mxu0 }
 0x30a   : > { %v3173_v15 = vpop.f32.mrb[47].mxu1  ;;  %v2393_v25 = vadd.f32 %v3107_v7, %v5170_v34  ;;  %v3110_v55 = vadd.f32 %v3109_v37, %v3108_v54 }
 0x30b   : > { %v3174_v56 = vadd.f32 %v3173_v15, %v3172_v52 }
 0x30c   : > { %v5209_v6 = vadd.f32 %v3171_v22, %v2393_v25  ;;  %v2396_v50 = vadd.f32 %v3110_v55, %v5170_v34 }
 0x30e   : > { %v5212_v38 = vadd.f32 %v3174_v56, %v2396_v50  ;;  %2540 = vadd.xlane.f32.xlu0 %v5209_v6  ;;  %v2566_v21 = vmul.f32 %v5209_v6, %v5209_v6 }
 0x310   : > { %2542 = vadd.xlane.f32.xlu1 %v5212_v38  ;;  %v2567_v57 = vmul.f32 %v5212_v38, %v5212_v38 }
 0x312   : > { %2588 = vadd.xlane.f32.xlu0 %v2566_v21 }
 0x313   : > { %v3111_v17 = vpop.f32.mrb[48].mxu0 }
 0x314   : > { %v3175_v62 = vpop.f32.mrb[48].mxu1  ;;  %v3112_v3 = vpop.f32.mrb[49].mxu0  ;;  %2590 = vadd.xlane.f32.xlu1 %v2567_v57 }
 0x315   : > { %v3176_v24 = vpop.f32.mrb[49].mxu1  ;;  %v3113_v12 = vadd.f32 %v3112_v3, %v3111_v17  ;;  %v3114_v19 = vpop.f32.mrb[50].mxu0 }
 0x316   : > { %v3177_v33 = vadd.f32 %v3176_v24, %v3175_v62  ;;  %v3178_v44 = vpop.f32.mrb[50].mxu1  ;;  %v3115_v48 = vpop.f32.mrb[51].mxu0 }
 0x317   : > { %v3179_v29 = vpop.f32.mrb[51].mxu1  ;;  %v2401_v59 = vadd.f32 %v3113_v12, %v5170_v34  ;;  %v3116_v10 = vadd.f32 %v3115_v48, %v3114_v19 }
 0x318   : > { %v3180_v23 = vadd.f32 %v3179_v29, %v3178_v44 }
 0x319   : > { %v5221_v9 = vadd.f32 %v3177_v33, %v2401_v59  ;;  %v2404_v1 = vadd.f32 %v3116_v10, %v5170_v34 }
 0x31b   : > { %v5224_v14 = vadd.f32 %v3180_v23, %v2404_v1  ;;  %v3117_v11 = vpop.f32.mrb[52].mxu0  ;;  %2544 = vadd.xlane.f32.xlu0 %v5221_v9  ;;  %v2568_v31 = vmul.f32 %v5221_v9, %v5221_v9 }
 0x31c   : > { %v3181_v5 = vpop.f32.mrb[52].mxu1  ;;  %v3118_v4 = vpop.f32.mrb[53].mxu0 }
 0x31d   : > { %v3182_v30 = vpop.f32.mrb[53].mxu1  ;;  %v3119_v20 = vadd.f32 %v3118_v4, %v3117_v11  ;;  %v3120_v27 = vpop.f32.mrb[54].mxu0  ;;  %2546 = vadd.xlane.f32.xlu1 %v5224_v14  ;;  %v2569_v46 = vmul.f32 %v5224_v14, %v5224_v14 }
 0x31e   : > { %v3183_v13 = vadd.f32 %v3182_v30, %v3181_v5  ;;  %v3184_v42 = vpop.f32.mrb[54].mxu1  ;;  %v3121_v43 = vpop.f32.mrb[55].mxu0 }
 0x31f   : > { %v3185_v2 = vpop.f32.mrb[55].mxu1  ;;  %v2409_v51 = vadd.f32 %v3119_v20, %v5170_v34  ;;  %v3122_v36 = vadd.f32 %v3121_v43, %v3120_v27  ;;  %2592 = vadd.xlane.f32.xlu0 %v2568_v31 }
 0x320   : > { %v3186_v26 = vadd.f32 %v3185_v2, %v3184_v42 }
 0x321   : > { %v5233_v45 = vadd.f32 %v3183_v13, %v2409_v51  ;;  %v2412_v32 = vadd.f32 %v3122_v36, %v5170_v34  ;;  %2594 = vadd.xlane.f32.xlu1 %v2569_v46 }
 0x323   : > { %v5236_v47 = vadd.f32 %v3186_v26, %v2412_v32  ;;  %v3123_v49 = vpop.f32.mrb[56].mxu0  ;;  %2548 = vadd.xlane.f32.xlu0 %v5233_v45  ;;  %v2570_v61 = vmul.f32 %v5233_v45, %v5233_v45 }
 0x324   : > { %v3187_v35 = vpop.f32.mrb[56].mxu1  ;;  %v3124_v58 = vpop.f32.mrb[57].mxu0 }
 0x325   : > { %v3188_v0 = vpop.f32.mrb[57].mxu1  ;;  %v3125_v18 = vadd.f32 %v3124_v58, %v3123_v49  ;;  %v3126_v28 = vpop.f32.mrb[58].mxu0  ;;  %2550 = vadd.xlane.f32.xlu1 %v5236_v47  ;;  %v2571_v15 = vmul.f32 %v5236_v47, %v5236_v47 }
 0x326   : > { %v3189_v16 = vadd.f32 %v3188_v0, %v3187_v35  ;;  %v3190_v60 = vpop.f32.mrb[58].mxu1  ;;  %v3127_v7 = vpop.f32.mrb[59].mxu0 }
 0x327   : > { %v3191_v22 = vpop.f32.mrb[59].mxu1  ;;  %v2417_v54 = vadd.f32 %v3125_v18, %v5170_v34  ;;  %v3128_v52 = vadd.f32 %v3127_v7, %v3126_v28  ;;  %2596 = vadd.xlane.f32.xlu0 %v2570_v61 }
 0x328   : > { %v3192_v37 = vadd.f32 %v3191_v22, %v3190_v60 }
 0x329   : > { %v5245_v25 = vadd.f32 %v3189_v16, %v2417_v54  ;;  %v2420_v55 = vadd.f32 %v3128_v52, %v5170_v34  ;;  %2598 = vadd.xlane.f32.xlu1 %v2571_v15 }
 0x32b   : > { %v5248_v56 = vadd.f32 %v3192_v37, %v2420_v55  ;;  %2552 = vadd.xlane.f32.xlu0 %v5245_v25  ;;  %v3129_v21 = vpop.f32.mrb[60].mxu0  ;;  %v2572_v33 = vmul.f32 %v5245_v25, %v5245_v25 }
 0x32c   : > { %v3193_v50 = vpop.f32.mrb[60].mxu1  ;;  %v3130_v57 = vpop.f32.mrb[61].mxu0 }
 0x32d   : > { %v3194_v17 = vpop.f32.mrb[61].mxu1  ;;  %v3131_v62 = vadd.f32 %v3130_v57, %v3129_v21  ;;  %2554 = vadd.xlane.f32.xlu1 %v5248_v56  ;;  %v3132_v12 = vpop.f32.mrb[62].mxu0  ;;  %v2573_v10 = vmul.f32 %v5248_v56, %v5248_v56 }
 0x32e   : > { %v3195_v3 = vadd.f32 %v3194_v17, %v3193_v50  ;;  %v3196_v24 = vpop.f32.mrb[62].mxu1  ;;  %v3133_v19 = vpop.f32.mrb[63].mxu0  ;;  %v5273_v50 = vld [vmem:[%s5459_s3] ss:$0 sm:$0xff] }
 0x32f   : > { %v3197_v44 = vpop.f32.mrb[63].mxu1  ;;  %v2425_v48 = vadd.f32 %v3131_v62, %v5170_v34  ;;  %v3134_v29 = vadd.f32 %v3133_v19, %v3132_v12  ;;  %2600 = vadd.xlane.f32.xlu0 %v2572_v33 }
 0x330   : > { %v3198_v59 = vadd.f32 %v3197_v44, %v3196_v24 }
 0x331   : > { %v5257_v23 = vadd.f32 %v3195_v3, %v2425_v48  ;;  %v2428_v1 = vadd.f32 %v3134_v29, %v5170_v34  ;;  %2602 = vadd.xlane.f32.xlu1 %v2573_v10 }
 0x333   : > { %v5260_v11 = vadd.f32 %v3198_v59, %v2428_v1  ;;  %2556 = vadd.xlane.f32.xlu0 %v5257_v23  ;;  %v2574_v5 = vmul.f32 %v5257_v23, %v5257_v23 }
 0x335   : > { %2558 = vadd.xlane.f32.xlu1 %v5260_v11  ;;  %v2575_v4 = vmul.f32 %v5260_v11, %v5260_v11 }
 0x337   : > { %2604 = vadd.xlane.f32.xlu0 %v2574_v5 }
 0x339   : > { %2606 = vadd.xlane.f32.xlu1 %v2575_v4 }
 0x370   : > { %v2529_v30 = vpop.xlane.xlu0 %2528 }
 0x371   : > { %v2608_v20 = vmul.f32 0.0078125, %v2529_v30 }
 0x372   : > { %v2531_v13 = vpop.xlane.xlu1 %2530 }
 0x373   : > { %v2609_v27 = vmul.f32 0.0078125, %v2531_v13  ;;  %v2640_v42 = vmul.f32 %v2608_v20, %v2608_v20  ;;  %v2672_v18 = vsub.f32 %v5174_v41, %v2608_v20 }
 0x374   : > { %v2577_v34 = vpop.xlane.xlu0 %2576 }
 0x375   : > { %v2624_v31 = vmul.f32 0.0078125, %v2577_v34  ;;  %v2641_v2 = vmul.f32 %v2609_v27, %v2609_v27  ;;  %v2673_v7 = vsub.f32 %v5176_v53, %v2609_v27  ;;  %v5279_v53 = vld [vmem:[%s5460_s4] ss:$0 sm:$0xff] }
 0x376   : > { %v2579_v43 = vpop.xlane.xlu1 %2578 }
 0x377   : > { %v2656_v51 = vsub.f32 %v2624_v31, %v2640_v42  ;;  %v2625_v36 = vmul.f32 0.0078125, %v2579_v43 }
 0x379   : > { %v2688_v26 = vadd.f32 1e-06, %v2656_v51  ;;  %v2657_v46 = vsub.f32 %v2625_v36, %v2641_v2 }
 0x37b   : > { %3546 = vrsqrt.f32 %v2688_v26  ;;  %v2689_v32 = vadd.f32 1e-06, %v2657_v46 }
 0x37d   : > { %3548 = vrsqrt.f32 %v2689_v32 }
 0x381   : > { %v2533_v49 = vpop.xlane.xlu0 %2532 }
 0x382   : > { %v2610_v35 = vmul.f32 0.0078125, %v2533_v49 }
 0x383   : > { %v2535_v58 = vpop.xlane.xlu1 %2534 }
 0x384   : > { %v2611_v0 = vmul.f32 0.0078125, %v2535_v58  ;;  %v2642_v60 = vmul.f32 %v2610_v35, %v2610_v35  ;;  %v2674_v30 = vsub.f32 %v5185_v8, %v2610_v35 }
 0x385   : > { %v2581_v16 = vpop.xlane.xlu0 %2580  ;;  %v3547_v28 = vpop.eup %3546 }
 0x386   : > { %v2626_v61 = vmul.f32 0.0078125, %v2581_v16  ;;  %v2720_v22 = vmul.f32 %v3547_v28, %v2672_v18  ;;  %v2643_v37 = vmul.f32 %v2611_v0, %v2611_v0  ;;  %v2675_v42 = vsub.f32 %v5188_v63, %v2611_v0 }
 0x387   : > { %v2583_v54 = vpop.xlane.xlu1 %2582  ;;  %v3549_v52 = vpop.eup %3548 }
 0x388   : > { %v2658_v15 = vsub.f32 %v2626_v61, %v2642_v60  ;;  %v2627_v55 = vmul.f32 0.0078125, %v2583_v54  ;;  %v2736_v21 = vmul.f32 %v5273_v50, %v2720_v22  ;;  %v2721_v41 = vmul.f32 %v3549_v52, %v2673_v7 }
 0x38a   : > { %v2690_v57 = vadd.f32 1e-06, %v2658_v15  ;;  %v2659_v17 = vsub.f32 %v2627_v55, %v2643_v37  ;;  %v2752_v62 = vadd.f32 %v5279_v53, %v2736_v21  ;;  %v2737_v3 = vmul.f32 %v5273_v50, %v2721_v41 }
 0x38c   : > { %3550 = vrsqrt.f32 %v2690_v57  ;;  %v2691_v24 = vadd.f32 1e-06, %v2659_v17  ;;  %v2784_v12 = vmul.f32 0.70710677, %v2752_v62  ;;  %v2753_v33 = vadd.f32 %v5279_v53, %v2737_v3 }
 0x38d   : > { %v2768_v49 = vmul.f32 0.5, %v2752_v62 }
 0x38e   : > { %3552 = vrsqrt.f32 %v2691_v24  ;;  %v2537_v19 = vpop.xlane.xlu0 %2536  ;;  %v2785_v44 = vmul.f32 0.70710677, %v2753_v33  ;;  %v2769_v16 = vmul.f32 0.5, %v2753_v33 }
 0x38f   : > { %3554 = verf.f32 %v2784_v12  ;;  %v2612_v48 = vmul.f32 0.0078125, %v2537_v19 }
 0x390   : > { %v2539_v29 = vpop.xlane.xlu1 %2538  ;;  %3556 = verf.f32 %v2785_v44 }
 0x391   : > { %v2613_v59 = vmul.f32 0.0078125, %v2539_v29  ;;  %v2644_v1 = vmul.f32 %v2612_v48, %v2612_v48  ;;  %v2676_v57 = vsub.f32 %v5197_v40, %v2612_v48 }
 0x392   : > { %v2585_v10 = vpop.xlane.xlu0 %2584 }
 0x393   : > { %v2628_v5 = vmul.f32 0.0078125, %v2585_v10  ;;  %v2645_v20 = vmul.f32 %v2613_v59, %v2613_v59  ;;  %v2677_v12 = vsub.f32 %v5200_v39, %v2613_v59 }
 0x394   : > { %v2587_v4 = vpop.xlane.xlu1 %2586 }
 0x395   : > { %v2660_v13 = vsub.f32 %v2628_v5, %v2644_v1  ;;  %v2629_v27 = vmul.f32 0.0078125, %v2587_v4 }
 0x396   : > { %v3551_v34 = vpop.eup %3550 }
 0x397   : > { %v2722_v31 = vmul.f32 %v3551_v34, %v2674_v30  ;;  %v2692_v43 = vadd.f32 1e-06, %v2660_v13  ;;  %v2661_v2 = vsub.f32 %v2629_v27, %v2645_v20 }
 0x398   : > { %v3553_v51 = vpop.eup %3552 }
 0x399   : > { %v3555_v36 = vpop.eup %3554  ;;  %v2738_v26 = vmul.f32 %v5273_v50, %v2722_v31  ;;  %v2723_v46 = vmul.f32 %v3553_v51, %v2675_v42  ;;  %3558 = vrsqrt.f32 %v2692_v43  ;;  %v2693_v32 = vadd.f32 1e-06, %v2661_v2 }
 0x39a   : > { %v2816_v58 = vadd.f32 1.0, %v3555_v36  ;;  %v3557_v8 = vpop.eup %3556 }
 0x39b   : > { %v2754_v35 = vadd.f32 %v5279_v53, %v2738_v26  ;;  %v2739_v18 = vmul.f32 %v5273_v50, %v2723_v46  ;;  %3560 = vrsqrt.f32 %v2693_v32  ;;  %v2541_v63 = vpop.xlane.xlu0 %2540  ;;  %v2817_v28 = vadd.f32 1.0, %v3557_v8 }
 0x39c   : > { %v2832_v0 = vmul.f32 %v2816_v58, %v2768_v49  ;;  %v5289_v60 = vmul.f32 0.0078125, %v2541_v63 }
 0x39d   : > { %v2786_v61 = vmul.f32 0.70710677, %v2754_v35  ;;  %v2755_v7 = vadd.f32 %v5279_v53, %v2739_v18  ;;  %v2543_v22 = vpop.xlane.xlu1 %2542  ;;  %v2833_v54 = vmul.f32 %v2817_v28, %v2769_v16  ;;  %v2770_v39 = vmul.f32 0.5, %v2754_v35 }
 0x39e   : > { %2848 = vst [vmem:[%s3868_s18] sm:$0xff] %v2832_v0  ;;  %v5293_v52 = vmul.f32 0.0078125, %v2543_v22  ;;  %v2646_v55 = vmul.f32 %v5289_v60, %v5289_v60  ;;  %v2678_v58 = vsub.f32 %v5209_v6, %v5289_v60 }
 0x39f   : > { %3562 = verf.f32 %v2786_v61  ;;  %v2787_v37 = vmul.f32 0.70710677, %v2755_v7  ;;  %v2589_v15 = vpop.xlane.xlu0 %2588  ;;  %2849 = vst [vmem:[%s3868_s18 + $0x8] sm:$0xff] %v2833_v54  ;;  %v2771_v2 = vmul.f32 0.5, %v2755_v7 }
 0x3a0   : > { %v2630_v21 = vmul.f32 0.0078125, %v2589_v15  ;;  %v2647_v17 = vmul.f32 %v5293_v52, %v5293_v52  ;;  %v2679_v28 = vsub.f32 %v5212_v38, %v5293_v52 }
 0x3a1   : > { %3564 = verf.f32 %v2787_v37  ;;  %v2591_v41 = vpop.xlane.xlu1 %2590 }
 0x3a2   : > { %v2662_v62 = vsub.f32 %v2630_v21, %v2646_v55  ;;  %v2631_v3 = vmul.f32 0.0078125, %v2591_v41 }
 0x3a3   : > { %v3559_v24 = vpop.eup %3558 }
 0x3a4   : > { %v2724_v33 = vmul.f32 %v3559_v24, %v2676_v57  ;;  %v2694_v19 = vadd.f32 1e-06, %v2662_v62  ;;  %v2663_v44 = vsub.f32 %v2631_v3, %v2647_v17 }
 0x3a5   : > { %v3561_v29 = vpop.eup %3560 }
 0x3a6   : > { %v2740_v10 = vmul.f32 %v5273_v50, %v2724_v33  ;;  %v2725_v1 = vmul.f32 %v3561_v29, %v2677_v12  ;;  %3566 = vrsqrt.f32 %v2694_v19  ;;  %v2695_v5 = vadd.f32 1e-06, %v2663_v44 }
 0x3a8   : > { %v2756_v4 = vadd.f32 %v5279_v53, %v2740_v10  ;;  %v2741_v40 = vmul.f32 %v5273_v50, %v2725_v1  ;;  %3568 = vrsqrt.f32 %v2695_v5  ;;  %v2545_v48 = vpop.xlane.xlu0 %2544 }
 0x3a9   : > { %v3563_v30 = vpop.eup %3562  ;;  %v5305_v20 = vmul.f32 0.0078125, %v2545_v48 }
 0x3aa   : > { %v2818_v59 = vadd.f32 1.0, %v3563_v30  ;;  %v2788_v13 = vmul.f32 0.70710677, %v2756_v4  ;;  %v2757_v27 = vadd.f32 %v5279_v53, %v2741_v40  ;;  %v2547_v34 = vpop.xlane.xlu1 %2546  ;;  %v2772_v24 = vmul.f32 0.5, %v2756_v4 }
 0x3ab   : > { %v3565_v42 = vpop.eup %3564  ;;  %v5308_v31 = vmul.f32 0.0078125, %v2547_v34  ;;  %v2648_v46 = vmul.f32 %v5305_v20, %v5305_v20 }
 0x3ac   : > { %v2834_v43 = vmul.f32 %v2818_v59, %v2770_v39  ;;  %v2819_v51 = vadd.f32 1.0, %v3565_v42  ;;  %3570 = verf.f32 %v2788_v13  ;;  %v2593_v36 = vpop.xlane.xlu0 %2592  ;;  %v2789_v26 = vmul.f32 0.70710677, %v2757_v27 }
 0x3ad   : > { %v2632_v32 = vmul.f32 0.0078125, %v2593_v36  ;;  %v2649_v35 = vmul.f32 %v5308_v31, %v5308_v31  ;;  %v2773_v48 = vmul.f32 0.5, %v2757_v27 }
 0x3ae   : > { %2850 = vst [vmem:[%s3868_s18 + $0x10] sm:$0xff] %v2834_v43  ;;  %v2835_v49 = vmul.f32 %v2819_v51, %v2771_v2  ;;  %v2595_v8 = vpop.xlane.xlu1 %2594  ;;  %3572 = verf.f32 %v2789_v26  ;;  %v2680_v2 = vsub.f32 %v5221_v9, %v5305_v20 }
 0x3af   : > { %v2664_v18 = vsub.f32 %v2632_v32, %v2648_v46  ;;  %v2633_v63 = vmul.f32 0.0078125, %v2595_v8  ;;  %v2681_v32 = vsub.f32 %v5224_v14, %v5308_v31 }
 0x3b0   : > { %v3567_v0 = vpop.eup %3566  ;;  %2851 = vst [vmem:[%s3868_s18 + $0x18] sm:$0xff] %v2835_v49  ;;  %v2549_v16 = vpop.xlane.xlu0 %2548 }
 0x3b1   : > { %v2726_v61 = vmul.f32 %v3567_v0, %v2678_v58  ;;  %v2696_v7 = vadd.f32 1e-06, %v2664_v18  ;;  %v2665_v22 = vsub.f32 %v2633_v63, %v2649_v35  ;;  %v5320_v37 = vmul.f32 0.0078125, %v2549_v16 }
 0x3b2   : > { %v3569_v54 = vpop.eup %3568  ;;  %v2551_v6 = vpop.xlane.xlu1 %2550 }
 0x3b3   : > { %v2742_v60 = vmul.f32 %v5273_v50, %v2726_v61  ;;  %v2727_v15 = vmul.f32 %v3569_v54, %v2679_v28  ;;  %3574 = vrsqrt.f32 %v2696_v7  ;;  %v2697_v55 = vadd.f32 1e-06, %v2665_v22 }
 0x3b4   : > { %v5323_v21 = vmul.f32 0.0078125, %v2551_v6  ;;  %v2597_v41 = vpop.xlane.xlu0 %2596  ;;  %v2650_v62 = vmul.f32 %v5320_v37, %v5320_v37  ;;  %v2682_v54 = vsub.f32 %v5233_v45, %v5320_v37 }
 0x3b5   : > { %v2758_v57 = vadd.f32 %v5279_v53, %v2742_v60  ;;  %v2743_v17 = vmul.f32 %v5273_v50, %v2727_v15  ;;  %3576 = vrsqrt.f32 %v2697_v55  ;;  %v2634_v38 = vmul.f32 0.0078125, %v2597_v41 }
 0x3b6   : > { %v3571_v52 = vpop.eup %3570  ;;  %v2599_v3 = vpop.xlane.xlu1 %2598  ;;  %v2651_v44 = vmul.f32 %v5323_v21, %v5323_v21 }
 0x3b7   : > { %v2820_v12 = vadd.f32 1.0, %v3571_v52  ;;  %v2790_v33 = vmul.f32 0.70710677, %v2758_v57  ;;  %v2759_v19 = vadd.f32 %v5279_v53, %v2743_v17  ;;  %v2666_v29 = vsub.f32 %v2634_v38, %v2650_v62 }
 0x3b8   : > { %v2635_v10 = vmul.f32 0.0078125, %v2599_v3  ;;  %v2553_v1 = vpop.xlane.xlu0 %2552  ;;  %v3573_v5 = vpop.eup %3572  ;;  %v2774_v60 = vmul.f32 0.5, %v2758_v57 }
 0x3b9   : > { %v2836_v40 = vmul.f32 %v2820_v12, %v2772_v24  ;;  %3578 = verf.f32 %v2790_v33  ;;  %v2791_v30 = vmul.f32 0.70710677, %v2759_v19  ;;  %v2821_v39 = vadd.f32 1.0, %v3573_v5 }
 0x3ba   : > { %v2698_v59 = vadd.f32 1e-06, %v2666_v29  ;;  %v2667_v4 = vsub.f32 %v2635_v10, %v2651_v44  ;;  %v5332_v13 = vmul.f32 0.0078125, %v2553_v1  ;;  %v2555_v34 = vpop.xlane.xlu1 %2554  ;;  %v2775_v52 = vmul.f32 0.5, %v2759_v19 }
 0x3bb   : > { %2852 = vst [vmem:[%s3868_s18 + $0x20] sm:$0xff] %v2836_v40  ;;  %3580 = verf.f32 %v2791_v30  ;;  %v5335_v42 = vmul.f32 0.0078125, %v2555_v34  ;;  %v2837_v43 = vmul.f32 %v2821_v39, %v2773_v48  ;;  %v2683_v44 = vsub.f32 %v5236_v47, %v5323_v21 }
 0x3bc   : > { %3582 = vrsqrt.f32 %v2698_v59  ;;  %v2699_v51 = vadd.f32 1e-06, %v2667_v4  ;;  %v2601_v27 = vpop.xlane.xlu0 %2600  ;;  %v2652_v26 = vmul.f32 %v5332_v13, %v5332_v13  ;;  %v2684_v21 = vsub.f32 %v5245_v25, %v5332_v13 }
 0x3bd   : > { %v3575_v36 = vpop.eup %3574  ;;  %v2636_v46 = vmul.f32 0.0078125, %v2601_v27  ;;  %2853 = vst [vmem:[%s3868_s18 + $0x28] sm:$0xff] %v2837_v43  ;;  %v2653_v35 = vmul.f32 %v5335_v42, %v5335_v42  ;;  %v2685_v27 = vsub.f32 %v5248_v56, %v5335_v42 }
 0x3be   : > { %v2728_v49 = vmul.f32 %v3575_v36, %v2680_v2  ;;  %3584 = vrsqrt.f32 %v2699_v51  ;;  %v2603_v58 = vpop.xlane.xlu1 %2602 }
 0x3bf   : > { %v3577_v8 = vpop.eup %3576  ;;  %v2668_v9 = vsub.f32 %v2636_v46, %v2652_v26  ;;  %v2637_v20 = vmul.f32 0.0078125, %v2603_v58 }
 0x3c0   : > { %v2744_v18 = vmul.f32 %v5273_v50, %v2728_v49  ;;  %v2729_v63 = vmul.f32 %v3577_v8, %v2681_v32  ;;  %v2557_v0 = vpop.xlane.xlu0 %2556 }
 0x3c1   : > { %v2700_v16 = vadd.f32 1e-06, %v2668_v9  ;;  %v2669_v28 = vsub.f32 %v2637_v20, %v2653_v35  ;;  %v5349_v14 = vmul.f32 0.0078125, %v2557_v0 }
 0x3c2   : > { %v2760_v61 = vadd.f32 %v5279_v53, %v2744_v18  ;;  %v2745_v7 = vmul.f32 %v5273_v50, %v2729_v63  ;;  %v2559_v31 = vpop.xlane.xlu1 %2558 }
 0x3c3   : > { %v3579_v22 = vpop.eup %3578  ;;  %3586 = vrsqrt.f32 %v2700_v16  ;;  %v2701_v6 = vadd.f32 1e-06, %v2669_v28  ;;  %v5354_v62 = vmul.f32 0.0078125, %v2559_v31  ;;  %v2654_v45 = vmul.f32 %v5349_v14, %v5349_v14 }
 0x3c4   : > { %v2822_v15 = vadd.f32 1.0, %v3579_v22  ;;  %v2792_v55 = vmul.f32 0.70710677, %v2760_v61  ;;  %v2761_v41 = vadd.f32 %v5279_v53, %v2745_v7  ;;  %v2605_v17 = vpop.xlane.xlu0 %2604  ;;  %v2776_v25 = vmul.f32 0.5, %v2760_v61 }
 0x3c5   : > { %v3581_v38 = vpop.eup %3580  ;;  %3588 = vrsqrt.f32 %v2701_v6  ;;  %v2638_v3 = vmul.f32 0.0078125, %v2605_v17  ;;  %v2655_v1 = vmul.f32 %v5354_v62, %v5354_v62  ;;  %v2686_v0 = vsub.f32 %v5257_v23, %v5349_v14 }
 0x3c6   : > { %v3583_v24 = vpop.eup %3582  ;;  %v2838_v12 = vmul.f32 %v2822_v15, %v2774_v60  ;;  %v2823_v33 = vadd.f32 1.0, %v3581_v38  ;;  %3590 = verf.f32 %v2792_v55  ;;  %v2607_v37 = vpop.xlane.xlu1 %2606  ;;  %v2793_v57 = vmul.f32 0.70710677, %v2761_v41 }
 0x3c7   : > { %v2730_v29 = vmul.f32 %v3583_v24, %v2682_v54  ;;  %v2670_v5 = vsub.f32 %v2638_v3, %v2654_v45  ;;  %v2639_v40 = vmul.f32 0.0078125, %v2607_v37  ;;  %v2777_v42 = vmul.f32 0.5, %v2761_v41 }
 0x3c8   : > { %v3585_v10 = vpop.eup %3584  ;;  %2854 = vst [vmem:[%s3868_s18 + $0x30] sm:$0xff] %v2838_v12  ;;  %v2839_v19 = vmul.f32 %v2823_v33, %v2775_v52  ;;  %3592 = verf.f32 %v2793_v57  ;;  %v2687_v7 = vsub.f32 %v5260_v11, %v5354_v62 }
 0x3c9   : > { %v2746_v48 = vmul.f32 %v5273_v50, %v2730_v29  ;;  %v2731_v30 = vmul.f32 %v3585_v10, %v2683_v44  ;;  %v2702_v39 = vadd.f32 1e-06, %v2670_v5  ;;  %v2671_v59 = vsub.f32 %v2639_v40, %v2655_v1 }
 0x3ca   : > { %2855 = vst [vmem:[%s3868_s18 + $0x38] sm:$0xff] %v2839_v19 }
 0x3cb   : > { %v2762_v4 = vadd.f32 %v5279_v53, %v2746_v48  ;;  %v2747_v47 = vmul.f32 %v5273_v50, %v2731_v30  ;;  %3594 = vrsqrt.f32 %v2702_v39  ;;  %v2703_v34 = vadd.f32 1e-06, %v2671_v59 }
 0x3cd   : > { %v3587_v43 = vpop.eup %3586  ;;  %v2794_v2 = vmul.f32 0.70710677, %v2762_v4  ;;  %v2763_v51 = vadd.f32 %v5279_v53, %v2747_v47  ;;  %3596 = vrsqrt.f32 %v2703_v34  ;;  %v2778_v15 = vmul.f32 0.5, %v2762_v4 }
 0x3ce   : > { %v2732_v36 = vmul.f32 %v3587_v43, %v2684_v21 }
 0x3cf   : > { %v3589_v26 = vpop.eup %3588  ;;  %3598 = verf.f32 %v2794_v2  ;;  %v2795_v46 = vmul.f32 0.70710677, %v2763_v51  ;;  %v2779_v38 = vmul.f32 0.5, %v2763_v51 }
 0x3d0   : > { %v3591_v32 = vpop.eup %3590  ;;  %v2748_v49 = vmul.f32 %v5273_v50, %v2732_v36  ;;  %v2733_v58 = vmul.f32 %v3589_v26, %v2685_v27 }
 0x3d1   : > { %v2824_v13 = vadd.f32 1.0, %v3591_v32  ;;  %3600 = verf.f32 %v2795_v46 }
 0x3d2   : > { %v2764_v8 = vadd.f32 %v5279_v53, %v2748_v49  ;;  %v2749_v35 = vmul.f32 %v5273_v50, %v2733_v58  ;;  %v3593_v9 = vpop.eup %3592 }
 0x3d3   : > { %v2840_v56 = vmul.f32 %v2824_v13, %v2776_v25  ;;  %v2825_v20 = vadd.f32 1.0, %v3593_v9 }
 0x3d4   : > { %v2796_v18 = vmul.f32 0.70710677, %v2764_v8  ;;  %v2765_v63 = vadd.f32 %v5279_v53, %v2749_v35  ;;  %v2780_v33 = vmul.f32 0.5, %v2764_v8 }
 0x3d5   : > { %2856 = vst [vmem:[%s3868_s18 + $0x40] sm:$0xff] %v2840_v56  ;;  %v3595_v16 = vpop.eup %3594  ;;  %v2841_v28 = vmul.f32 %v2825_v20, %v2777_v42 }
 0x3d6   : > { %3602 = verf.f32 %v2796_v18  ;;  %v2797_v61 = vmul.f32 0.70710677, %v2765_v63  ;;  %v2734_v31 = vmul.f32 %v3595_v16, %v2686_v0  ;;  %v2781_v57 = vmul.f32 0.5, %v2765_v63 }
 0x3d7   : > { %v3597_v22 = vpop.eup %3596  ;;  %2857 = vst [vmem:[%s3868_s18 + $0x48] sm:$0xff] %v2841_v28 }
 0x3d8   : > { %3604 = verf.f32 %v2797_v61  ;;  %v2750_v6 = vmul.f32 %v5273_v50, %v2734_v31  ;;  %v2735_v60 = vmul.f32 %v3597_v22, %v2687_v7 }
 0x3d9   : > { %v3599_v54 = vpop.eup %3598 }
 0x3da   : > { %v2826_v55 = vadd.f32 1.0, %v3599_v54  ;;  %v2766_v14 = vadd.f32 %v5279_v53, %v2750_v6  ;;  %v2751_v41 = vmul.f32 %v5273_v50, %v2735_v60 }
 0x3db   : > { %v3601_v23 = vpop.eup %3600 }
 0x3dc   : > { %v2842_v17 = vmul.f32 %v2826_v55, %v2778_v15  ;;  %v2827_v11 = vadd.f32 1.0, %v3601_v23  ;;  %v2798_v52 = vmul.f32 0.70710677, %v2766_v14  ;;  %v2767_v62 = vadd.f32 %v5279_v53, %v2751_v41 }
 0x3dd   : > { %v2782_v10 = vmul.f32 0.5, %v2766_v14 }
 0x3de   : > { %2858 = vst [vmem:[%s3868_s18 + $0x50] sm:$0xff] %v2842_v17  ;;  %v2843_v3 = vmul.f32 %v2827_v11, %v2779_v38  ;;  %3606 = verf.f32 %v2798_v52  ;;  %v2799_v24 = vmul.f32 0.70710677, %v2767_v62  ;;  %v2783_v40 = vmul.f32 0.5, %v2767_v62 }
 0x3e0   : > { %v3603_v12 = vpop.eup %3602  ;;  %2859 = vst [vmem:[%s3868_s18 + $0x58] sm:$0xff] %v2843_v3  ;;  %3608 = verf.f32 %v2799_v24 }
 0x3e1   : > { %v2828_v45 = vadd.f32 1.0, %v3603_v12 }
 0x3e2   : > { %v3605_v50 = vpop.eup %3604 }
 0x3e3   : > { %v2844_v37 = vmul.f32 %v2828_v45, %v2780_v33  ;;  %v2829_v44 = vadd.f32 1.0, %v3605_v50 }
 0x3e5   : > { %2860 = vst [vmem:[%s3868_s18 + $0x60] sm:$0xff] %v2844_v37  ;;  %v2845_v53 = vmul.f32 %v2829_v44, %v2781_v57 }
 0x3e7   : > { %2861 = vst [vmem:[%s3868_s18 + $0x68] sm:$0xff] %v2845_v53 }
 0x3e8   : > { %v3607_v29 = vpop.eup %3606 }
 0x3e9   : > { %v2830_v19 = vadd.f32 1.0, %v3607_v29 }
 0x3ea   : > { %v3609_v1 = vpop.eup %3608 }
 0x3eb   : > { %v2846_v5 = vmul.f32 %v2830_v19, %v2782_v10  ;;  %v2831_v48 = vadd.f32 1.0, %v3609_v1 }
 0x3ed   : > { %2862 = vst [vmem:[%s3868_s18 + $0x70] sm:$0xff] %v2846_v5  ;;  %v2847_v30 = vmul.f32 %v2831_v48, %v2783_v40 }
 0x3ef   : > { %2863 = vst [vmem:[%s3868_s18 + $0x78] sm:$0xff] %v2847_v30 }
 0x3f0   : > { %3625 = shalt.err (!%p3622_p9)
}
 0x3f1   : > { %s3626_s18 = scalar_lea.hbm %s5396_s13, 2048  ;;  %s3630_s28 = scalar_lea.hbm %s5465_s9, 8192 }
 0x3f2   : > { %p3627_p10 = scmp.ne.s32.totalorder %s5396_s13, %s3626_s18  ;;  %p3631_p13 = scmp.lt.u32.totalorder %s5396_s13, %s5465_s9 }
 0x3f3   : > { %p3632_p0 = scmp.lt.u32.totalorder %s3630_s28, %s3626_s18  ;;  %p3634_p2 = scmp.lt.u32.totalorder %s3626_s18, %s5396_s13 }
 0x3f4   : > { %p3628_p11 = pnand %p3627_p10, %p3814_p3 }
 0x3f5   : > { %p3633_p1 = por %p3632_p0, %p3631_p13 }
 0x3f6   : > { %p3629_p12 = pneg %p3628_p11 }
 0x3f7   : > { %p3635_p4 = por %p3634_p2, %p3633_p1 }
 0x3f9   : > { %p3636_p5 = pnand %p3635_p4, %p3629_p12 }
 0x3fb   : > { %3639 = shalt.err (!%p3636_p5)
}
 0x3fc   : > { %s3711_s26 = smov 128   ;;  %s3712_s17 = smov 8  }
 0x3fd   : > { %3199 = dma.vmem_to_hbm [thread:$0]  (%p3814_p3), %s5398_s20, 2048, %s5396_s13, %s5404_s1, %s3711_s26, %s3711_s26, %s3712_s17  }
 0x3fe PF: > { %p3205_p6 = scmp.ge.s32.totalorder %s3706_s16, 2  ;;  %s2896_s29 = sand.u32 1, %s3678_s30  }
 0x3ff   : > { %s2897_s21 = scalar_lea.sflag [#allocation4], %s2896_s29 }
 0x400   : > { %p3202_p7 = pnand %p3205_p6, %p3823_p8 }
 0x402   : > { %3673 = dma.done.wait (!%p3202_p7), %s2897_s21, 2048  }
 0x403   : > { %3675 = vsyncadd (!%p3202_p7), %s2897_s21, 4294965248  ;;  %s22_s16 = sadd.s32 1, %s3706_s16   ;;  %s5477_s22 = sld [smem:[#allocation6_spill]] }
 0x404   : > { %p19_p9 = scmp.ge.s32.totalorder %s22_s16, 6   ;;  %s5478_s30 = smov %s3682_s10 }
 0x405   : > { %s5479_s10 = smov %s3686_s11  ;;  %s5480_s11 = smov %s3832_s27 }
 0x406   : > { %s5481_s12 = smov %s3698_s14  ;;  %s5482_s13 = smov %s3702_s15 }
 0x407   : > { %s5483_s14 = smov %s5486_s19  ;;  %21 = sbr.rel (!%p19_p9) target bundleno = 8 (0x8), region = 105 }
 0x409   : > { %s5484_s15 = smov %s5477_s22 }
 0x40e   :  { %2902 = vsyncpa [#allocation4], 1 }
 0x40f   :  { %2904 = vsyncpa [#allocation4 + $0x1], 1 }

</bundles_post_ra>
